<compile_context>
chip_gen: v5e
topology: v5e:2x2
jax: 0.10.0
libtpu: 0.0.40
codegen_flags: <defaults>
</compile_context>

<pallas_src>
import jax
import jax.numpy as jnp
from jax import lax
from jax.experimental import pallas as pl
from jax.experimental.pallas import tpu as pltpu

_EPS = 1e-5


# ---------------------------------------------------------------------------
# In-kernel building blocks
# ---------------------------------------------------------------------------
def _conv3x3_bn_relu_tile(x, w_k, scale, bias):
    """3x3 conv (+folded BN +ReLU) of a (nb, H, W, C) tile.

    One im2col matmul (nb*H*W, 9C) @ (9C, Cout), bf16 operands, f32 accumulate.
    The zero halo is built in registers (no HBM pad pass).
    Returns (nb*H*W, Cout) float32.
    """
    nb, H, W, C = x.shape
    zw = jnp.zeros((nb, H, 1, C), x.dtype)
    xp = jnp.concatenate([zw, x, zw], axis=2)               # pad W -> W + 2
    zh = jnp.zeros((nb, 1, W + 2, C), x.dtype)
    xp = jnp.concatenate([zh, xp, zh], axis=1)              # pad H -> H + 2
    cols = [xp[:, dy:dy + H, dx:dx + W, :].reshape(nb * H * W, C)
            for dy in range(3) for dx in range(3)]
    patches = jnp.concatenate(cols, axis=-1).astype(jnp.bfloat16)   # (M, 9C)
    acc = jnp.dot(patches, w_k, preferred_element_type=jnp.float32)
    return jnp.maximum(acc * scale + bias, 0.0)


def _conv1x1_bn_relu_tile(x2d, w_k, scale, bias):
    acc = jnp.dot(x2d.astype(jnp.bfloat16), w_k,
                  preferred_element_type=jnp.float32)
    return jnp.maximum(acc * scale + bias, 0.0)


# ---------------------------------------------------------------------------
# Pallas kernels
# ---------------------------------------------------------------------------
def _output_block_ts_kernel(x_ref, m_ref,
                            w3a_ref, s3a_ref, b3a_ref,
                            w3b_ref, s3b_ref, b3b_ref,
                            w1a_ref, s1a_ref, b1a_ref,
                            w1b_ref, s1b_ref, b1b_ref,
                            o_ref):
    nb, H, W, C = x_ref.shape
    M = nb * H * W
    x = x_ref[...].astype(jnp.float32)                      # (nb, H, W, C)

    # conv branch: 3x3 -> BN -> ReLU -> 3x3 -> BN -> ReLU (im2col matmuls)
    h = _conv3x3_bn_relu_tile(x, w3a_ref[...], s3a_ref[...], b3a_ref[...])
    cout = h.shape[-1]
    h = _conv3x3_bn_relu_tile(h.reshape(nb, H, W, cout),
                              w3b_ref[...], s3b_ref[...], b3b_ref[...])

    # conv_1x1 branch (same input tile -> no extra HBM pass, pure matmuls)
    t = _conv1x1_bn_relu_tile(x.reshape(M, C), w1a_ref[...],
                              s1a_ref[...], b1a_ref[...])
    x1 = _conv1x1_bn_relu_tile(t, w1b_ref[...], s1b_ref[...], b1b_ref[...])

    # masked residual combine; store transposed (Cout, M) -> lane-dense stores
    y = h * m_ref[...] + x1                                  # (M, cout)
    o_ref[...] = y.T


def _output_block_sf_kernel(x_ref,
                            w3a_ref, s3a_ref, b3a_ref,
                            w3b_ref, s3b_ref, b3b_ref,
                            o_ref):
    nb, H, W, C = x_ref.shape
    x = x_ref[...].astype(jnp.float32)
    h = _conv3x3_bn_relu_tile(x, w3a_ref[...], s3a_ref[...], b3a_ref[...])
    cout = h.shape[-1]
    h = _conv3x3_bn_relu_tile(h.reshape(nb, H, W, cout),
                              w3b_ref[...], s3b_ref[...], b3b_ref[...])
    o_ref[...] = h.T


# ---------------------------------------------------------------------------
# pallas_call wrappers
# ---------------------------------------------------------------------------
_COMPILER_PARAMS = pltpu.CompilerParams(
    dimension_semantics=("parallel",),
    vmem_limit_bytes=48 * 1024 * 1024,   # explicit budget; safe on v5e/v6e/v7x
)


def _pick_images_per_block(n, hw, target_rows=1024):
    """Images per grid step: enough rows (M = nb*H*W) to feed the MXU, but keep
    >= 2 grid steps when possible (megacore / pipelining). nb must divide n and
    keep the transposed output block a multiple of 128 lanes (or be the full
    batch, which is always a legal block)."""
    want = min(n, max(1, -(-target_rows // hw)))
    if n >= 2:
        want = min(want, max(1, n // 2))
    for nb in range(want, 0, -1):
        if n % nb == 0 and (nb * hw) % 128 == 0:
            return nb
    return n


def _full(shape):
    return pl.BlockSpec(shape, lambda n: (0,) * len(shape))


def _conv_param_specs(k, cout):
    return [_full((k, cout)), _full((1, cout)), _full((1, cout))]


def _run_ts(xcat, mask_col, kp, cout):
    N, H, W, C = xcat.shape
    nb = _pick_images_per_block(N, H * W)
    mblk = nb * H * W
    in_specs = [
        pl.BlockSpec((nb, H, W, C), lambda n: (n, 0, 0, 0)),
        pl.BlockSpec((mblk, 1), lambda n: (n, 0)),
    ]
    in_specs += _conv_param_specs(9 * C, cout)       # conv3x3 a
    in_specs += _conv_param_specs(9 * cout, cout)    # conv3x3 b
    in_specs += _conv_param_specs(C, cout)           # conv1x1 a
    in_specs += _conv_param_specs(cout, cout)        # conv1x1 b
    return pl.pallas_call(
        _output_block_ts_kernel,
        out_shape=jax.ShapeDtypeStruct((cout, N * H * W), jnp.float32),
        grid=(N // nb,),
        in_specs=in_specs,
        out_specs=pl.BlockSpec((cout, mblk), lambda n: (0, n)),
        compiler_params=_COMPILER_PARAMS,
    )(xcat, mask_col,
      kp["w3a"], kp["s3a"], kp["b3a"],
      kp["w3b"], kp["s3b"], kp["b3b"],
      kp["w1a"], kp["s1a"], kp["b1a"],
      kp["w1b"], kp["s1b"], kp["b1b"])


def _run_sf(xcat, kp, cout):
    N, H, W, C = xcat.shape
    nb = _pick_images_per_block(N, H * W)
    mblk = nb * H * W
    in_specs = [pl.BlockSpec((nb, H, W, C), lambda n: (n, 0, 0, 0))]
    in_specs += _conv_param_specs(9 * C, cout)
    in_specs += _conv_param_specs(9 * cout, cout)
    return pl.pallas_call(
        _output_block_sf_kernel,
        out_shape=jax.ShapeDtypeStruct((cout, N * H * W), jnp.float32),
        grid=(N // nb,),
        in_specs=in_specs,
        out_specs=pl.BlockSpec((cout, mblk), lambda n: (0, n)),
        compiler_params=_COMPILER_PARAMS,
    )(xcat, kp["w3a"], kp["s3a"], kp["b3a"], kp["w3b"], kp["s3b"], kp["b3b"])


# ---------------------------------------------------------------------------
# Parameter prep (PyTorch-layout weights -> kernel layout, bf16)
# ---------------------------------------------------------------------------
def _prep_conv3x3_weight(w_oihw):
    o, i, kh, kw = w_oihw.shape
    # OIHW -> (kh*kw*I, O), matching im2col patch order (dy, dx, c)
    return (jnp.transpose(w_oihw, (2, 3, 1, 0))
            .reshape(kh * kw * i, o).astype(jnp.bfloat16))


def _prep_conv1x1_weight(w_oihw):
    return jnp.transpose(w_oihw[:, :, 0, 0], (1, 0)).astype(jnp.bfloat16)


def _prep_kernel_params(params):
    cout = params["w3a"].shape[0]
    kp = {
        "w3a": _prep_conv3x3_weight(params["w3a"]),
        "w3b": _prep_conv3x3_weight(params["w3b"]),
        "w1a": _prep_conv1x1_weight(params["w1a"]),
        "w1b": _prep_conv1x1_weight(params["w1b"]),
    }
    for k in ("s3a", "b3a", "s3b", "b3b", "s1a", "b1a", "s1b", "b1b"):
        kp[k] = params[k].reshape(1, cout).astype(jnp.float32)
    return kp, cout


# ---------------------------------------------------------------------------
# Plain-JAX glue (fused by XLA under jit): bilinear resize matching torch
# align_corners=False, upsample+crop+concat in NHWC
# ---------------------------------------------------------------------------
def _resize_axis(out_size, in_size):
    scale = in_size / out_size
    src = (jnp.arange(out_size, dtype=jnp.float32) + 0.5) * scale - 0.5
    src = jnp.maximum(src, 0.0)                     # torch clamps src < 0 to 0
    i0 = jnp.minimum(jnp.floor(src).astype(jnp.int32), in_size - 1)
    i1 = jnp.minimum(i0 + 1, in_size - 1)
    w1 = src - i0.astype(jnp.float32)
    return i0, i1, 1.0 - w1, w1


def _bilinear_resize_nhwc(x, out_h, out_w):
    i0, i1, h0, h1 = _resize_axis(out_h, x.shape[1])
    j0, j1, v0, v1 = _resize_axis(out_w, x.shape[2])
    r = (x[:, i0] * h0[None, :, None, None]
         + x[:, i1] * h1[None, :, None, None])
    return (r[:, :, j0] * v0[None, None, :, None]
            + r[:, :, j1] * v1[None, None, :, None])


def _upsample_crop_concat_nhwc(x_nchw, s_nchw):
    x = jnp.transpose(x_nchw, (0, 2, 3, 1))
    s = jnp.transpose(s_nchw, (0, 2, 3, 1))
    H, W = s.shape[1], s.shape[2]
    xu = _bilinear_resize_nhwc(x, 2 * x.shape[1], 2 * x.shape[2])[:, :H, :W, :]
    return jnp.concatenate([xu, s], axis=-1)


# ---------------------------------------------------------------------------
# OutputBlock forward
# ---------------------------------------------------------------------------
@jax.jit
def _forward_time_series(params, x, s, inc_mask):
    B, T = s.shape[0], s.shape[1]
    x = x.reshape((B * T,) + x.shape[2:])
    s = s.reshape((B * T,) + s.shape[2:])
    N, _, H, W = s.shape
    xcat = _upsample_crop_concat_nhwc(x, s)                  # (N, H, W, C)
    mask = _bilinear_resize_nhwc(jnp.transpose(inc_mask, (0, 2, 3, 1)), H, W)
    mask_col = mask.reshape(N * H * W, 1)
    kp, cout = _prep_kernel_params(params)
    out2d = _run_ts(xcat, mask_col, kp, cout)                # (cout, N*H*W)
    out = out2d.reshape(cout, N, H, W).transpose(1, 0, 2, 3)
    return out.reshape((B, T, cout, H, W))


@jax.jit
def _forward_single_frame(params, x, s):
    N, _, H, W = s.shape
    xcat = _upsample_crop_concat_nhwc(x, s)
    kp, cout = _prep_kernel_params(params)
    out2d = _run_sf(xcat, kp, cout)
    return out2d.reshape(cout, N, H, W).transpose(1, 0, 2, 3)


def output_block_forward(params, x, s, inc_mask=None):
    if x.ndim == 5:
        return _forward_time_series(params, x, s, inc_mask)
    return _forward_single_frame(params, x, s)


# ---------------------------------------------------------------------------
# Deterministic parameter init (eval-mode BN folded into scale/bias)
# ---------------------------------------------------------------------------
def _fold_bn(key, c):
    k1, k2, k3, k4 = jax.random.split(key, 4)
    gamma = jax.random.uniform(k1, (c,), jnp.float32, 0.5, 1.5)
    beta = 0.1 * jax.random.normal(k2, (c,), jnp.float32)
    mean = 0.1 * jax.random.normal(k3, (c,), jnp.float32)
    var = jax.random.uniform(k4, (c,), jnp.float32, 0.5, 1.5)
    scale = gamma / jnp.sqrt(var + _EPS)
    return scale, beta - mean * scale


def make_params(key, in_ch, src_ch, out_ch):
    cin = in_ch + src_ch
    ks = jax.random.split(key, 8)
    p = {}
    p["w3a"] = 0.3 * jax.random.normal(ks[0], (out_ch, cin, 3, 3), jnp.float32)
    p["s3a"], p["b3a"] = _fold_bn(ks[1], out_ch)
    p["w3b"] = 0.3 * jax.random.normal(ks[2], (out_ch, out_ch, 3, 3), jnp.float32)
    p["s3b"], p["b3b"] = _fold_bn(ks[3], out_ch)
    p["w1a"] = 0.3 * jax.random.normal(ks[4], (out_ch, cin, 1, 1), jnp.float32)
    p["s1a"], p["b1a"] = _fold_bn(ks[5], out_ch)
    p["w1b"] = 0.3 * jax.random.normal(ks[6], (out_ch, out_ch, 1, 1), jnp.float32)
    p["s1b"], p["b1b"] = _fold_bn(ks[7], out_ch)
    return p


# ---------------------------------------------------------------------------
# Precision-matched lax.conv reference (bf16 operands, f32 accumulation)
# ---------------------------------------------------------------------------
def _ref_conv_bf16(x_nchw, w_oihw, pad):
    return lax.conv_general_dilated(
        x_nchw.astype(jnp.bfloat16), w_oihw.astype(jnp.bfloat16),
        window_strides=(1, 1), padding=[(pad, pad), (pad, pad)],
        dimension_numbers=("NCHW", "OIHW", "NCHW"),
        preferred_element_type=jnp.float32)


def _ref_bn_relu(x, scale, bias):
    return jnp.maximum(
        x * scale[None, :, None, None] + bias[None, :, None, None], 0.0)


def ref_forward_time_series(params, x, s, inc_mask):
    B, T = s.shape[0], s.shape[1]
    x = x.reshape((B * T,) + x.shape[2:])
    s = s.reshape((B * T,) + s.shape[2:])
    N, _, H, W = s.shape
    xcat = jnp.transpose(_upsample_crop_concat_nhwc(x, s), (0, 3, 1, 2))
    h = _ref_bn_relu(_ref_conv_bf16(xcat, params["w3a"], 1), params["s3a"], params["b3a"])
    h = _ref_bn_relu(_ref_conv_bf16(h, params["w3b"], 1), params["s3b"], params["b3b"])
    g = _ref_bn_relu(_ref_conv_bf16(xcat, params["w1a"], 0), params["s1a"], params["b1a"])
    g = _ref_bn_relu(_ref_conv_bf16(g, params["w1b"], 0), params["s1b"], params["b1b"])
    m = jnp.transpose(
        _bilinear_resize_nhwc(jnp.transpose(inc_mask, (0, 2, 3, 1)), H, W),
        (0, 3, 1, 2))
    out = h * m + g
    return out.reshape((B, T) + out.shape[1:])


def ref_forward_single_frame(params, x, s):
    xcat = jnp.transpose(_upsample_crop_concat_nhwc(x, s), (0, 3, 1, 2))
    h = _ref_bn_relu(_ref_conv_bf16(xcat, params["w3a"], 1), params["s3a"], params["b3a"])
    h = _ref_bn_relu(_ref_conv_bf16(h, params["w3b"], 1), params["s3b"], params["b3b"])
    return h


# ---------------------------------------------------------------------------
if __name__ == "__main__":
    B, T = 1, 2
    in_ch, src_ch, out_ch = 4, 3, 8
    Hx, Wx = 8, 8          # low-res input spatial (upsampled x2 -> 16x16)
    H, W = 16, 16          # skip-connection (s) spatial
    Hm, Wm = 8, 8          # inc_mask spatial (interpolated to H, W)

    key = jax.random.PRNGKey(0)
    kp_, kx, ks_, km = jax.random.split(key, 4)
    params = make_params(kp_, in_ch, src_ch, out_ch)

    x = jax.random.normal(kx, (B, T, in_ch, Hx, Wx), jnp.float32)
    s = jax.random.normal(ks_, (B, T, src_ch, H, W), jnp.float32)
    inc_mask = jax.nn.sigmoid(
        jax.random.normal(km, (B * T, 1, Hm, Wm), jnp.float32))

    # time-series path (main path, uses inc_mask)
    out = jax.block_until_ready(output_block_forward(params, x, s, inc_mask))
    assert out.shape == (B, T, out_ch, H, W)
    ref = jax.block_until_ready(ref_forward_time_series(params, x, s, inc_mask))
    rel_err = jnp.max(jnp.abs(out - ref) / (1.0 + jnp.abs(ref)))
    assert bool(rel_err < 5e-3), f"time-series mismatch vs reference: {rel_err}"

    # single-frame path (4-D x, no mask)
    out_sf = jax.block_until_ready(
        output_block_forward(params, x[:, 0], s[:, 0]))
    assert out_sf.shape == (B, out_ch, H, W)
    ref_sf = jax.block_until_ready(
        ref_forward_single_frame(params, x[:, 0], s[:, 0]))
    rel_err_sf = jnp.max(jnp.abs(out_sf - ref_sf) / (1.0 + jnp.abs(ref_sf)))
    assert bool(rel_err_sf < 5e-3), f"single-frame mismatch vs ref: {rel_err_sf}"

    print("KERNEL_OK")
</pallas_src>

<mosaic_0001>
module attributes {stable_mosaic.version = 11 : i64} {
  func.func @_output_block_ts_kernel(%arg0: i32, %arg1: memref<1x16x16x7xf32, #tpu.memory_space<vmem>>, %arg2: memref<256x1xf32, #tpu.memory_space<vmem>>, %arg3: memref<63x8xbf16, #tpu.memory_space<vmem>>, %arg4: memref<1x8xf32, #tpu.memory_space<vmem>>, %arg5: memref<1x8xf32, #tpu.memory_space<vmem>>, %arg6: memref<72x8xbf16, #tpu.memory_space<vmem>>, %arg7: memref<1x8xf32, #tpu.memory_space<vmem>>, %arg8: memref<1x8xf32, #tpu.memory_space<vmem>>, %arg9: memref<7x8xbf16, #tpu.memory_space<vmem>>, %arg10: memref<1x8xf32, #tpu.memory_space<vmem>>, %arg11: memref<1x8xf32, #tpu.memory_space<vmem>>, %arg12: memref<8x8xbf16, #tpu.memory_space<vmem>>, %arg13: memref<1x8xf32, #tpu.memory_space<vmem>>, %arg14: memref<1x8xf32, #tpu.memory_space<vmem>>, %arg15: memref<8x256xf32, #tpu.memory_space<vmem>>) attributes {dimension_semantics = [#tpu.dimension_semantics<parallel>], iteration_bounds = array<i64: 2>, scalar_prefetch = 0 : i64, scratch_operands = 0 : i64, tpu.core_type = #tpu.core_type<tc>, window_params = [{transform_indices = @transform_0, window_bounds = array<i64: 1, 16, 16, 7>}, {transform_indices = @transform_1, window_bounds = array<i64: 256, 1>}, {pipeline_mode = #tpu.pipeline_mode<synchronous>, transform_indices = @transform_2, window_bounds = array<i64: 63, 8>}, {pipeline_mode = #tpu.pipeline_mode<synchronous>, transform_indices = @transform_3, window_bounds = array<i64: 1, 8>}, {pipeline_mode = #tpu.pipeline_mode<synchronous>, transform_indices = @transform_4, window_bounds = array<i64: 1, 8>}, {pipeline_mode = #tpu.pipeline_mode<synchronous>, transform_indices = @transform_5, window_bounds = array<i64: 72, 8>}, {pipeline_mode = #tpu.pipeline_mode<synchronous>, transform_indices = @transform_6, window_bounds = array<i64: 1, 8>}, {pipeline_mode = #tpu.pipeline_mode<synchronous>, transform_indices = @transform_7, window_bounds = array<i64: 1, 8>}, {pipeline_mode = #tpu.pipeline_mode<synchronous>, transform_indices = @transform_8, window_bounds = array<i64: 7, 8>}, {pipeline_mode = #tpu.pipeline_mode<synchronous>, transform_indices = @transform_9, window_bounds = array<i64: 1, 8>}, {pipeline_mode = #tpu.pipeline_mode<synchronous>, transform_indices = @transform_10, window_bounds = array<i64: 1, 8>}, {pipeline_mode = #tpu.pipeline_mode<synchronous>, transform_indices = @transform_11, window_bounds = array<i64: 8, 8>}, {pipeline_mode = #tpu.pipeline_mode<synchronous>, transform_indices = @transform_12, window_bounds = array<i64: 1, 8>}, {pipeline_mode = #tpu.pipeline_mode<synchronous>, transform_indices = @transform_13, window_bounds = array<i64: 1, 8>}, {transform_indices = @transform_14, window_bounds = array<i64: 8, 256>}]} {
    %c0 = arith.constant 0 : index
    %c0_0 = arith.constant 0 : index
    %c0_1 = arith.constant 0 : index
    %c0_2 = arith.constant 0 : index
    %0 = vector.load %arg1[%c0, %c0_0, %c0_1, %c0_2] : memref<1x16x16x7xf32, #tpu.memory_space<vmem>>, vector<1x16x16x7xf32>
    %c0_3 = arith.constant 0 : index
    %c0_4 = arith.constant 0 : index
    %1 = vector.load %arg3[%c0_3, %c0_4] : memref<63x8xbf16, #tpu.memory_space<vmem>>, vector<63x8xbf16>
    %c0_5 = arith.constant 0 : index
    %c0_6 = arith.constant 0 : index
    %2 = vector.load %arg4[%c0_5, %c0_6] : memref<1x8xf32, #tpu.memory_space<vmem>>, vector<1x8xf32>
    %c0_7 = arith.constant 0 : index
    %c0_8 = arith.constant 0 : index
    %3 = vector.load %arg5[%c0_7, %c0_8] : memref<1x8xf32, #tpu.memory_space<vmem>>, vector<1x8xf32>
    %cst = arith.constant 0.000000e+00 : f32
    %4 = vector.broadcast %cst : f32 to vector<1x16x1x7xf32>
    %5 = tpu.concatenate %4, %0, %4 in 2 : vector<1x16x1x7xf32>, vector<1x16x16x7xf32>, vector<1x16x1x7xf32> -> vector<1x16x18x7xf32>
    %cst_9 = arith.constant 0.000000e+00 : f32
    %6 = vector.broadcast %cst_9 : f32 to vector<1x1x18x7xf32>
    %7 = tpu.concatenate %6, %5, %6 in 1 : vector<1x1x18x7xf32>, vector<1x16x18x7xf32>, vector<1x1x18x7xf32> -> vector<1x18x18x7xf32>
    %8 = vector.extract_strided_slice %7 {offsets = [0, 0, 0, 0], sizes = [1, 16, 16, 7], strides = [1, 1, 1, 1]} : vector<1x18x18x7xf32> to vector<1x16x16x7xf32>
    %9 = vector.shape_cast %8 : vector<1x16x16x7xf32> to vector<256x7xf32>
    %10 = vector.extract_strided_slice %7 {offsets = [0, 0, 1, 0], sizes = [1, 16, 16, 7], strides = [1, 1, 1, 1]} : vector<1x18x18x7xf32> to vector<1x16x16x7xf32>
    %11 = vector.shape_cast %10 : vector<1x16x16x7xf32> to vector<256x7xf32>
    %12 = vector.extract_strided_slice %7 {offsets = [0, 0, 2, 0], sizes = [1, 16, 16, 7], strides = [1, 1, 1, 1]} : vector<1x18x18x7xf32> to vector<1x16x16x7xf32>
    %13 = vector.shape_cast %12 : vector<1x16x16x7xf32> to vector<256x7xf32>
    %14 = vector.extract_strided_slice %7 {offsets = [0, 1, 0, 0], sizes = [1, 16, 16, 7], strides = [1, 1, 1, 1]} : vector<1x18x18x7xf32> to vector<1x16x16x7xf32>
    %15 = vector.shape_cast %14 : vector<1x16x16x7xf32> to vector<256x7xf32>
    %16 = vector.extract_strided_slice %7 {offsets = [0, 1, 1, 0], sizes = [1, 16, 16, 7], strides = [1, 1, 1, 1]} : vector<1x18x18x7xf32> to vector<1x16x16x7xf32>
    %17 = vector.shape_cast %16 : vector<1x16x16x7xf32> to vector<256x7xf32>
    %18 = vector.extract_strided_slice %7 {offsets = [0, 1, 2, 0], sizes = [1, 16, 16, 7], strides = [1, 1, 1, 1]} : vector<1x18x18x7xf32> to vector<1x16x16x7xf32>
    %19 = vector.shape_cast %18 : vector<1x16x16x7xf32> to vector<256x7xf32>
    %20 = vector.extract_strided_slice %7 {offsets = [0, 2, 0, 0], sizes = [1, 16, 16, 7], strides = [1, 1, 1, 1]} : vector<1x18x18x7xf32> to vector<1x16x16x7xf32>
    %21 = vector.shape_cast %20 : vector<1x16x16x7xf32> to vector<256x7xf32>
    %22 = vector.extract_strided_slice %7 {offsets = [0, 2, 1, 0], sizes = [1, 16, 16, 7], strides = [1, 1, 1, 1]} : vector<1x18x18x7xf32> to vector<1x16x16x7xf32>
    %23 = vector.shape_cast %22 : vector<1x16x16x7xf32> to vector<256x7xf32>
    %24 = vector.extract_strided_slice %7 {offsets = [0, 2, 2, 0], sizes = [1, 16, 16, 7], strides = [1, 1, 1, 1]} : vector<1x18x18x7xf32> to vector<1x16x16x7xf32>
    %25 = vector.shape_cast %24 : vector<1x16x16x7xf32> to vector<256x7xf32>
    %26 = tpu.concatenate %9, %11, %13, %15, %17, %19, %21, %23, %25 in 1 : vector<256x7xf32>, vector<256x7xf32>, vector<256x7xf32>, vector<256x7xf32>, vector<256x7xf32>, vector<256x7xf32>, vector<256x7xf32>, vector<256x7xf32>, vector<256x7xf32> -> vector<256x63xf32>
    %27 = arith.truncf %26 : vector<256x63xf32> to vector<256x63xbf16>
    %cst_10 = arith.constant dense<0.000000e+00> : vector<256x8xf32>
    %28 = tpu.matmul %27, %1, %cst_10 {dimension_numbers = #tpu.dot_dimension_numbers<[1], [0], [0], [1], [0, 0, 1, 1], [], []>} : vector<256x63xbf16>, vector<63x8xbf16>, vector<256x8xf32> -> vector<256x8xf32>
    %29 = vector.broadcast %2 : vector<1x8xf32> to vector<256x8xf32>
    %30 = arith.mulf %28, %29 : vector<256x8xf32>
    %31 = vector.broadcast %3 : vector<1x8xf32> to vector<256x8xf32>
    %32 = arith.addf %30, %31 : vector<256x8xf32>
    %cst_11 = arith.constant 0.000000e+00 : f32
    %33 = vector.broadcast %cst_11 : f32 to vector<256x8xf32>
    %34 = arith.maximumf %32, %33 : vector<256x8xf32>
    %35 = vector.shape_cast %34 : vector<256x8xf32> to vector<1x16x16x8xf32>
    %c0_12 = arith.constant 0 : index
    %c0_13 = arith.constant 0 : index
    %36 = vector.load %arg6[%c0_12, %c0_13] : memref<72x8xbf16, #tpu.memory_space<vmem>>, vector<72x8xbf16>
    %c0_14 = arith.constant 0 : index
    %c0_15 = arith.constant 0 : index
    %37 = vector.load %arg7[%c0_14, %c0_15] : memref<1x8xf32, #tpu.memory_space<vmem>>, vector<1x8xf32>
    %c0_16 = arith.constant 0 : index
    %c0_17 = arith.constant 0 : index
    %38 = vector.load %arg8[%c0_16, %c0_17] : memref<1x8xf32, #tpu.memory_space<vmem>>, vector<1x8xf32>
    %cst_18 = arith.constant 0.000000e+00 : f32
    %39 = vector.broadcast %cst_18 : f32 to vector<1x16x1x8xf32>
    %40 = tpu.concatenate %39, %35, %39 in 2 : vector<1x16x1x8xf32>, vector<1x16x16x8xf32>, vector<1x16x1x8xf32> -> vector<1x16x18x8xf32>
    %cst_19 = arith.constant 0.000000e+00 : f32
    %41 = vector.broadcast %cst_19 : f32 to vector<1x1x18x8xf32>
    %42 = tpu.concatenate %41, %40, %41 in 1 : vector<1x1x18x8xf32>, vector<1x16x18x8xf32>, vector<1x1x18x8xf32> -> vector<1x18x18x8xf32>
    %43 = vector.extract_strided_slice %42 {offsets = [0, 0, 0, 0], sizes = [1, 16, 16, 8], strides = [1, 1, 1, 1]} : vector<1x18x18x8xf32> to vector<1x16x16x8xf32>
    %44 = vector.shape_cast %43 : vector<1x16x16x8xf32> to vector<256x8xf32>
    %45 = vector.extract_strided_slice %42 {offsets = [0, 0, 1, 0], sizes = [1, 16, 16, 8], strides = [1, 1, 1, 1]} : vector<1x18x18x8xf32> to vector<1x16x16x8xf32>
    %46 = vector.shape_cast %45 : vector<1x16x16x8xf32> to vector<256x8xf32>
    %47 = vector.extract_strided_slice %42 {offsets = [0, 0, 2, 0], sizes = [1, 16, 16, 8], strides = [1, 1, 1, 1]} : vector<1x18x18x8xf32> to vector<1x16x16x8xf32>
    %48 = vector.shape_cast %47 : vector<1x16x16x8xf32> to vector<256x8xf32>
    %49 = vector.extract_strided_slice %42 {offsets = [0, 1, 0, 0], sizes = [1, 16, 16, 8], strides = [1, 1, 1, 1]} : vector<1x18x18x8xf32> to vector<1x16x16x8xf32>
    %50 = vector.shape_cast %49 : vector<1x16x16x8xf32> to vector<256x8xf32>
    %51 = vector.extract_strided_slice %42 {offsets = [0, 1, 1, 0], sizes = [1, 16, 16, 8], strides = [1, 1, 1, 1]} : vector<1x18x18x8xf32> to vector<1x16x16x8xf32>
    %52 = vector.shape_cast %51 : vector<1x16x16x8xf32> to vector<256x8xf32>
    %53 = vector.extract_strided_slice %42 {offsets = [0, 1, 2, 0], sizes = [1, 16, 16, 8], strides = [1, 1, 1, 1]} : vector<1x18x18x8xf32> to vector<1x16x16x8xf32>
    %54 = vector.shape_cast %53 : vector<1x16x16x8xf32> to vector<256x8xf32>
    %55 = vector.extract_strided_slice %42 {offsets = [0, 2, 0, 0], sizes = [1, 16, 16, 8], strides = [1, 1, 1, 1]} : vector<1x18x18x8xf32> to vector<1x16x16x8xf32>
    %56 = vector.shape_cast %55 : vector<1x16x16x8xf32> to vector<256x8xf32>
    %57 = vector.extract_strided_slice %42 {offsets = [0, 2, 1, 0], sizes = [1, 16, 16, 8], strides = [1, 1, 1, 1]} : vector<1x18x18x8xf32> to vector<1x16x16x8xf32>
    %58 = vector.shape_cast %57 : vector<1x16x16x8xf32> to vector<256x8xf32>
    %59 = vector.extract_strided_slice %42 {offsets = [0, 2, 2, 0], sizes = [1, 16, 16, 8], strides = [1, 1, 1, 1]} : vector<1x18x18x8xf32> to vector<1x16x16x8xf32>
    %60 = vector.shape_cast %59 : vector<1x16x16x8xf32> to vector<256x8xf32>
    %61 = tpu.concatenate %44, %46, %48, %50, %52, %54, %56, %58, %60 in 1 : vector<256x8xf32>, vector<256x8xf32>, vector<256x8xf32>, vector<256x8xf32>, vector<256x8xf32>, vector<256x8xf32>, vector<256x8xf32>, vector<256x8xf32>, vector<256x8xf32> -> vector<256x72xf32>
    %62 = arith.truncf %61 : vector<256x72xf32> to vector<256x72xbf16>
    %cst_20 = arith.constant dense<0.000000e+00> : vector<256x8xf32>
    %63 = tpu.matmul %62, %36, %cst_20 {dimension_numbers = #tpu.dot_dimension_numbers<[1], [0], [0], [1], [0, 0, 1, 1], [], []>} : vector<256x72xbf16>, vector<72x8xbf16>, vector<256x8xf32> -> vector<256x8xf32>
    %64 = vector.broadcast %37 : vector<1x8xf32> to vector<256x8xf32>
    %65 = arith.mulf %63, %64 : vector<256x8xf32>
    %66 = vector.broadcast %38 : vector<1x8xf32> to vector<256x8xf32>
    %67 = arith.addf %65, %66 : vector<256x8xf32>
    %cst_21 = arith.constant 0.000000e+00 : f32
    %68 = vector.broadcast %cst_21 : f32 to vector<256x8xf32>
    %69 = arith.maximumf %67, %68 : vector<256x8xf32>
    %70 = vector.shape_cast %0 : vector<1x16x16x7xf32> to vector<256x7xf32>
    %c0_22 = arith.constant 0 : index
    %c0_23 = arith.constant 0 : index
    %71 = vector.load %arg9[%c0_22, %c0_23] : memref<7x8xbf16, #tpu.memory_space<vmem>>, vector<7x8xbf16>
    %c0_24 = arith.constant 0 : index
    %c0_25 = arith.constant 0 : index
    %72 = vector.load %arg10[%c0_24, %c0_25] : memref<1x8xf32, #tpu.memory_space<vmem>>, vector<1x8xf32>
    %c0_26 = arith.constant 0 : index
    %c0_27 = arith.constant 0 : index
    %73 = vector.load %arg11[%c0_26, %c0_27] : memref<1x8xf32, #tpu.memory_space<vmem>>, vector<1x8xf32>
    %74 = arith.truncf %70 : vector<256x7xf32> to vector<256x7xbf16>
    %cst_28 = arith.constant dense<0.000000e+00> : vector<256x8xf32>
    %75 = tpu.matmul %74, %71, %cst_28 {dimension_numbers = #tpu.dot_dimension_numbers<[1], [0], [0], [1], [0, 0, 1, 1], [], []>} : vector<256x7xbf16>, vector<7x8xbf16>, vector<256x8xf32> -> vector<256x8xf32>
    %76 = vector.broadcast %72 : vector<1x8xf32> to vector<256x8xf32>
    %77 = arith.mulf %75, %76 : vector<256x8xf32>
    %78 = vector.broadcast %73 : vector<1x8xf32> to vector<256x8xf32>
    %79 = arith.addf %77, %78 : vector<256x8xf32>
    %cst_29 = arith.constant 0.000000e+00 : f32
    %80 = vector.broadcast %cst_29 : f32 to vector<256x8xf32>
    %81 = arith.maximumf %79, %80 : vector<256x8xf32>
    %c0_30 = arith.constant 0 : index
    %c0_31 = arith.constant 0 : index
    %82 = vector.load %arg12[%c0_30, %c0_31] : memref<8x8xbf16, #tpu.memory_space<vmem>>, vector<8x8xbf16>
    %c0_32 = arith.constant 0 : index
    %c0_33 = arith.constant 0 : index
    %83 = vector.load %arg13[%c0_32, %c0_33] : memref<1x8xf32, #tpu.memory_space<vmem>>, vector<1x8xf32>
    %c0_34 = arith.constant 0 : index
    %c0_35 = arith.constant 0 : index
    %84 = vector.load %arg14[%c0_34, %c0_35] : memref<1x8xf32, #tpu.memory_space<vmem>>, vector<1x8xf32>
    %85 = arith.truncf %81 : vector<256x8xf32> to vector<256x8xbf16>
    %cst_36 = arith.constant dense<0.000000e+00> : vector<256x8xf32>
    %86 = tpu.matmul %85, %82, %cst_36 {dimension_numbers = #tpu.dot_dimension_numbers<[1], [0], [0], [1], [0, 0, 1, 1], [], []>} : vector<256x8xbf16>, vector<8x8xbf16>, vector<256x8xf32> -> vector<256x8xf32>
    %87 = vector.broadcast %83 : vector<1x8xf32> to vector<256x8xf32>
    %88 = arith.mulf %86, %87 : vector<256x8xf32>
    %89 = vector.broadcast %84 : vector<1x8xf32> to vector<256x8xf32>
    %90 = arith.addf %88, %89 : vector<256x8xf32>
    %cst_37 = arith.constant 0.000000e+00 : f32
    %91 = vector.broadcast %cst_37 : f32 to vector<256x8xf32>
    %92 = arith.maximumf %90, %91 : vector<256x8xf32>
    %c0_38 = arith.constant 0 : index
    %c0_39 = arith.constant 0 : index
    %93 = vector.load %arg2[%c0_38, %c0_39] : memref<256x1xf32, #tpu.memory_space<vmem>>, vector<256x1xf32>
    %94 = vector.broadcast %93 : vector<256x1xf32> to vector<256x8xf32>
    %95 = arith.mulf %69, %94 : vector<256x8xf32>
    %96 = arith.addf %95, %92 : vector<256x8xf32>
    %97 = tpu.transpose %96, [1, 0] : vector<256x8xf32> -> vector<8x256xf32>
    %c0_40 = arith.constant 0 : index
    %c0_41 = arith.constant 0 : index
    %98 = vector.load %arg15[%c0_40, %c0_41] : memref<8x256xf32, #tpu.memory_space<vmem>>, vector<8x256xf32>
    tpu.vector_store %arg15[%c0_40, %c0_41], %97 {strides = array<i32>} : memref<8x256xf32, #tpu.memory_space<vmem>>, vector<8x256xf32>,
    return
  }
  func.func @transform_0(%arg0: i32) -> (i32, i32, i32, i32) {
    %c0_i32 = arith.constant 0 : i32
    %c0_i32_0 = arith.constant 0 : i32
    %c0_i32_1 = arith.constant 0 : i32
    %c0_i32_2 = arith.constant 0 : i32
    return %arg0, %c0_i32, %c0_i32_0, %c0_i32_1 : i32, i32, i32, i32
  }
  func.func @transform_1(%arg0: i32) -> (i32, i32) {
    %c0_i32 = arith.constant 0 : i32
    %c0_i32_0 = arith.constant 0 : i32
    return %arg0, %c0_i32 : i32, i32
  }
  func.func @transform_2(%arg0: i32) -> (i32, i32) {
    %c0_i32 = arith.constant 0 : i32
    %c0_i32_0 = arith.constant 0 : i32
    %c0_i32_1 = arith.constant 0 : i32
    return %c0_i32, %c0_i32_0 : i32, i32
  }
  func.func @transform_3(%arg0: i32) -> (i32, i32) {
    %c0_i32 = arith.constant 0 : i32
    %c0_i32_0 = arith.constant 0 : i32
    %c0_i32_1 = arith.constant 0 : i32
    return %c0_i32, %c0_i32_0 : i32, i32
  }
  func.func @transform_4(%arg0: i32) -> (i32, i32) {
    %c0_i32 = arith.constant 0 : i32
    %c0_i32_0 = arith.constant 0 : i32
    %c0_i32_1 = arith.constant 0 : i32
    return %c0_i32, %c0_i32_0 : i32, i32
  }
  func.func @transform_5(%arg0: i32) -> (i32, i32) {
    %c0_i32 = arith.constant 0 : i32
    %c0_i32_0 = arith.constant 0 : i32
    %c0_i32_1 = arith.constant 0 : i32
    return %c0_i32, %c0_i32_0 : i32, i32
  }
  func.func @transform_6(%arg0: i32) -> (i32, i32) {
    %c0_i32 = arith.constant 0 : i32
    %c0_i32_0 = arith.constant 0 : i32
    %c0_i32_1 = arith.constant 0 : i32
    return %c0_i32, %c0_i32_0 : i32, i32
  }
  func.func @transform_7(%arg0: i32) -> (i32, i32) {
    %c0_i32 = arith.constant 0 : i32
    %c0_i32_0 = arith.constant 0 : i32
    %c0_i32_1 = arith.constant 0 : i32
    return %c0_i32, %c0_i32_0 : i32, i32
  }
  func.func @transform_8(%arg0: i32) -> (i32, i32) {
    %c0_i32 = arith.constant 0 : i32
    %c0_i32_0 = arith.constant 0 : i32
    %c0_i32_1 = arith.constant 0 : i32
    return %c0_i32, %c0_i32_0 : i32, i32
  }
  func.func @transform_9(%arg0: i32) -> (i32, i32) {
    %c0_i32 = arith.constant 0 : i32
    %c0_i32_0 = arith.constant 0 : i32
    %c0_i32_1 = arith.constant 0 : i32
    return %c0_i32, %c0_i32_0 : i32, i32
  }
  func.func @transform_10(%arg0: i32) -> (i32, i32) {
    %c0_i32 = arith.constant 0 : i32
    %c0_i32_0 = arith.constant 0 : i32
    %c0_i32_1 = arith.constant 0 : i32
    return %c0_i32, %c0_i32_0 : i32, i32
  }
  func.func @transform_11(%arg0: i32) -> (i32, i32) {
    %c0_i32 = arith.constant 0 : i32
    %c0_i32_0 = arith.constant 0 : i32
    %c0_i32_1 = arith.constant 0 : i32
    return %c0_i32, %c0_i32_0 : i32, i32
  }
  func.func @transform_12(%arg0: i32) -> (i32, i32) {
    %c0_i32 = arith.constant 0 : i32
    %c0_i32_0 = arith.constant 0 : i32
    %c0_i32_1 = arith.constant 0 : i32
    return %c0_i32, %c0_i32_0 : i32, i32
  }
  func.func @transform_13(%arg0: i32) -> (i32, i32) {
    %c0_i32 = arith.constant 0 : i32
    %c0_i32_0 = arith.constant 0 : i32
    %c0_i32_1 = arith.constant 0 : i32
    return %c0_i32, %c0_i32_0 : i32, i32
  }
  func.func @transform_14(%arg0: i32) -> (i32, i32) {
    %c0_i32 = arith.constant 0 : i32
    %c0_i32_0 = arith.constant 0 : i32
    return %c0_i32, %arg0 : i32, i32
  }
}

</mosaic_0001>

<bundles_post_ra>
// kernel: _forward_time_series.1
= control target key start
LH: loop header
LB: loop body
LE: loop exit
PB: predicated region body
PF: predicated region fallthrough
CT: control target
= control target key end

     0   :  { %s6298_s29 = smov 0   ;;  %s10110_s0 = inlined_call_operand.vmem [shape: f32[2,16,16,7], index: 0, kind: input, shape index: {}]   ;;  %s10111_s1 = inlined_call_operand.vmem [shape: f32[512,1], index: 1, kind: input, shape index: {}]   ;;  %s10112_s2 = inlined_call_operand.vmem [shape: bf16[63,8], index: 2, kind: input, shape index: {}]   ;;  %s10113_s3 = inlined_call_operand.vmem [shape: f32[1,8], index: 3, kind: input, shape index: {}]   ;;  %s10114_s4 = inlined_call_operand.vmem [shape: f32[1,8], index: 4, kind: input, shape index: {}]   ;;  %s10115_s5 = inlined_call_operand.vmem [shape: bf16[72,8], index: 5, kind: input, shape index: {}]   ;;  %s10116_s6 = inlined_call_operand.vmem [shape: f32[1,8], index: 6, kind: input, shape index: {}]   ;;  %s10117_s7 = inlined_call_operand.vmem [shape: f32[1,8], index: 7, kind: input, shape index: {}]   ;;  %s10118_s8 = inlined_call_operand.vmem [shape: bf16[7,8], index: 8, kind: input, shape index: {}]   ;;  %s10119_s9 = inlined_call_operand.vmem [shape: f32[1,8], index: 9, kind: input, shape index: {}]   ;;  %s10120_s10 = inlined_call_operand.vmem [shape: f32[1,8], index: 10, kind: input, shape index: {}]   ;;  %s10121_s11 = inlined_call_operand.vmem [shape: bf16[8,8], index: 11, kind: input, shape index: {}]   ;;  %s10122_s12 = inlined_call_operand.vmem [shape: f32[1,8], index: 12, kind: input, shape index: {}]   ;;  %s10123_s13 = inlined_call_operand.vmem [shape: f32[1,8], index: 13, kind: input, shape index: {}]   ;;  %s10124_s14 = inlined_call_operand.vmem [shape: f32[8,512], index: 14, kind: output, shape index: {}]  }
   0x1 LB: > { %s6304_s30 = sadd.s32 4294967295, %s6203_s29   ;;  %p4775_p0 = scmp.ge.s32.totalorder %s6203_s29, 1  ;;  %s6203_s29 = sphi %s6298_s29, %s24_s29  }
   0x2   : > { %p423_p1 = scmp.lt.s32.totalorder %s6203_s29, 3 }
   0x4   : > { %p424_p2 = pnand %p4775_p0, %p423_p1 }
   0x6   : > { %427 = sbr.rel (%p424_p2) target bundleno = 1504 (0x5e0), region = 76 }
   0xb   : > { %p474_p3 = scmp.lt.s32.totalorder %s6304_s30, 1  ;;  %vm566_vm0 = vcmask 1040384   ;;  %vm725_vm1 = vcmask 1046528   ;;  %v10125_v40 = vmov 0.0   ;;  %s6206_s20 = smov 7   ;;  %vm803_vm2 = vcmask 1045504  }
   0xc   : > { %v6377_v41 = vrot.slane %v10125_v40, 1  ;;  %s6207_s21 = smov 14   ;;  %s6208_s22 = smov 21   ;;  %vm1996_vm3 = vcmask 1047552   ;;  %vm1646_vm4 = vcmask 56320   ;;  %vm1710_vm5 = vcmask 171008  }
   0xd   : > { %s475_s15 = scalar_select %p474_p3, %s6304_s30, 1  ;;  %vm1678_vm6 = vcmask 113664   ;;  %vm1743_vm7 = vcmask 228352   ;;  %vm1809_vm8 = vcmask 343040   ;;  %vm1776_vm9 = vcmask 285696  }
   0xe   : > { %10328 = vst [vmem:[#allocation10_spill] sm:$0xff] %v6377_v41  ;;  %s6209_s23 = smov 28   ;;  %s6210_s24 = smov 35   ;;  %vm1842_vm10 = vcmask 400384   ;;  %vm1875_vm11 = vcmask 457728   ;;  %vm1947_vm12 = vcmask 515072  }
   0xf   : > { %s4880_s16 = sshll.u32 %s475_s15, 8  ;;  %s6211_s25 = smov 42   ;;  %vm3308_vm13 = vcmask 64512   ;;  %vm3340_vm14 = vcmask 130048   ;;  %vm3372_vm15 = vcmask 195584  }
  0x10   : > { %s6313_s19 = scalar_lea.vmem %s10110_s0, %s4880_s16  ;;  %s6212_s26 = smov 49  }
  0x11   : > { %v498_v0 = vld [vmem:[%s6313_s19 + $0x30] sm:$0xff]  ;;  %v499_v1 = vld [vmem:[%s6313_s19 + $0x38] sm:$0xff]  ;;  %v500_v2 = vld [vmem:[%s6313_s19 + $0x40] sm:$0xff]  ;;  %s6213_s27 = smov 56   ;;  %s6215_s28 = smov 8  }
  0x12   : > { %v501_v3 = vld [vmem:[%s6313_s19 + $0x48] sm:$0xff]  ;;  %v576_v4 = vrot.slane %v498_v0, 7  ;;  %v577_v5 = vrot.slane %v499_v1, 7  ;;  %v579_v6 = vrot.slane %v500_v2, 7  ;;  %v6320_v7 = vld [vmem:[%s6313_s19 + $0x10] sm:$0xff]  ;;  %v495_v8 = vld [vmem:[%s6313_s19 + $0x18] sm:$0xff] }
  0x13   : > { %v580_v9 = vrot.slane %v501_v3, 7  ;;  %v496_v10 = vld [vmem:[%s6313_s19 + $0x20] sm:$0xff]  ;;  %v497_v11 = vld [vmem:[%s6313_s19 + $0x28] sm:$0xff]  ;;  %v570_v12 = vrot.slane %v6320_v7, 7  ;;  %v571_v13 = vrot.slane %v495_v8, 7  ;;  %v502_v31 = vld [vmem:[%s6313_s19 + $0x50] sm:$0xff] }
  0x14   : > { %v6327_v14 = vsel %vm566_vm0, %v576_v4, %v577_v5  ;;  %v6330_v15 = vsel %vm566_vm0, 0.0, %v579_v6  ;;  %v6333_v16 = vsel %vm566_vm0, %v577_v5, 0.0  ;;  %v573_v17 = vrot.slane %v496_v10, 7  ;;  %v492_v25 = vld [vmem:[%s6313_s19] sm:$0xff]  ;;  %v493_v30 = vld [vmem:[%s6313_s19 + $0x8] sm:$0xff]  ;;  %v6363_v32 = vld [vmem:[%s6313_s19 + $0x58] sm:$0xff] }
  0x15   : > { %10320 = vst [vmem:[#allocation2_spill] sm:$0xff] %v6327_v14  ;;  %v6336_v18 = vsel %vm566_vm0, %v579_v6, %v580_v9  ;;  %v744_v19 = vrot.slane %v6327_v14, 1  ;;  %v746_v20 = vrot.slane %v6333_v16, 1  ;;  %v748_v21 = vrot.slane %v6330_v15, 1  ;;  %v506_v2 = vld [vmem:[%s6313_s19 + $0x70] sm:$0xff]  ;;  %v507_v3 = vld [vmem:[%s6313_s19 + $0x78] sm:$0xff] }
  0x16   : > { %10321 = vst [vmem:[#allocation3_spill] sm:$0xff] %v6330_v15  ;;  %v749_v22 = vrot.slane %v6336_v18, 1  ;;  %v6345_v23 = vsel %vm566_vm0, %v570_v12, %v571_v13  ;;  %v574_v24 = vrot.slane %v497_v11, 7  ;;  %v6354_v27 = vsel %vm566_vm0, 0.0, %v573_v17  ;;  %v6448_v10 = vld [vmem:[%s6313_s19 + $0x88] sm:$0xff]  ;;  %v504_v11 = vld [vmem:[%s6313_s19 + $0x60] sm:$0xff] }
  0x17   : > { %10322 = vst [vmem:[#allocation4_spill] sm:$0xff] %v6336_v18  ;;  %v6351_v26 = vsel %vm725_vm1, %v744_v19, %v746_v20  ;;  %v6357_v28 = vsel %vm566_vm0, %v571_v13, 0.0  ;;  %v734_v29 = vrot.slane %v6345_v23, 1  ;;  %v738_v36 = vrot.slane %v6354_v27, 1  ;;  %v505_v13 = vld [vmem:[%s6313_s19 + $0x68] sm:$0xff]  ;;  %s6216_s15 = smov 16  }
  0x18   : > { %10323 = vst [vmem:[#allocation5_spill] sm:$0xff] %v6345_v23  ;;  %v6366_v33 = vsel %vm725_vm1, %v748_v21, %v749_v22  ;;  %v6369_v34 = vsel %vm566_vm0, %v573_v17, %v574_v24  ;;  %v736_v35 = vrot.slane %v6357_v28, 1  ;;  %v567_v39 = vrot.slane %v492_v25, 7  ;;  %s6217_s16 = smov 24   ;;  %s6218_s17 = smov 32  }
  0x19   : > { %10324 = vst [vmem:[#allocation6_spill] sm:$0xff] %v6351_v26  ;;  %v4935_v37 = vpack.i.bf16 %v6366_v33, %v6351_v26  ;;  %v739_v38 = vrot.slane %v6369_v34, 1  ;;  %v568_v43 = vrot.slane %v493_v30, 7  ;;  %v582_v44 = vrot.slane %v502_v31, 7 }
  0x1a   : > { %10325 = vst [vmem:[#allocation7_spill] sm:$0xff] %v6354_v27  ;;  %v6382_v42 = vsel %vm725_vm1, %v734_v29, %v736_v35  ;;  %v583_v45 = vrot.slane %v6363_v32, 7  ;;  %v6390_v47 = vsel %vm566_vm0, 0.0, %v567_v39  ;;  %v6393_v48 = vsel %vm566_vm0, %v580_v9, 0.0 }
  0x1b   : > { %10326 = vst [vmem:[#allocation8_spill] sm:$0xff] %v6366_v33  ;;  %4936 = vrot.lane.b32.xlu2 %v4935_v37, %s6206_s20  ;;  %v6387_v46 = vsel %vm725_vm1, %v738_v36, %v739_v38  ;;  %v6396_v49 = vsel %vm566_vm0, 0.0, %v576_v4  ;;  %v6401_v51 = vsel %vm566_vm0, %v567_v39, %v568_v43  ;;  %v6404_v52 = vsel %vm566_vm0, %v568_v43, 0.0  ;;  %v508_v4 = vld [vmem:[%s6313_s19 + $0x80] sm:$0xff] }
  0x1c   : > { %10327 = vst [vmem:[#allocation9_spill] sm:$0xff] %v6369_v34  ;;  %v4925_v50 = vpack.i.bf16 %v6387_v46, %v6382_v42  ;;  %v728_v53 = vrot.slane %v6390_v47, 1  ;;  %v729_v54 = vrot.slane %v6401_v51, 1  ;;  %v731_v55 = vrot.slane %v6404_v52, 1 }
  0x1d   : > { %10329 = vst [vmem:[#allocation11_spill] sm:$0xff] %v6382_v42  ;;  %v6412_v56 = vsel %vm566_vm0, %v582_v44, %v583_v45  ;;  %v6415_v57 = vsel %vm566_vm0, 0.0, %v582_v44  ;;  %v751_v58 = vrot.slane %v6393_v48, 1  ;;  %v6422_v61 = vsel %vm566_vm0, %v574_v24, 0.0 }
  0x1e   : > { %10330 = vst [vmem:[#allocation12_spill] sm:$0xff] %v6390_v47  ;;  %4926 = vrot.lane.b32.xlu1 %v4925_v50, %s6206_s20  ;;  %v753_v59 = vrot.slane %v6415_v57, 1  ;;  %v754_v60 = vrot.slane %v6412_v56, 1  ;;  %v6425_v62 = vsel %vm725_vm1, %v728_v53, %v729_v54  ;;  %v6428_v63 = vsel %vm725_vm1, %v729_v54, %v731_v55 }
  0x1f   : > { %10331 = vst [vmem:[#allocation13_spill] sm:$0xff] %v6396_v49  ;;  %v741_v0 = vrot.slane %v6422_v61, 1  ;;  %v743_v1 = vrot.slane %v6396_v49, 1  ;;  %v4915_v6 = vpack.i.bf16 %v6425_v62, %v6377_v41  ;;  %v6440_v8 = vsel %vm725_vm1, %v749_v22, %v751_v58 }
  0x20   : > { %10332 = vst [vmem:[#allocation14_spill] sm:$0xff] %v6401_v51  ;;  %v6445_v9 = vsel %vm725_vm1, %v753_v59, %v754_v60  ;;  %v6465_v22 = vsel %vm566_vm0, 0.0, %v570_v12  ;;  %v588_v30 = vrot.slane %v506_v2, 7  ;;  %v589_v31 = vrot.slane %v507_v3, 7  ;;  %v512_v59 = vld [vmem:[%s6313_s19 + $0xa0] sm:$0xff] }
  0x21   : > { %10333 = vst [vmem:[#allocation15_spill] sm:$0xff] %v6412_v56  ;;  %v4940_v17 = vpack.i.bf16 %v6445_v9, %v6440_v8  ;;  %v6455_v20 = vsel %vm725_vm1, %v739_v38, %v741_v0  ;;  %v6460_v21 = vsel %vm725_vm1, %v743_v1, %v744_v19  ;;  %4916 = vrot.lane.b32.xlu0 %v4915_v6, %s6206_s20  ;;  %v733_v25 = vrot.slane %v6465_v22, 1  ;;  %v514_v6 = vld [vmem:[%s6313_s19 + $0xb0] sm:$0xff] }
  0x22   : > { %10334 = vst [vmem:[#allocation16_spill] sm:$0xff] %v6415_v57  ;;  %v4930_v24 = vpack.i.bf16 %v6460_v21, %v6455_v20  ;;  %v591_v35 = vrot.slane %v508_v4, 7  ;;  %v592_v19 = vrot.slane %v6448_v10, 7  ;;  %v585_v36 = vrot.slane %v504_v11, 7  ;;  %v513_v4 = vld [vmem:[%s6313_s19 + $0xa8] sm:$0xff] }
  0x23   : > { %10335 = vst [vmem:[#allocation17_spill] sm:$0xff] %v6425_v62  ;;  %4941 = vrot.lane.b32.xlu2 %v4940_v17, %s6206_s20  ;;  %v586_v7 = vrot.slane %v505_v13, 7  ;;  %v6476_v12 = vsel %vm725_vm1, %v733_v25, %v734_v29  ;;  %v6479_v37 = vsel %vm566_vm0, %v588_v30, %v589_v31  ;;  %v6482_v38 = vsel %vm566_vm0, %v589_v31, 0.0 }
  0x24   : > { %10336 = vst [vmem:[#allocation18_spill] sm:$0xff] %v6428_v63  ;;  %v6485_v39 = vsel %vm566_vm0, 0.0, %v588_v30  ;;  %v4920_v43 = vpack.i.bf16 %v6476_v12, %v6428_v63  ;;  %v6490_v44 = vsel %vm566_vm0, %v591_v35, %v592_v19  ;;  %v6493_v29 = vsel %vm566_vm0, 0.0, %v591_v35 }
  0x25   : > { %10337 = vst [vmem:[#allocation19_spill] sm:$0xff] %v6440_v8  ;;  %v764_v50 = vrot.slane %v6479_v37, 1  ;;  %v766_v53 = vrot.slane %v6482_v38, 1  ;;  %v768_v54 = vrot.slane %v6493_v29, 1  ;;  %v10127_v55 = vrot.slane %v6490_v44, 1 }
  0x26   : > { %10338 = vst [vmem:[#allocation20_spill] sm:$0xff] %v6445_v9  ;;  %4931 = vrot.lane.b32.xlu1 %v4930_v24, %s6206_s20  ;;  %v6501_v58 = vsel %vm566_vm0, %v585_v36, %v586_v7  ;;  %v6505_v0 = vsel %vm566_vm0, %v586_v7, 0.0  ;;  %v763_v2 = vrot.slane %v6485_v39, 1  ;;  %v6510_v3 = vsel %vm566_vm0, 0.0, %v585_v36  ;;  %v6529_v24 = vld [vmem:[%s6313_s19 + $0xb8] sm:$0xff] }
  0x27   : > { %10339 = vst [vmem:[#allocation21_spill] sm:$0xff] %v6460_v21  ;;  %v759_v1 = vrot.slane %v6501_v58, 1  ;;  %v6515_v10 = vsel %vm725_vm1, %v764_v50, %v766_v53  ;;  %v6520_v11 = vsel %vm725_vm1, %v768_v54, %v10127_v55  ;;  %v761_v13 = vrot.slane %v6505_v0, 1 }
  0x28   : > { %10340 = vst [vmem:[#allocation22_spill] sm:$0xff] %v6465_v22  ;;  %v6526_v17 = vsel %vm566_vm0, %v583_v45, 0.0  ;;  %v4955_v25 = vpack.i.bf16 %v6520_v11, %v6515_v10  ;;  %v6534_v30 = vsel %vm725_vm1, %v763_v2, %v764_v50  ;;  %v758_v35 = vrot.slane %v6510_v3, 1  ;;  %v510_v2 = vld [vmem:[%s6313_s19 + $0x90] sm:$0xff] }
  0x29   : > { %10341 = vst [vmem:[#allocation23_spill] sm:$0xff] %v6479_v37  ;;  %v756_v31 = vrot.slane %v6526_v17, 1  ;;  %4921 = vrot.lane.b32.xlu0 %v4920_v43, %s6206_s20  ;;  %v6540_v32 = vsel %vm725_vm1, %v759_v1, %v761_v13  ;;  %v597_v45 = vrot.slane %v512_v59, 7  ;;  %v598_v36 = vrot.slane %v513_v4, 7  ;;  %v511_v13 = vld [vmem:[%s6313_s19 + $0x98] sm:$0xff] }
  0x2a   : > { %10342 = vst [vmem:[#allocation24_spill] sm:$0xff] %v6485_v39  ;;  %v600_v7 = vrot.slane %v514_v6, 7  ;;  %v4950_v53 = vpack.i.bf16 %v6534_v30, %v6540_v32  ;;  %v6551_v54 = vsel %vm725_vm1, %v758_v35, %v759_v1  ;;  %v10130_v43 = vrot.slane %v6529_v24, 7  ;;  %v518_v1 = vld [vmem:[%s6313_s19 + $0xd0] sm:$0xff] }
  0x2b   : > { %10343 = vst [vmem:[#allocation25_spill] sm:$0xff] %v6490_v44  ;;  %4956 = vrot.lane.b32.xlu2 %v4955_v25, %s6206_s20  ;;  %v6548_v50 = vsel %vm725_vm1, %v754_v60, %v756_v31  ;;  %v6559_v4 = vsel %vm566_vm0, %v597_v45, %v598_v36  ;;  %v6565_v60 = vsel %vm566_vm0, %v598_v36, 0.0  ;;  %v594_v36 = vrot.slane %v510_v2, 7 }
  0x2c   : > { %10344 = vst [vmem:[#allocation26_spill] sm:$0xff] %v6493_v29  ;;  %v4945_v59 = vpack.i.bf16 %v6551_v54, %v6548_v50  ;;  %v6562_v6 = vsel %vm566_vm0, 0.0, %v600_v7  ;;  %v6571_v25 = vsel %vm566_vm0, %v600_v7, %v10130_v43  ;;  %v779_v31 = vrot.slane %v6559_v4, 1 }
  0x2d   : > { %10345 = vst [vmem:[#allocation27_spill] sm:$0xff] %v6501_v58  ;;  %v781_v35 = vrot.slane %v6565_v60, 1  ;;  %v783_v5 = vrot.slane %v6562_v6, 1  ;;  %v10137_v40 = vrot.slane %v6571_v25, 1  ;;  %v595_v55 = vrot.slane %v511_v13, 7 }
  0x2e   : > { %10346 = vst [vmem:[#allocation28_spill] sm:$0xff] %v6510_v3  ;;  %4951 = vrot.lane.b32.xlu1 %v4950_v53, %s6206_s20  ;;  %v6579_v41 = vsel %vm566_vm0, 0.0, %v597_v45  ;;  %v606_v53 = vrot.slane %v518_v1, 7  ;;  %v6602_v13 = vsel %vm566_vm0, 0.0, %v594_v36  ;;  %v807_v9 = vrot.slane %v6401_v51, 2 }
  0x2f   : > { %10347 = vst [vmem:[#allocation29_spill] sm:$0xff] %v6515_v10  ;;  %v6582_v7 = vsel %vm725_vm1, %v779_v31, %v781_v35  ;;  %v778_v43 = vrot.slane %v6579_v41, 1  ;;  %v520_v10 = vld [vmem:[%s6313_s19 + $0xe0] sm:$0xff]  ;;  %v6596_v2 = vsel %vm566_vm0, %v594_v36, %v595_v55  ;;  %v6599_v45 = vsel %vm566_vm0, %v595_v55, 0.0  ;;  %v6605_v35 = vld [vmem:[%s6313_s19 + $0xe8] sm:$0xff] }
  0x30   : > { %10348 = vst [vmem:[#allocation30_spill] sm:$0xff] %v6520_v11  ;;  %v517_v11 = vld [vmem:[%s6313_s19 + $0xc8] sm:$0xff]  ;;  %v774_v26 = vrot.slane %v6596_v2, 1  ;;  %v773_v36 = vrot.slane %v6602_v13, 1  ;;  %v609_v8 = vrot.slane %v520_v10, 7 }
  0x31   : > { %10349 = vst [vmem:[#allocation31_spill] sm:$0xff] %v6534_v30  ;;  %v6593_v30 = vsel %vm725_vm1, %v783_v5, %v10137_v40  ;;  %v776_v5 = vrot.slane %v6599_v45, 1  ;;  %v6614_v40 = vsel %vm725_vm1, %v778_v43, %v779_v31  ;;  %4946 = vrot.lane.b32.xlu0 %v4945_v59, %s6206_s20  ;;  %v604_v62 = vrot.slane %v517_v11, 7 }
  0x32   : > { %10350 = vst [vmem:[#allocation32_spill] sm:$0xff] %v6540_v32  ;;  %v6586_v32 = vsel %vm566_vm0, %v592_v19, 0.0  ;;  %v516_v19 = vld [vmem:[%s6313_s19 + $0xc0] sm:$0xff]  ;;  %v4970_v1 = vpack.i.bf16 %v6593_v30, %v6582_v7  ;;  %v10363_v59 = vrot.slane %v6490_v44, 1  ;;  %v6643_v11 = vsel %vm566_vm0, 0.0, %v609_v8 }
  0x33   : > { %10351 = vst [vmem:[#allocation33_spill] sm:$0xff] %v6548_v50  ;;  %v771_v55 = vrot.slane %v6586_v32, 1  ;;  %v6621_v33 = vsel %vm725_vm1, %v774_v26, %v776_v5 }
  0x34   : > { %10352 = vst [vmem:[#allocation34_spill] sm:$0xff] %v6551_v54  ;;  %v519_v54 = vld [vmem:[%s6313_s19 + $0xd8] sm:$0xff]  ;;  %4971 = vrot.lane.b32.xlu2 %v4970_v1, %s6206_s20  ;;  %v4965_v43 = vpack.i.bf16 %v6614_v40, %v6621_v33 }
  0x35   : > { %10353 = vst [vmem:[#allocation35_spill] sm:$0xff] %v6559_v4  ;;  %v607_v21 = vrot.slane %v519_v54, 7  ;;  %v6629_v31 = vsel %vm725_vm1, %v10363_v59, %v771_v55  ;;  %v6632_v54 = vsel %vm725_vm1, %v773_v36, %v774_v26  ;;  %v798_v55 = vrot.slane %v6643_v11, 1 }
  0x36   : > { %10354 = vst [vmem:[#allocation36_spill] sm:$0xff] %v6562_v6  ;;  %v4960_v1 = vpack.i.bf16 %v6632_v54, %v6629_v31  ;;  %4966 = vrot.lane.b32.xlu1 %v4965_v43, %s6206_s20 }
  0x37   : > { %10355 = vst [vmem:[#allocation37_spill] sm:$0xff] %v6571_v25  ;;  %v6635_v10 = vsel %vm566_vm0, %v606_v53, %v607_v21 }
  0x38   : > { %10356 = vst [vmem:[#allocation38_spill] sm:$0xff] %v6579_v41  ;;  %v794_v26 = vrot.slane %v6635_v10, 1 }
  0x39   : > { %10357 = vst [vmem:[#allocation39_spill] sm:$0xff] %v6582_v7  ;;  %v610_v7 = vrot.slane %v6605_v35, 7  ;;  %4961 = vrot.lane.b32.xlu0 %v4960_v1, %s6206_s20  ;;  %v811_v1 = vrot.slane %v6465_v22, 2 }
  0x3a   : > { %10358 = vst [vmem:[#allocation40_spill] sm:$0xff] %v6593_v30  ;;  %v603_v30 = vrot.slane %v516_v19, 7  ;;  %v6646_v19 = vsel %vm566_vm0, %v607_v21, 0.0 }
  0x3b   : > { %10359 = vst [vmem:[#allocation41_spill] sm:$0xff] %v6596_v2  ;;  %v6640_v35 = vsel %vm566_vm0, %v609_v8, %v610_v7  ;;  %v796_v5 = vrot.slane %v6646_v19, 1  ;;  %v6660_v8 = vsel %vm566_vm0, %v604_v62, 0.0 }
  0x3c   : > { %10360 = vst [vmem:[#allocation42_spill] sm:$0xff] %v6602_v13  ;;  %v799_v36 = vrot.slane %v6640_v35, 1  ;;  %v6654_v59 = vsel %vm566_vm0, %v603_v30, %v604_v62  ;;  %v6663_v21 = vsel %vm566_vm0, 0.0, %v603_v30  ;;  %v10374_v62 = vrot.slane %v6529_v24, 7 }
  0x3d   : > { %10361 = vst [vmem:[#allocation43_spill] sm:$0xff] %v6614_v40  ;;  %v6666_v43 = vsel %vm725_vm1, %v794_v26, %v796_v5  ;;  %v789_v40 = vrot.slane %v6654_v59, 1  ;;  %v788_v5 = vrot.slane %v6663_v21, 1 }
  0x3e   : > { %10362 = vst [vmem:[#allocation44_spill] sm:$0xff] %v6621_v33  ;;  %v6657_v33 = vsel %vm566_vm0, 0.0, %v606_v53  ;;  %v6679_v30 = vsel %vm566_vm0, %v10374_v62, 0.0  ;;  %v809_v62 = vrot.slane %v6404_v52, 2 }
  0x3f   : > { %10364 = vst [vmem:[#allocation45_spill] sm:$0xff] %v6629_v31  ;;  %v791_v31 = vrot.slane %v6660_v8, 1  ;;  %v793_v63 = vrot.slane %v6657_v33, 1  ;;  %v786_v50 = vrot.slane %v6679_v30, 1  ;;  %v6693_v24 = vsel %vm725_vm1, %v788_v5, %v789_v40 }
  0x40   : > { %10365 = vst [vmem:[#allocation46_spill] sm:$0xff] %v6632_v54  ;;  %v6669_v54 = vsel %vm725_vm1, %v798_v55, %v799_v36  ;;  %v10381_v5 = vmov 0.0  }
  0x41   : > { %10366 = vst [vmem:[#allocation47_spill] sm:$0xff] %v6635_v10  ;;  %v4985_v53 = vpack.i.bf16 %v6669_v54, %v6666_v43  ;;  %v6684_v55 = vsel %vm725_vm1, %v789_v40, %v791_v31  ;;  %v806_v40 = vrot.slane %v6390_v47, 2 }
  0x42   : > { %10367 = vst [vmem:[#allocation48_spill] sm:$0xff] %v6640_v35 }
  0x43   : > { %10368 = vst [vmem:[#allocation49_spill] sm:$0xff] %v6643_v11  ;;  %4986 = vrot.lane.b32.xlu2 %v4985_v53, %s6206_s20  ;;  %v812_v53 = vrot.slane %v6345_v23, 2 }
  0x44   : > { %10369 = vst [vmem:[#allocation50_spill] sm:$0xff] %v6654_v59 }
  0x45   : > { %10370 = vst [vmem:[#allocation51_spill] sm:$0xff] %v6657_v33 }
  0x46   : > { %10371 = vst [vmem:[#allocation52_spill] sm:$0xff] %v6663_v21 }
  0x47   : > { %10372 = vst [vmem:[#allocation53_spill] sm:$0xff] %v6666_v43  ;;  %v6690_v43 = vsel %vm725_vm1, %v793_v63, %v794_v26  ;;  %v6706_v63 = vsel %vm803_vm2, %v807_v9, %v809_v62  ;;  %v6713_v26 = vsel %vm803_vm2, %v811_v1, %v812_v53  ;;  %v6724_v62 = vsel %vm566_vm0, %v610_v7, 0.0 }
  0x48   : > { %10373 = vst [vmem:[#allocation54_spill] sm:$0xff] %v6669_v54  ;;  %v4980_v31 = vpack.i.bf16 %v6690_v43, %v6684_v55  ;;  %v10378_v54 = vrot.slane %v6571_v25, 1  ;;  %v827_v1 = vrot.slane %v6336_v18, 2  ;;  %v821_v7 = vrot.slane %v6396_v49, 2 }
  0x49   : > { %10375 = vst [vmem:[#allocation55_spill] sm:$0xff] %v6684_v55  ;;  %v6716_v55 = vrot.slane %v10381_v5, 2 }
  0x4a   : > { %10376 = vst [vmem:[#allocation56_spill] sm:$0xff] %v6690_v43  ;;  %v6702_v42 = vsel %vm725_vm1, %v10378_v54, %v786_v50  ;;  %4981 = vrot.lane.b32.xlu1 %v4980_v31, %s6206_s20  ;;  %v4995_v50 = vpack.i.bf16 %v6713_v26, %v6706_v63  ;;  %v6721_v54 = vsel %vm803_vm2, %v806_v40, %v807_v9  ;;  %v824_v31 = vrot.slane %v6333_v16, 2 }
  0x4b   : > { %10377 = vst [vmem:[#allocation57_spill] sm:$0xff] %v6693_v24  ;;  %v4975_v52 = vpack.i.bf16 %v6693_v24, %v6702_v42  ;;  %v822_v43 = vrot.slane %v6327_v14, 2  ;;  %v826_v24 = vrot.slane %v6330_v15, 2  ;;  %v4990_v5 = vpack.i.bf16 %v6721_v54, %v6716_v55 }
  0x4c   : > { %10379 = vst [vmem:[#allocation58_spill] sm:$0xff] %v6706_v63  ;;  %v801_v63 = vrot.slane %v6724_v62, 1  ;;  %4996 = vrot.lane.b32.xlu2 %v4995_v50, %s6207_s21  ;;  %v817_v9 = vrot.slane %v6369_v34, 2  ;;  %v819_v16 = vrot.slane %v6422_v61, 2 }
  0x4d   : > { %10380 = vst [vmem:[#allocation59_spill] sm:$0xff] %v6713_v26  ;;  %4976 = vrot.lane.b32.xlu0 %v4975_v52, %s6206_s20  ;;  %v6739_v40 = vsel %vm803_vm2, %v822_v43, %v824_v31  ;;  %v6742_v26 = vsel %vm803_vm2, %v826_v24, %v827_v1  ;;  %v814_v52 = vrot.slane %v6357_v28, 2  ;;  %v816_v31 = vrot.slane %v6354_v27, 2 }
  0x4e   : > { %10382 = vst [vmem:[#allocation60_spill] sm:$0xff] %v6716_v55  ;;  %v6747_v55 = vsel %vm725_vm1, %v799_v36, %v801_v63  ;;  %v5010_v50 = vpack.i.bf16 %v6742_v26, %v6739_v40  ;;  %v6752_v61 = vsel %vm803_vm2, %v817_v9, %v819_v16  ;;  %v837_v24 = vrot.slane %v6501_v58, 2 }
  0x4f   : > { %10383 = vst [vmem:[#allocation61_spill] sm:$0xff] %v6721_v54  ;;  %v6755_v54 = vsel %vm803_vm2, %v821_v7, %v822_v43  ;;  %v839_v28 = vrot.slane %v6505_v0, 2  ;;  %v842_v36 = vrot.slane %v6479_v37, 2  ;;  %v6767_v16 = vsel %vm803_vm2, %v812_v53, %v814_v52 }
  0x50   : > { %10384 = vst [vmem:[#allocation62_spill] sm:$0xff] %v6739_v40  ;;  %v5005_v63 = vpack.i.bf16 %v6755_v54, %v6752_v61  ;;  %v6771_v43 = vsel %vm803_vm2, %v816_v31, %v817_v9  ;;  %v832_v0 = vrot.slane %v6412_v56, 2  ;;  %v834_v7 = vrot.slane %v6526_v17, 2 }
  0x51   : > { %10385 = vst [vmem:[#allocation63_spill] sm:$0xff] %v6742_v26  ;;  %v836_v40 = vrot.slane %v6510_v3, 2  ;;  %v6777_v26 = vsel %vm803_vm2, %v837_v24, %v839_v28  ;;  %v5000_v53 = vpack.i.bf16 %v6771_v43, %v6767_v16  ;;  %v829_v9 = vrot.slane %v6393_v48, 2 }
  0x52   : > { %4991 = vrot.lane.b32.xlu1 %v4990_v5, %s6207_s21  ;;  %10386 = vst [vmem:[#allocation64_spill] sm:$0xff] %v6747_v55  ;;  %v841_v5 = vrot.slane %v6485_v39, 2  ;;  %v6789_v17 = vsel %vm803_vm2, %v832_v0, %v834_v7  ;;  %v831_v31 = vrot.slane %v6415_v57, 2  ;;  %v852_v28 = vrot.slane %v6596_v2, 2 }
  0x53   : > { %10387 = vst [vmem:[#allocation65_spill] sm:$0xff] %v6752_v61  ;;  %v857_v61 = vrot.slane %v6559_v4, 2  ;;  %v6803_v7 = vsel %vm803_vm2, %v827_v1, %v829_v9 }
  0x54   : > { %5011 = vrot.lane.b32.xlu2 %v5010_v50, %s6207_s21  ;;  %10388 = vst [vmem:[#allocation66_spill] sm:$0xff] %v6777_v26  ;;  %v6792_v50 = vsel %vm803_vm2, %v836_v40, %v837_v24  ;;  %v6807_v40 = vsel %vm803_vm2, %v831_v31, %v832_v0  ;;  %v847_v24 = vrot.slane %v6490_v44, 2  ;;  %v844_v0 = vrot.slane %v6482_v38, 2 }
  0x55   : > { %953 = vrot.lane.b32.xlu0 %v6747_v55, %s6206_s20  ;;  %v6780_v55 = vsel %vm803_vm2, %v841_v5, %v842_v36  ;;  %10390 = vst [vmem:[#allocation68_spill] sm:$0xff] %v6789_v17  ;;  %v854_v5 = vrot.slane %v6599_v45, 2  ;;  %v5020_v48 = vpack.i.bf16 %v6792_v50, %v6789_v17  ;;  %v849_v45 = vrot.slane %v6586_v32, 2 }
  0x56   : > { %10389 = vst [vmem:[#allocation67_spill] sm:$0xff] %v6780_v55  ;;  %v5025_v52 = vpack.i.bf16 %v6780_v55, %v6777_v26  ;;  %v851_v26 = vrot.slane %v6602_v13, 2  ;;  %v5015_v1 = vpack.i.bf16 %v6807_v40, %v6803_v7  ;;  %v846_v31 = vrot.slane %v6493_v29, 2 }
  0x57   : > { %v6813_v55 = vsel %vm803_vm2, %v852_v28, %v854_v5  ;;  %v6825_v32 = vsel %vm803_vm2, %v847_v24, %v849_v45  ;;  %v867_v5 = vrot.slane %v6654_v59, 2  ;;  %v872_v17 = vrot.slane %v6635_v10, 2 }
  0x58   : > { %10391 = vst [vmem:[#allocation69_spill] sm:$0xff] %v6813_v55  ;;  %v6839_v45 = vsel %vm803_vm2, %v842_v36, %v844_v0 }
  0x5a   : > { %5006 = vrot.lane.b32.xlu1 %v5005_v63, %s6207_s21  ;;  %v856_v63 = vrot.slane %v6579_v41, 2 }
  0x5c   : > { %5026 = vrot.lane.b32.xlu2 %v5025_v52, %s6207_s21  ;;  %v6828_v52 = vsel %vm803_vm2, %v851_v26, %v852_v28  ;;  %v6843_v26 = vsel %vm803_vm2, %v846_v31, %v847_v24  ;;  %v862_v28 = vrot.slane %v6571_v25, 2  ;;  %v859_v24 = vrot.slane %v6565_v60, 2 }
  0x5d   : > { %5001 = vrot.lane.b32.xlu0 %v5000_v53, %s6207_s21  ;;  %v6816_v53 = vsel %vm803_vm2, %v856_v63, %v857_v61  ;;  %v869_v63 = vrot.slane %v6660_v8, 2  ;;  %v5035_v38 = vpack.i.bf16 %v6828_v52, %v6825_v32  ;;  %v864_v8 = vrot.slane %v6679_v30, 2 }
  0x5e   : > { %10392 = vst [vmem:[#allocation70_spill] sm:$0xff] %v6816_v53  ;;  %v5040_v9 = vpack.i.bf16 %v6816_v53, %v6813_v55  ;;  %v866_v55 = vrot.slane %v6663_v21, 2  ;;  %v5030_v36 = vpack.i.bf16 %v6843_v26, %v6839_v45  ;;  %v861_v31 = vrot.slane %v6562_v6, 2 }
  0x5f   : > { %v6849_v53 = vsel %vm803_vm2, %v867_v5, %v869_v63  ;;  %v6861_v30 = vsel %vm803_vm2, %v862_v28, %v864_v8  ;;  %v6872_v60 = vsel %vm803_vm2, %v857_v61, %v859_v24  ;;  %v879_v8 = vrot.slane %v6724_v62, 2 }
  0x60   : > { %v876_v61 = vrot.slane %v6643_v11, 2  ;;  %v6903_v62 = vpack.i.bf16 %v6327_v14, %v6396_v49 }
  0x62   : > { %5021 = vrot.lane.b32.xlu1 %v5020_v48, %s6207_s21  ;;  %v871_v48 = vrot.slane %v6657_v33, 2 }
  0x64   : > { %5041 = vrot.lane.b32.xlu2 %v5040_v9, %s6207_s21  ;;  %v6864_v9 = vsel %vm803_vm2, %v866_v55, %v867_v5  ;;  %v5065_v5 = vpack.i.bf16 %v6401_v51, %v6390_v47  ;;  %v10442_v47 = vld [vmem:[#allocation59_spill] sm:$0xff] }
  0x65   : > { %5016 = vrot.lane.b32.xlu0 %v5015_v1, %s6207_s21  ;;  %v6852_v1 = vsel %vm803_vm2, %v871_v48, %v872_v17  ;;  %v5050_v63 = vpack.i.bf16 %v6864_v9, %v6861_v30  ;;  %v6875_v48 = vsel %vm803_vm2, %v861_v31, %v862_v28  ;;  %v6908_v31 = vpack.i.bf16 %v6369_v34, %v6354_v27 }
  0x66   : > { %v5055_v0 = vpack.i.bf16 %v6852_v1, %v6849_v53  ;;  %v5045_v55 = vpack.i.bf16 %v6875_v48, %v6872_v60 }
  0x6a   : > { %5036 = vrot.lane.b32.xlu1 %v5035_v38, %s6207_s21  ;;  %v877_v38 = vrot.slane %v6640_v35, 2 }
  0x6c   : > { %5056 = vrot.lane.b32.xlu2 %v5055_v0, %s6207_s21  ;;  %v6889_v28 = vsel %vm803_vm2, %v877_v38, %v879_v8  ;;  %v6895_v0 = vsel %vm803_vm2, %v876_v61, %v877_v38  ;;  %v6938_v8 = vpack.i.bf16 %v6336_v18, %v6330_v15  ;;  %v6948_v61 = vpack.i.bf16 %v6490_v44, %v6493_v29  ;;  %v10410_v18 = vld [vmem:[#allocation8_spill] sm:$0xff]  ;;  %v10411_v15 = vld [vmem:[#allocation19_spill] sm:$0xff] }
  0x6d   : > { %5031 = vrot.lane.b32.xlu0 %v5030_v36, %s6207_s21  ;;  %v874_v36 = vrot.slane %v6646_v19, 2 }
  0x6f   : > { %v6892_v24 = vsel %vm803_vm2, %v872_v17, %v874_v36  ;;  %v6942_v36 = vpack.i.bf16 %v6596_v2, %v6602_v13  ;;  %v6962_v13 = vpack.i.bf16 %v6479_v37, %v6485_v39  ;;  %v6966_v2 = vpack.i.bf16 %v6654_v59, %v6663_v21 }
  0x70   : > { %v5060_v19 = vpack.i.bf16 %v6895_v0, %v6892_v24 }
  0x72   : > { %5051 = vrot.lane.b32.xlu1 %v5050_v63, %s6207_s21  ;;  %v6918_v63 = vpack.i.bf16 %v6345_v23, %v6465_v22 }
  0x74   : > { %5066 = vrot.lane.b32.xlu2 %v5065_v5, %s6208_s22  ;;  %v6928_v5 = vpack.i.bf16 %v6412_v56, %v6415_v57 }
  0x75   : > { %5046 = vrot.lane.b32.xlu0 %v5045_v55, %s6207_s21  ;;  %v6912_v17 = vpop.permute.xlu2 %4936  ;;  %v6922_v55 = vpack.i.bf16 %v6501_v58, %v6510_v3  ;;  %v522_v3 = vld [vmem:[%s6313_s19 + $0xf0] sm:$0xff]  ;;  %v6956_v58 = vld [vmem:[%s6313_s19 + $0xf8] sm:$0xff] }
  0x76   : > { %10393 = vst [vmem:[#allocation71_spill] sm:$0xff] %v6912_v17  ;;  %v612_v44 = vrot.slane %v522_v3, 7  ;;  %v613_v29 = vrot.slane %v6956_v58, 7  ;;  %v6989_v58 = vpack.i.bf16 %v6559_v4, %v6579_v41  ;;  %v7013_v4 = vpack.i.bf16 %v6635_v10, %v6657_v33 }
  0x77   : > { %v7017_v41 = vpack.i.bf16 %v6455_v20, %v6387_v46  ;;  %v10404_v46 = vld [vmem:[#allocation20_spill] sm:$0xff]  ;;  %v10405_v20 = vld [vmem:[#allocation33_spill] sm:$0xff] }
  0x78   : > { %v6978_v39 = vsel %vm566_vm0, %v612_v44, %v613_v29  ;;  %v6981_v37 = vsel %vm566_vm0, 0.0, %v612_v44  ;;  %v7001_v44 = vpack.i.bf16 %v6640_v35, %v6643_v11  ;;  %v10401_v11 = vld [vmem:[#allocation11_spill] sm:$0xff]  ;;  %v7037_v33 = vpack.i.bf16 %v10405_v20, %v10404_v46  ;;  %v10414_v46 = vld [vmem:[#allocation21_spill] sm:$0xff]  ;;  %v10415_v20 = vld [vmem:[#allocation6_spill] sm:$0xff] }
  0x79   : > { %v6993_v3 = vpack.i.bf16 %v6978_v39, %v6981_v37  ;;  %v884_v51 = vrot.slane %v6978_v39, 1 }
  0x7a   : > { %1046 = vrot.lane.b32.xlu1 %v6889_v28, %s6207_s21 }
  0x7c   : > { %5081 = vrot.lane.b32.xlu2 %v6903_v62, %s6208_s22 }
  0x7d   : > { %5061 = vrot.lane.b32.xlu0 %v5060_v19, %s6207_s21  ;;  %v6932_v38 = vpop.permute.xlu2 %4941  ;;  %s4780_s21 = sshll.u32 %s6304_s30, 1 }
  0x7e   : > { %10394 = vst [vmem:[#allocation72_spill] sm:$0xff] %v6932_v38  ;;  %v7047_v38 = vpack.i.bf16 %v10411_v15, %v10410_v18  ;;  %v10419_v18 = vld [vmem:[#allocation31_spill] sm:$0xff]  ;;  %p486_p5 = scmp.lt.s32.totalorder %s4780_s21, 3 }
  0x80   : > { %s10725_s21 = smov (!%p486_p5, %s4780_s21), 3 }
  0x82   : > { %5076 = vrot.lane.b32.xlu1 %v6908_v31, %s6208_s22 }
  0x84   : > { %5096 = vrot.lane.b32.xlu2 %v6922_v55, %s6208_s22 }
  0x85   : > { %5071 = vrot.lane.b32.xlu0 %v6918_v63, %s6208_s22  ;;  %v6952_v19 = vpop.permute.xlu2 %4956 }
  0x86   : > { %10395 = vst [vmem:[#allocation73_spill] sm:$0xff] %v6952_v19  ;;  %v6973_v19 = vpack.i.bf16 %v6571_v25, %v6562_v6 }
  0x8a   : > { %5091 = vrot.lane.b32.xlu1 %v6928_v5, %s6208_s22 }
  0x8c   : > { %5111 = vrot.lane.b32.xlu2 %v6942_v36, %s6208_s22 }
  0x8d   : > { %5086 = vrot.lane.b32.xlu0 %v6938_v8, %s6208_s22 }
  0x8e   : > { %v6983_v21 = vpop.permute.xlu2 %4971 }
  0x8f   : > { %10396 = vst [vmem:[#allocation74_spill] sm:$0xff] %v6983_v21  ;;  %v7025_v21 = vpack.i.bf16 %v10401_v11, %v6476_v12  ;;  %v10407_v12 = vld [vmem:[#allocation18_spill] sm:$0xff]  ;;  %v10408_v11 = vld [vmem:[#allocation17_spill] sm:$0xff] }
  0x90   : > { %v6995_v59 = vpop.permute.xlu1 %4926  ;;  %v10409_v57 = vpack.i.bf16 %v10407_v12, %v10408_v11  ;;  %v10416_v12 = vld [vmem:[#allocation30_spill] sm:$0xff] }
  0x91   : > { %10397 = vst [vmem:[#allocation75_spill] sm:$0xff] %v6995_v59 }
  0x92   : > { %5106 = vrot.lane.b32.xlu1 %v6948_v61, %s6208_s22 }
  0x93   : > { %v7005_v25 = vpop.permute.xlu0 %4916 }
  0x94   : > { %5126 = vrot.lane.b32.xlu2 %v6966_v2, %s6208_s22  ;;  %10398 = vst [vmem:[#allocation76_spill] sm:$0xff] %v7005_v25 }
  0x95   : > { %5101 = vrot.lane.b32.xlu0 %v6962_v13, %s6208_s22 }
  0x98   : > { %v7019_v35 = vpop.permute.xlu1 %4931 }
  0x99   : > { %10400 = vst [vmem:[#allocation78_spill] sm:$0xff] %v7019_v35  ;;  %v10434_v35 = vld [vmem:[#allocation64_spill] sm:$0xff] }
  0x9a   : > { %5121 = vrot.lane.b32.xlu1 %v6973_v19, %s6208_s22 }
  0x9c   : > { %5141 = vrot.lane.b32.xlu2 %v6993_v3, %s6208_s22 }
  0x9d   : > { %5116 = vrot.lane.b32.xlu0 %v6989_v58, %s6208_s22  ;;  %v7007_v6 = vpop.permute.xlu2 %4986 }
  0x9e   : > { %10399 = vst [vmem:[#allocation77_spill] sm:$0xff] %v7007_v6  ;;  %v7029_v6 = vpop.permute.xlu0 %4921 }
  0x9f   : > { %10402 = vst [vmem:[#allocation11_spill] sm:$0xff] %v7029_v6 }
  0xa0   : > { %v7039_v56 = vpop.permute.xlu1 %4951 }
  0xa1   : > { %10406 = vst [vmem:[#allocation20_spill] sm:$0xff] %v7039_v56  ;;  %v7059_v56 = vpack.i.bf16 %v10415_v20, %v10414_v46  ;;  %v10423_v20 = vld [vmem:[#allocation34_spill] sm:$0xff] }
  0xa2   : > { %5136 = vrot.lane.b32.xlu1 %v7001_v44, %s6208_s22 }
  0xa4   : > { %5156 = vrot.lane.b32.xlu2 %v7017_v41, %s6209_s23 }
  0xa5   : > { %5131 = vrot.lane.b32.xlu0 %v7013_v4, %s6208_s22 }
  0xa6   : > { %v7031_v10 = vpop.permute.xlu2 %4996  ;;  %v7051_v49 = vpop.permute.xlu0 %4946 }
  0xa7   : > { %10403 = vst [vmem:[#allocation79_spill] sm:$0xff] %v7031_v10 }
  0xa8   : > { %10412 = vst [vmem:[#allocation33_spill] sm:$0xff] %v7051_v49  ;;  %v7065_v15 = vpop.permute.xlu1 %4966  ;;  %v10420_v49 = vld [vmem:[#allocation29_spill] sm:$0xff] }
  0xa9   : > { %10418 = vst [vmem:[#allocation17_spill] sm:$0xff] %v7065_v15  ;;  %v7071_v17 = vpack.i.bf16 %v10420_v49, %v10419_v18  ;;  %v10425_v15 = vld [vmem:[#allocation40_spill] sm:$0xff]  ;;  %v10427_v18 = vld [vmem:[#allocation43_spill] sm:$0xff] }
  0xaa   : > { %5151 = vrot.lane.b32.xlu1 %v7025_v21, %s6209_s23  ;;  %v7087_v34 = vpack.i.bf16 %v6702_v42, %v10425_v15  ;;  %v10431_v42 = vld [vmem:[#allocation46_spill] sm:$0xff]  ;;  %v10432_v15 = vld [vmem:[#allocation44_spill] sm:$0xff] }
  0xac   : > { %5171 = vrot.lane.b32.xlu2 %v7037_v33, %s6209_s23 }
  0xad   : > { %5146 = vrot.lane.b32.xlu0 %v10409_v57, %s6209_s23  ;;  %v10417_v57 = vld [vmem:[#allocation45_spill] sm:$0xff] }
  0xae   : > { %v7053_v14 = vpop.permute.xlu2 %5011  ;;  %v7063_v11 = vpack.i.bf16 %v10417_v57, %v10416_v12  ;;  %v10424_v12 = vld [vmem:[#allocation32_spill] sm:$0xff] }
  0xaf   : > { %10413 = vst [vmem:[#allocation18_spill] sm:$0xff] %v7053_v14  ;;  %v7075_v14 = vpop.permute.xlu0 %4961  ;;  %v7083_v57 = vpack.i.bf16 %v10424_v12, %v10423_v20  ;;  %v7107_v12 = vpack.i.bf16 %v10432_v15, %v10431_v42  ;;  %v693_v42 = vsel %vm566_vm0, %v613_v29, 0.0  ;;  %v10444_v29 = vld [vmem:[#allocation61_spill] sm:$0xff] }
  0xb0   : > { %10421 = vst [vmem:[#allocation8_spill] sm:$0xff] %v7075_v14  ;;  %v10428_v14 = vld [vmem:[#allocation39_spill] sm:$0xff] }
  0xb1   : > { %v7095_v27 = vpack.i.bf16 %v10428_v14, %v10427_v18  ;;  %v10436_v18 = vld [vmem:[#allocation56_spill] sm:$0xff] }
  0xb2   : > { %5166 = vrot.lane.b32.xlu1 %v7047_v38, %s6209_s23 }
  0xb4   : > { %5186 = vrot.lane.b32.xlu2 %v7063_v11, %s6209_s23 }
  0xb5   : > { %5161 = vrot.lane.b32.xlu0 %v7059_v56, %s6209_s23 }
  0xb6   : > { %v7077_v46 = vpop.permute.xlu2 %5026 }
  0xb7   : > { %10422 = vst [vmem:[#allocation19_spill] sm:$0xff] %v7077_v46 }
  0xba   : > { %5181 = vrot.lane.b32.xlu1 %v7071_v17, %s6209_s23 }
  0xbc   : > { %v7089_v49 = vpop.permute.xlu1 %4981  ;;  %5201 = vrot.lane.b32.xlu2 %v7087_v34, %s6209_s23 }
  0xbd   : > { %10426 = vst [vmem:[#allocation21_spill] sm:$0xff] %v7089_v49  ;;  %5176 = vrot.lane.b32.xlu0 %v7083_v57, %s6209_s23  ;;  %v10433_v49 = vld [vmem:[#allocation54_spill] sm:$0xff] }
  0xbe   : > { %v7101_v20 = vpop.permute.xlu2 %5041  ;;  %v7111_v23 = vpack.i.bf16 %v10434_v35, %v10433_v49  ;;  %v10440_v35 = vld [vmem:[#allocation57_spill] sm:$0xff]  ;;  %v10441_v49 = vld [vmem:[#allocation55_spill] sm:$0xff] }
  0xbf   : > { %v7099_v46 = vpop.permute.xlu0 %4976  ;;  %10430 = vst [vmem:[#allocation30_spill] sm:$0xff] %v7101_v20  ;;  %v7132_v59 = vpack.i.bf16 %v10441_v49, %v10440_v35 }
  0xc0   : > { %10429 = vst [vmem:[#allocation6_spill] sm:$0xff] %v7099_v46  ;;  %v10437_v46 = vld [vmem:[#allocation53_spill] sm:$0xff] }
  0xc1   : > { %v7119_v22 = vpack.i.bf16 %v10437_v46, %v10436_v18  ;;  %v7136_v46 = vpack.i.bf16 %v6767_v16, %v10442_v47  ;;  %v883_v18 = vrot.slane %v6981_v37, 1 }
  0xc2   : > { %5196 = vrot.lane.b32.xlu1 %v7095_v27, %s6209_s23 }
  0xc3   : > { %v885_v47 = vsel %vm725_vm1, %v883_v18, %v884_v51  ;;  %v10448_v18 = vld [vmem:[#allocation62_spill] sm:$0xff] }
  0xc4   : > { %v7113_v14 = vpop.permute.xlu1 %4991  ;;  %5216 = vrot.lane.b32.xlu2 %v7111_v23, %s6209_s23 }
  0xc5   : > { %10435 = vst [vmem:[#allocation45_spill] sm:$0xff] %v7113_v14  ;;  %5191 = vrot.lane.b32.xlu0 %v7107_v12, %s6209_s23  ;;  %v10446_v14 = vld [vmem:[#allocation63_spill] sm:$0xff] }
  0xc6   : > { %v7126_v15 = vpop.permute.xlu2 %5056  ;;  %v7159_v25 = vpack.i.bf16 %v6803_v7, %v10446_v14  ;;  %v10449_v7 = vld [vmem:[#allocation65_spill] sm:$0xff] }
  0xc7   : > { %v7123_v20 = vpop.permute.xlu0 %953  ;;  %10439 = vst [vmem:[#allocation29_spill] sm:$0xff] %v7126_v15  ;;  %v10445_v15 = vld [vmem:[#allocation58_spill] sm:$0xff]  ;;  %v7179_v14 = vpack.i.bf16 %v10449_v7, %v6771_v43 }
  0xc8   : > { %10438 = vst [vmem:[#allocation31_spill] sm:$0xff] %v7123_v20  ;;  %v886_v20 = vrot.slane %v693_v42, 1  ;;  %v5225_v6 = vpack.i.bf16 %v10445_v15, %v10444_v29  ;;  %v10450_v29 = vld [vmem:[#allocation67_spill] sm:$0xff] }
  0xca   : > { %5211 = vrot.lane.b32.xlu1 %v7119_v22, %s6209_s23  ;;  %v887_v16 = vsel %vm725_vm1, %v884_v51, %v886_v20  ;;  %v7167_v51 = vpack.i.bf16 %v10448_v18, %v6755_v54 }
  0xcc   : > { %v7140_v10 = vpop.permute.xlu1 %5006  ;;  %5231 = vrot.lane.b32.xlu2 %v7136_v46, %s6210_s24 }
  0xcd   : > { %10443 = vst [vmem:[#allocation34_spill] sm:$0xff] %v7140_v10  ;;  %5206 = vrot.lane.b32.xlu0 %v7132_v59, %s6209_s23  ;;  %v7155_v10 = vpack.i.bf16 %v887_v16, %v885_v47  ;;  %v7183_v47 = vpack.i.bf16 %v6839_v45, %v10450_v29  ;;  %v10452_v16 = vld [vmem:[#allocation66_spill] sm:$0xff]  ;;  %v10455_v45 = vld [vmem:[#allocation68_spill] sm:$0xff] }
  0xce   : > { %v7152_v49 = vpop.permute.xlu2 %5066  ;;  %v7191_v18 = vpack.i.bf16 %v10452_v16, %v6792_v50  ;;  %v7203_v7 = vpack.i.bf16 %v10455_v45, %v6807_v40  ;;  %v10456_v29 = vld [vmem:[#allocation70_spill] sm:$0xff]  ;;  %v10458_v16 = vld [vmem:[#allocation69_spill] sm:$0xff]  ;;  %v7231_v45 = vpack.i.bf16 %v6892_v24, %v6852_v1  ;;  %v7253_v24 = vpack.i.bf16 %v6861_v30, %v6875_v48 }
  0xcf   : > { %v7150_v35 = vpop.permute.xlu0 %5001  ;;  %v7273_v30 = vpack.i.bf16 %v6889_v28, %v6895_v0 }
  0xd2   : > { %5226 = vrot.lane.b32.xlu1 %v5225_v6, %s6210_s24 }
  0xd4   : > { %v7161_v15 = vpop.permute.xlu1 %5021  ;;  %5246 = vrot.lane.b32.xlu2 %v7159_v25, %s6210_s24 }
  0xd5   : > { %10447 = vst [vmem:[#allocation32_spill] sm:$0xff] %v7161_v15  ;;  %5221 = vrot.lane.b32.xlu0 %v7155_v10, %s6209_s23  ;;  %s6219_s23 = smov 40  }
  0xd6   : > { %v7173_v6 = vpop.permute.xlu2 %5081 }
  0xd7   : > { %v7171_v20 = vpop.permute.xlu0 %5016 }
  0xda   : > { %5241 = vrot.lane.b32.xlu1 %v7167_v51, %s6210_s24 }
  0xdc   : > { %v7185_v54 = vpop.permute.xlu1 %5036  ;;  %5261 = vrot.lane.b32.xlu2 %v7183_v47, %s6210_s24 }
  0xdd   : > { %10451 = vst [vmem:[#allocation40_spill] sm:$0xff] %v7185_v54  ;;  %5236 = vrot.lane.b32.xlu0 %v7179_v14, %s6210_s24  ;;  %v7207_v54 = vpack.i.bf16 %v6872_v60, %v10456_v29  ;;  %v7227_v60 = vpack.i.bf16 %v6825_v32, %v6843_v26  ;;  %v7239_v29 = vpack.i.bf16 %v6849_v53, %v6864_v9  ;;  %v889_v32 = vrot.slane %v6978_v39, 2 }
  0xde   : > { %v7197_v43 = vpop.permute.xlu2 %5096  ;;  %v891_v26 = vrot.slane %v693_v42, 2 }
  0xdf   : > { %v7195_v15 = vpop.permute.xlu0 %5031  ;;  %10454 = vst [vmem:[#allocation39_spill] sm:$0xff] %v7197_v43 }
  0xe0   : > { %10453 = vst [vmem:[#allocation43_spill] sm:$0xff] %v7195_v15  ;;  %v7215_v15 = vpack.i.bf16 %v10458_v16, %v6828_v52  ;;  %v888_v16 = vrot.slane %v6981_v37, 2  ;;  %v892_v9 = vsel %vm803_vm2, %v889_v32, %v891_v26 }
  0xe2   : > { %5256 = vrot.lane.b32.xlu1 %v7191_v18, %s6210_s24  ;;  %v890_v53 = vsel %vm803_vm2, %v888_v16, %v889_v32 }
  0xe3   : > { %v7261_v37 = vpack.i.bf16 %v892_v9, %v890_v53 }
  0xe4   : > { %v7209_v50 = vpop.permute.xlu1 %5051  ;;  %5276 = vrot.lane.b32.xlu2 %v7207_v54, %s6210_s24 }
  0xe5   : > { %10457 = vst [vmem:[#allocation46_spill] sm:$0xff] %v7209_v50  ;;  %5251 = vrot.lane.b32.xlu0 %v7203_v7, %s6210_s24 }
  0xe6   : > { %v7221_v40 = vpop.permute.xlu2 %5111 }
  0xe7   : > { %v7219_v43 = vpop.permute.xlu0 %5046  ;;  %10460 = vst [vmem:[#allocation54_spill] sm:$0xff] %v7221_v40 }
  0xe8   : > { %10459 = vst [vmem:[#allocation44_spill] sm:$0xff] %v7219_v43 }
  0xea   : > { %5271 = vrot.lane.b32.xlu1 %v7215_v15, %s6210_s24 }
  0xec   : > { %v7233_v52 = vpop.permute.xlu1 %1046  ;;  %5291 = vrot.lane.b32.xlu2 %v7231_v45, %s6210_s24 }
  0xed   : > { %10461 = vst [vmem:[#allocation64_spill] sm:$0xff] %v7233_v52  ;;  %5266 = vrot.lane.b32.xlu0 %v7227_v60, %s6210_s24 }
  0xee   : > { %v7247_v1 = vpop.permute.xlu2 %5126 }
  0xef   : > { %v7245_v50 = vpop.permute.xlu0 %5061  ;;  %10463 = vst [vmem:[#allocation53_spill] sm:$0xff] %v7247_v1  ;;  %v10493_v1 = vld [vmem:[#allocation76_spill] sm:$0xff] }
  0xf0   : > { %10462 = vst [vmem:[#allocation56_spill] sm:$0xff] %v7245_v50 }
  0xf2   : > { %5286 = vrot.lane.b32.xlu1 %v7239_v29, %s6210_s24 }
  0xf4   : > { %v7257_v52 = vpop.permute.xlu1 %5076  ;;  %5306 = vrot.lane.b32.xlu2 %v6918_v63, %s6211_s25 }
  0xf5   : > { %5281 = vrot.lane.b32.xlu0 %v7253_v24, %s6210_s24 }
  0xf6   : > { %v7267_v42 = vpop.permute.xlu2 %5141 }
  0xf7   : > { %v7265_v39 = vpop.permute.xlu0 %5071  ;;  %10464 = vst [vmem:[#allocation57_spill] sm:$0xff] %v7267_v42 }
  0xfa   : > { %5301 = vrot.lane.b32.xlu1 %v7261_v37, %s6210_s24 }
  0xfc   : > { %v7275_v48 = vpop.permute.xlu1 %5091  ;;  %5321 = vrot.lane.b32.xlu2 %v6938_v8, %s6211_s25 }
  0xfd   : > { %5296 = vrot.lane.b32.xlu0 %v7273_v30, %s6210_s24 }
  0xfe   : > { %v7283_v16 = vpop.permute.xlu2 %5156 }
  0xff   : > { %v7281_v63 = vpop.permute.xlu0 %5086 }
 0x102   : > { %5316 = vrot.lane.b32.xlu1 %v6903_v62, %s6211_s25 }
 0x104   : > { %v7287_v32 = vpop.permute.xlu1 %5106  ;;  %5336 = vrot.lane.b32.xlu2 %v6962_v13, %s6211_s25 }
 0x105   : > { %5311 = vrot.lane.b32.xlu0 %v6908_v31, %s6211_s25 }
 0x106   : > { %v7295_v0 = vpop.permute.xlu2 %5171 }
 0x107   : > { %v7293_v28 = vpop.permute.xlu0 %5101 }
 0x10a   : > { %5331 = vrot.lane.b32.xlu1 %v6922_v55, %s6211_s25 }
 0x10c   : > { %v7299_v8 = vpop.permute.xlu1 %5121  ;;  %5351 = vrot.lane.b32.xlu2 %v6989_v58, %s6211_s25 }
 0x10d   : > { %10465 = vst [vmem:[#allocation55_spill] sm:$0xff] %v7299_v8  ;;  %5326 = vrot.lane.b32.xlu0 %v6928_v5, %s6211_s25  ;;  %v5068_v8 = vunpack.i.l.bf16 %v7152_v49 }
 0x10e   : > { %v7307_v31 = vpop.permute.xlu2 %5186 }
 0x10f   : > { %v7305_v62 = vpop.permute.xlu0 %5116 }
 0x110   : > { %10466 = vst [vmem:[#allocation59_spill] sm:$0xff] %v7305_v62 }
 0x112   : > { %5346 = vrot.lane.b32.xlu1 %v6942_v36, %s6211_s25  ;;  %v10470_v36 = vmov 0.0  }
 0x114   : > { %v7311_v13 = vpop.permute.xlu1 %5136  ;;  %5366 = vrot.lane.b32.xlu2 %v7013_v4, %s6211_s25 }
 0x115   : > { %10467 = vst [vmem:[#allocation61_spill] sm:$0xff] %v7311_v13  ;;  %5341 = vrot.lane.b32.xlu0 %v6948_v61, %s6211_s25  ;;  %v10243_v13 = vmov 65535  }
 0x116   : > { %v7321_v5 = vpop.permute.xlu2 %5201  ;;  %v1997_v50 = vsel %vm725_vm1, 4294967295, %v10243_v13 }
 0x117   : > { %v7317_v55 = vpop.permute.xlu0 %5131  ;;  %10469 = vst [vmem:[#allocation63_spill] sm:$0xff] %v7321_v5 }
 0x118   : > { %10468 = vst [vmem:[#allocation58_spill] sm:$0xff] %v7317_v55 }
 0x11a   : > { %5361 = vrot.lane.b32.xlu1 %v6966_v2, %s6211_s25 }
 0x11c   : > { %v7323_v58 = vpop.permute.xlu1 %5151  ;;  %1427 = vrot.lane.b32.xlu2 %v10470_v36, %s6211_s25 }
 0x11d   : > { %5356 = vrot.lane.b32.xlu0 %v6973_v19, %s6211_s25 }
 0x11e   : > { %v7333_v4 = vpop.permute.xlu2 %5216 }
 0x11f   : > { %v7329_v26 = vpop.permute.xlu0 %5146  ;;  %10471 = vst [vmem:[#allocation62_spill] sm:$0xff] %v7333_v4 }
 0x122   : > { %5376 = vrot.lane.b32.xlu1 %v6993_v3, %s6211_s25 }
 0x124   : > { %v7335_v61 = vpop.permute.xlu1 %5166  ;;  %5391 = vrot.lane.b32.xlu2 %v7059_v56, %s6212_s26 }
 0x125   : > { %5371 = vrot.lane.b32.xlu0 %v7001_v44, %s6211_s25 }
 0x126   : > { %v7349_v3 = vpop.permute.xlu2 %5231 }
 0x127   : > { %v7341_v2 = vpop.permute.xlu0 %5161 }
 0x12a   : > { %5386 = vrot.lane.b32.xlu1 %v7017_v41, %s6212_s26 }
 0x12c   : > { %v7345_v19 = vpop.permute.xlu1 %5181  ;;  %5406 = vrot.lane.b32.xlu2 %v7083_v57, %s6212_s26 }
 0x12d   : > { %5381 = vrot.lane.b32.xlu0 %v7025_v21, %s6212_s26 }
 0x12e   : > { %v7363_v41 = vpop.permute.xlu2 %5246 }
 0x12f   : > { %v7353_v44 = vpop.permute.xlu0 %5176 }
 0x132   : > { %5401 = vrot.lane.b32.xlu1 %v7037_v33, %s6212_s26 }
 0x134   : > { %v7357_v56 = vpop.permute.xlu1 %5196  ;;  %5421 = vrot.lane.b32.xlu2 %v7107_v12, %s6212_s26 }
 0x135   : > { %10472 = vst [vmem:[#allocation65_spill] sm:$0xff] %v7357_v56  ;;  %5396 = vrot.lane.b32.xlu0 %v7047_v38, %s6212_s26 }
 0x136   : > { %v7377_v38 = vpop.permute.xlu2 %5261 }
 0x137   : > { %v7365_v21 = vpop.permute.xlu0 %5191 }
 0x138   : > { %10473 = vst [vmem:[#allocation67_spill] sm:$0xff] %v7365_v21 }
 0x13a   : > { %5416 = vrot.lane.b32.xlu1 %v7063_v11, %s6212_s26 }
 0x13c   : > { %v7369_v57 = vpop.permute.xlu1 %5211  ;;  %5436 = vrot.lane.b32.xlu2 %v7132_v59, %s6212_s26 }
 0x13d   : > { %10474 = vst [vmem:[#allocation66_spill] sm:$0xff] %v7369_v57  ;;  %5411 = vrot.lane.b32.xlu0 %v7071_v17, %s6212_s26 }
 0x13e   : > { %v7391_v59 = vpop.permute.xlu2 %5276 }
 0x13f   : > { %v7375_v33 = vpop.permute.xlu0 %5206  ;;  %10477 = vst [vmem:[#allocation69_spill] sm:$0xff] %v7391_v59 }
 0x140   : > { %10475 = vst [vmem:[#allocation68_spill] sm:$0xff] %v7375_v33 }
 0x142   : > { %5431 = vrot.lane.b32.xlu1 %v7087_v34, %s6212_s26 }
 0x144   : > { %v7381_v12 = vpop.permute.xlu1 %5226  ;;  %5451 = vrot.lane.b32.xlu2 %v7155_v10, %s6212_s26 }
 0x145   : > { %5426 = vrot.lane.b32.xlu0 %v7095_v27, %s6212_s26  ;;  %v5229_v62 = vunpack.i.h.bf16 %v7381_v12 }
 0x146   : > { %v7405_v10 = vpop.permute.xlu2 %5291 }
 0x147   : > { %v7387_v11 = vpop.permute.xlu0 %5221  ;;  %10478 = vst [vmem:[#allocation80_spill] sm:$0xff] %v7405_v10  ;;  %v1998_v10 = vsel %vm1996_vm3, %v1997_v50, 0  ;;  %v4881_v50 = vld [vmem:[%s10112_s2] sm:$0xff]  ;;  %vm3405_vm3 = vcmask 261120  }
 0x148   : > { %10476 = vst [vmem:[#allocation70_spill] sm:$0xff] %v7387_v11 }
 0x14a   : > { %5446 = vrot.lane.b32.xlu1 %v7111_v23, %s6212_s26  ;;  %v10479_v23 = vld [vmem:[#allocation10_spill] sm:$0xff] }
 0x14c   : > { %v7393_v17 = vpop.permute.xlu1 %5241  ;;  %5461 = vrot.lane.b32.xlu2 %v7179_v14, %s6213_s27 }
 0x14d   : > { %5441 = vrot.lane.b32.xlu0 %v7119_v22, %s6212_s26 }
 0x14f   : > { %v7399_v27 = vpop.permute.xlu0 %5236 }
 0x152   : > { %5456 = vrot.lane.b32.xlu1 %v7136_v46, %s6213_s27  ;;  %v7421_v46 = vpop.permute.xlu2 %5306 }
 0x154   : > { %v7403_v34 = vpop.permute.xlu1 %5256  ;;  %5476 = vrot.lane.b32.xlu2 %v7203_v7, %s6213_s27 }
 0x155   : > { %1520 = vrot.lane.b32.xlu0 %v10479_v23, %s6212_s26  ;;  %v5149_v23 = vunpack.i.h.bf16 %v7329_v26  ;;  %s6220_s26 = smov 48  }
 0x157   : > { %v7411_v22 = vpop.permute.xlu0 %5251 }
 0x15a   : > { %5471 = vrot.lane.b32.xlu1 %v7159_v25, %s6213_s27 }
 0x15c   : > { %v7415_v14 = vpop.permute.xlu1 %5271  ;;  %5491 = vrot.lane.b32.xlu2 %v7227_v60, %s6213_s27 }
 0x15d   : > { %10480 = vst [vmem:[#allocation81_spill] sm:$0xff] %v7415_v14  ;;  %5466 = vrot.lane.b32.xlu0 %v7167_v51, %s6213_s27  ;;  %v7435_v51 = vpop.permute.xlu2 %5321 }
 0x15f   : > { %v7423_v53 = vpop.permute.xlu0 %5266 }
 0x162   : > { %5486 = vrot.lane.b32.xlu1 %v7183_v47, %s6213_s27 }
 0x164   : > { %v7427_v7 = vpop.permute.xlu1 %5286  ;;  %5506 = vrot.lane.b32.xlu2 %v7253_v24, %s6213_s27 }
 0x165   : > { %10481 = vst [vmem:[#allocation82_spill] sm:$0xff] %v7427_v7  ;;  %5481 = vrot.lane.b32.xlu0 %v7191_v18, %s6213_s27  ;;  %v7449_v18 = vpop.permute.xlu2 %5336  ;;  %v4882_v7 = vld [vmem:[%s10112_s2 + $0x8] sm:$0xff] }
 0x167   : > { %v7433_v25 = vpop.permute.xlu0 %5281 }
 0x168   : > { %10482 = vst [vmem:[#allocation83_spill] sm:$0xff] %v7433_v25 }
 0x16a   : > { %5501 = vrot.lane.b32.xlu1 %v7207_v54, %s6213_s27 }
 0x16c   : > { %v7439_v60 = vpop.permute.xlu1 %5301  ;;  %5521 = vrot.lane.b32.xlu2 %v7273_v30, %s6213_s27 }
 0x16d   : > { %10483 = vst [vmem:[#allocation84_spill] sm:$0xff] %v7439_v60  ;;  %5496 = vrot.lane.b32.xlu0 %v7215_v15, %s6213_s27  ;;  %v7459_v15 = vpop.permute.xlu2 %5351 }
 0x16e   : > { %10485 = vst [vmem:[#allocation86_spill] sm:$0xff] %v7459_v15 }
 0x16f   : > { %v7445_v47 = vpop.permute.xlu0 %5296 }
 0x170   : > { %10484 = vst [vmem:[#allocation85_spill] sm:$0xff] %v7445_v47 }
 0x172   : > { %5516 = vrot.lane.b32.xlu1 %v7231_v45, %s6213_s27 }
 0x174   : > { %v7451_v24 = vpop.permute.xlu1 %5316 }
 0x175   : > { %5511 = vrot.lane.b32.xlu0 %v7239_v29, %s6213_s27  ;;  %v7467_v45 = vpop.permute.xlu2 %5366 }
 0x176   : > { %10486 = vst [vmem:[#allocation87_spill] sm:$0xff] %v7467_v45 }
 0x177   : > { %v7455_v54 = vpop.permute.xlu0 %5311 }
 0x17c   : > { %v7457_v9 = vpop.permute.xlu1 %5331 }
 0x17d   : > { %5526 = vrot.lane.b32.xlu0 %v7261_v37, %s6213_s27  ;;  %v7475_v42 = vpop.permute.xlu2 %1427  ;;  %v4884_v37 = vld [vmem:[%s10112_s2 + $0x18] sm:$0xff] }
 0x17e   : > { %10489 = vst [vmem:[#allocation90_spill] sm:$0xff] %v7475_v42  ;;  %v2000_v45 = vand.u32 %v4884_v37, %v1998_v10 }
 0x17f   : > { %v7463_v30 = vpop.permute.xlu0 %5326 }
 0x180   : > { %2006 = vmatpush.bf16.msra.mxu0 %v2000_v45 }
 0x184   : > { %v7465_v36 = vpop.permute.xlu1 %5346 }
 0x185   : > { %v7486_v57 = vpop.permute.xlu2 %5391 }
 0x187   : > { %v7469_v60 = vpop.permute.xlu0 %5341 }
 0x18c   : > { %v7471_v11 = vpop.permute.xlu1 %5361 }
 0x18d   : > { %10487 = vst [vmem:[#allocation88_spill] sm:$0xff] %v7471_v11  ;;  %v7498_v13 = vpop.permute.xlu2 %5406  ;;  %v4918_v11 = vunpack.i.l.bf16 %v10493_v1 }
 0x18f   : > { %v7473_v29 = vpop.permute.xlu0 %5356 }
 0x190   : > { %10488 = vst [vmem:[#allocation89_spill] sm:$0xff] %v7473_v29  ;;  %v1647_v29 = vsel %vm1646_vm4, 0.0, %v4918_v11  ;;  %v5309_v11 = vunpack.i.h.bf16 %v7421_v46 }
 0x194   : > { %v7477_v47 = vpop.permute.xlu1 %5376 }
 0x195   : > { %10490 = vst [vmem:[#allocation91_spill] sm:$0xff] %v7477_v47  ;;  %v4883_v47 = vld [vmem:[%s10112_s2 + $0x10] sm:$0xff]  ;;  %v7507_v37 = vpop.permute.xlu2 %5421 }
 0x196   : > { %2007 = vmatpush.bf16.msra.mxu0 %v4883_v47 }
 0x197   : > { %v7479_v4 = vpop.permute.xlu0 %5371 }
 0x198   : > { %10491 = vst [vmem:[#allocation92_spill] sm:$0xff] %v7479_v4 }
 0x19a   : > { %2008 = vmatpush.bf16.msra.mxu0 %v4882_v7  ;;  %v10495_v7 = vld [vmem:[#allocation45_spill] sm:$0xff] }
 0x19b   : > { %v4993_v5 = vunpack.i.l.bf16 %v10495_v7 }
 0x19c   : > { %v7488_v55 = vpop.permute.xlu1 %5386 }
 0x19d   : > { %v7514_v25 = vpop.permute.xlu2 %5436  ;;  %v1679_v59 = vsel %vm1678_vm6, %v1647_v29, %v4993_v5 }
 0x19e   : > { %2009 = vmatpush.bf16.msra.mxu0 %v4881_v50  ;;  %10494 = vst [vmem:[#allocation76_spill] sm:$0xff] %v7514_v25  ;;  %v5069_v50 = vunpack.i.h.bf16 %v7152_v49  ;;  %v5228_v25 = vunpack.i.l.bf16 %v7381_v12  ;;  %v1711_v56 = vsel %vm1710_vm5, %v1679_v59, %v5068_v8 }
 0x19f   : > { %v5382_v42 = vpop.permute.xlu0 %5381 }
 0x1a0   : > { %v1712_v49 = vsel %vm1710_vm5, %v1679_v59, %v5069_v50  ;;  %v5383_v29 = vunpack.i.l.bf16 %v5382_v42 }
 0x1a1   : > { %v1745_v14 = vsel %vm1743_vm7, %v1712_v49, %v5149_v23 }
 0x1a2   : > { %v1778_v12 = vsel %vm1776_vm9, %v1745_v14, %v5229_v62  ;;  %v10498_v62 = vld [vmem:[#allocation11_spill] sm:$0xff] }
 0x1a3   : > { %v1811_v50 = vsel %vm1809_vm8, %v1778_v12, %v5309_v11  ;;  %v10499_v11 = vld [vmem:[#allocation79_spill] sm:$0xff]  ;;  %v5154_v12 = vunpack.i.h.bf16 %v7323_v58 }
 0x1a4   : > { %v7493_v4 = vpop.permute.xlu1 %5401 }
 0x1a7   : > { %v7503_v10 = vpop.permute.xlu0 %5396 }
 0x1ac   : > { %v7505_v45 = vpop.permute.xlu1 %5416 }
 0x1af   : > { %v7511_v47 = vpop.permute.xlu0 %5411 }
 0x1b4   : > { %v7509_v33 = vpop.permute.xlu1 %5431 }
 0x1b5   : > { %10492 = vst [vmem:[#allocation93_spill] sm:$0xff] %v7509_v33  ;;  %v5148_v33 = vunpack.i.l.bf16 %v7329_v26  ;;  %v5384_v26 = vunpack.i.h.bf16 %v5382_v42 }
 0x1b7   : > { %v7529_v15 = vpop.permute.xlu0 %5426  ;;  %v1744_v5 = vsel %vm1743_vm7, %v1711_v56, %v5148_v33  ;;  %v1844_v42 = vsel %vm1842_vm10, %v1811_v50, %v5384_v26  ;;  %v10500_v26 = vld [vmem:[#allocation14_spill] sm:$0xff] }
 0x1b8   : > { %10497 = vst [vmem:[#allocation94_spill] sm:$0xff] %v7529_v15  ;;  %v1777_v8 = vsel %vm1776_vm9, %v1744_v5, %v5228_v25  ;;  %v7538_v15 = vpop.permute.xlu2 %5451  ;;  %v4919_v25 = vunpack.i.h.bf16 %v10493_v1  ;;  %v4998_v5 = vunpack.i.l.bf16 %v10499_v11  ;;  %v10501_v1 = vld [vmem:[#allocation12_spill] sm:$0xff] }
 0x1ba   : > { %v1648_v50 = vsel %vm1646_vm4, %v10501_v1, %v4919_v25  ;;  %v5388_v25 = vunpack.i.l.bf16 %v7488_v55 }
 0x1bc   : > { %v7518_v43 = vpop.permute.xlu1 %5446 }
 0x1bd   : > { %10496 = vst [vmem:[#allocation45_spill] sm:$0xff] %v7518_v43  ;;  %v5308_v43 = vunpack.i.l.bf16 %v7421_v46 }
 0x1bf   : > { %v1810_v21 = vsel %vm1809_vm8, %v1777_v8, %v5308_v43  ;;  %v4923_v43 = vunpack.i.l.bf16 %v10498_v62  ;;  %v7547_v49 = vpop.permute.xlu0 %5441  ;;  %v5073_v8 = vunpack.i.l.bf16 %v7265_v39 }
 0x1c0   : > { %v1843_v56 = vsel %vm1842_vm10, %v1810_v21, %v5383_v29  ;;  %v4994_v21 = vunpack.i.h.bf16 %v10495_v7 }
 0x1c1   : > { %v1649_v29 = vsel %vm1646_vm4, %v10500_v26, %v4923_v43 }
 0x1c2   : > { %v1681_v7 = vsel %vm1678_vm6, %v1649_v29, %v4998_v5 }
 0x1c4   : > { %v5457_v59 = vpop.permute.xlu1 %5456 }
 0x1c5   : > { %v5459_v46 = vunpack.i.h.bf16 %v5457_v59  ;;  %v5458_v40 = vunpack.i.l.bf16 %v5457_v59  ;;  %v5153_v59 = vunpack.i.l.bf16 %v7323_v58 }
 0x1c7   : > { %v1876_v33 = vsel %vm1875_vm11, %v1843_v56, %v5458_v40  ;;  %v1877_v23 = vsel %vm1875_vm11, %v1844_v42, %v5459_v46  ;;  %v5074_v40 = vunpack.i.h.bf16 %v7265_v39  ;;  %v5234_v46 = vunpack.i.h.bf16 %v7349_v3  ;;  %v5462_v42 = vpop.permute.xlu2 %5461 }
 0x1c8   : > { %v1908_v14 = vpack.c.bf16 %v1877_v23, %v1876_v33  ;;  %v5233_v56 = vunpack.i.l.bf16 %v7349_v3  ;;  %v1680_v33 = vsel %vm1678_vm6, %v1648_v50, %v4994_v21  ;;  %v5314_v23 = vunpack.i.h.bf16 %v7455_v54  ;;  %v7576_v50 = vpop.permute.xlu0 %1520 }
 0x1c9   : > { %v5313_v39 = vunpack.i.l.bf16 %v7455_v54  ;;  %v1713_v43 = vsel %vm1710_vm5, %v1680_v33, %v5073_v8  ;;  %v1714_v58 = vsel %vm1710_vm5, %v1681_v7, %v5074_v40  ;;  %v5464_v1 = vunpack.i.h.bf16 %v5462_v42 }
 0x1ca   : > { %4798 = vmatmul.msk.bf16.vlgmr.msra.gmra.mxu0 %vm1947_vm12, %v1908_v14  ;;  %v5389_v14 = vunpack.i.h.bf16 %v7488_v55  ;;  %v1746_v26 = vsel %vm1743_vm7, %v1713_v43, %v5153_v59  ;;  %v1747_v3 = vsel %vm1743_vm7, %v1714_v58, %v5154_v12  ;;  %v5463_v5 = vunpack.i.l.bf16 %v5462_v42 }
 0x1cb   : > { %v1779_v21 = vsel %vm1776_vm9, %v1746_v26, %v5233_v56  ;;  %v1780_v29 = vsel %vm1776_vm9, %v1747_v3, %v5234_v46  ;;  %v4924_v42 = vunpack.i.h.bf16 %v10498_v62  ;;  %v10502_v56 = vld [vmem:[#allocation75_spill] sm:$0xff]  ;;  %v4999_v46 = vunpack.i.h.bf16 %v10499_v11  ;;  %v10504_v26 = vld [vmem:[#allocation5_spill] sm:$0xff] }
 0x1cc   : > { %v1812_v54 = vsel %vm1809_vm8, %v1779_v21, %v5313_v39  ;;  %v1813_v8 = vsel %vm1809_vm8, %v1780_v29, %v5314_v23  ;;  %v4928_v33 = vunpack.i.l.bf16 %v10502_v56  ;;  %v5003_v23 = vunpack.i.l.bf16 %v7150_v35  ;;  %v10503_v39 = vld [vmem:[#allocation22_spill] sm:$0xff] }
 0x1cd   : > { %v1845_v40 = vsel %vm1842_vm10, %v1812_v54, %v5388_v25  ;;  %v1846_v55 = vsel %vm1842_vm10, %v1813_v8, %v5389_v14  ;;  %v1650_v43 = vsel %vm1646_vm4, %v10503_v39, %v4924_v42  ;;  %v5079_v58 = vunpack.i.h.bf16 %v7257_v52 }
 0x1ce   : > { %v1878_v59 = vsel %vm1875_vm11, %v1845_v40, %v5463_v5  ;;  %v1879_v12 = vsel %vm1875_vm11, %v1846_v55, %v5464_v1  ;;  %v5078_v14 = vunpack.i.l.bf16 %v7257_v52  ;;  %v5159_v25 = vunpack.i.h.bf16 %v7283_v16 }
 0x1cf   : > { %v1909_v7 = vpack.c.bf16 %v1879_v12, %v1878_v59  ;;  %v5158_v62 = vunpack.i.l.bf16 %v7283_v16  ;;  %v1651_v3 = vsel %vm1646_vm4, %v10504_v26, %v4928_v33  ;;  %v5239_v1 = vunpack.i.h.bf16 %v7399_v27  ;;  %v10506_v26 = vld [vmem:[#allocation34_spill] sm:$0xff] }
 0x1d0   : > { %v5238_v11 = vunpack.i.l.bf16 %v7399_v27  ;;  %v5467_v5 = vpop.permute.xlu0 %5466  ;;  %v1682_v21 = vsel %vm1678_vm6, %v1650_v43, %v4999_v46  ;;  %v1683_v29 = vsel %vm1678_vm6, %v1651_v3, %v5003_v23  ;;  %v5319_v54 = vunpack.i.h.bf16 %v7451_v24 }
 0x1d1   : > { %v5318_v52 = vunpack.i.l.bf16 %v7451_v24  ;;  %v1715_v8 = vsel %vm1710_vm5, %v1682_v21, %v5078_v14  ;;  %v1716_v16 = vsel %vm1710_vm5, %v1683_v29, %v5079_v58  ;;  %v5394_v40 = vunpack.i.h.bf16 %v7486_v57 }
 0x1d2   : > { %v5393_v55 = vunpack.i.l.bf16 %v7486_v57  ;;  %v1748_v59 = vsel %vm1743_vm7, %v1715_v8, %v5158_v62  ;;  %v1749_v27 = vsel %vm1743_vm7, %v1716_v16, %v5159_v25  ;;  %v5469_v12 = vunpack.i.h.bf16 %v5467_v5  ;;  %v10505_v25 = vld [vmem:[#allocation78_spill] sm:$0xff] }
 0x1d3   : > { %v5468_v42 = vunpack.i.l.bf16 %v5467_v5  ;;  %v1782_v33 = vsel %vm1776_vm9, %v1749_v27, %v5239_v1  ;;  %v4929_v14 = vunpack.i.h.bf16 %v10502_v56  ;;  %v4933_v62 = vunpack.i.l.bf16 %v10505_v25  ;;  %v10508_v56 = vld [vmem:[#allocation9_spill] sm:$0xff] }
 0x1d4   : > { %v1815_v46 = vsel %vm1809_vm8, %v1782_v33, %v5319_v54  ;;  %v5008_v3 = vunpack.i.l.bf16 %v10506_v26  ;;  %v5004_v1 = vunpack.i.h.bf16 %v7150_v35  ;;  %v5083_v5 = vunpack.i.l.bf16 %v7173_v6  ;;  %v10507_v54 = vld [vmem:[#allocation7_spill] sm:$0xff] }
 0x1d5   : > { %v1848_v39 = vsel %vm1842_vm10, %v1815_v46, %v5394_v40  ;;  %v5164_v21 = vunpack.i.h.bf16 %v7341_v2  ;;  %v5163_v29 = vunpack.i.l.bf16 %v7341_v2  ;;  %v1653_v8 = vsel %vm1646_vm4, %v10508_v56, %v4933_v62 }
 0x1d6   : > { %v1881_v43 = vsel %vm1875_vm11, %v1848_v39, %v5469_v12  ;;  %v5244_v16 = vunpack.i.h.bf16 %v7393_v17  ;;  %v5243_v40 = vunpack.i.l.bf16 %v7393_v17  ;;  %v1685_v35 = vsel %vm1678_vm6, %v1653_v8, %v5008_v3  ;;  %v10509_v3 = vld [vmem:[#allocation71_spill] sm:$0xff] }
 0x1d7   : > { %v5323_v27 = vunpack.i.l.bf16 %v7435_v51  ;;  %v5169_v56 = vunpack.i.h.bf16 %v7335_v61  ;;  %v5168_v8 = vunpack.i.l.bf16 %v7335_v61 }
 0x1da   : > { %4799 = vmatmul.msk.bf16.gmra.mxu0 %vm1947_vm12, %v1909_v7  ;;  %v1781_v7 = vsel %vm1776_vm9, %v1748_v59, %v5238_v11  ;;  %v5084_v11 = vunpack.i.h.bf16 %v7173_v6  ;;  %v5324_v6 = vunpack.i.h.bf16 %v7435_v51 }
 0x1db   : > { %v1814_v24 = vsel %vm1809_vm8, %v1781_v7, %v5318_v52  ;;  %v1652_v52 = vsel %vm1646_vm4, %v10507_v54, %v4929_v14  ;;  %v5398_v7 = vunpack.i.l.bf16 %v7503_v10  ;;  %v5089_v54 = vunpack.i.h.bf16 %v7281_v63 }
 0x1dc   : > { %v1847_v23 = vsel %vm1842_vm10, %v1814_v24, %v5393_v55  ;;  %v5472_v55 = vpop.permute.xlu1 %5471  ;;  %v1684_v59 = vsel %vm1678_vm6, %v1652_v52, %v5004_v1  ;;  %v1718_v12 = vsel %vm1710_vm5, %v1685_v35, %v5084_v11  ;;  %v4938_v1 = vunpack.i.l.bf16 %v10509_v3 }
 0x1dd   : > { %v1880_v57 = vsel %vm1875_vm11, %v1847_v23, %v5468_v42  ;;  %v1717_v2 = vsel %vm1710_vm5, %v1684_v59, %v5083_v5  ;;  %v5399_v42 = vunpack.i.h.bf16 %v7503_v10  ;;  %v1751_v33 = vsel %vm1743_vm7, %v1718_v12, %v5164_v21  ;;  %v10510_v5 = vld [vmem:[#allocation18_spill] sm:$0xff] }
 0x1de   : > { %v1910_v58 = vpack.c.bf16 %v1881_v43, %v1880_v57  ;;  %v1750_v17 = vsel %vm1743_vm7, %v1717_v2, %v5163_v29  ;;  %v5474_v24 = vunpack.i.h.bf16 %v5472_v55  ;;  %v5473_v46 = vunpack.i.l.bf16 %v5472_v55  ;;  %v10512_v55 = vld [vmem:[#allocation13_spill] sm:$0xff] }
 0x1df   : > { %v1783_v23 = vsel %vm1776_vm9, %v1750_v17, %v5243_v40  ;;  %v1784_v39 = vsel %vm1776_vm9, %v1751_v33, %v5244_v16  ;;  %v4934_v11 = vunpack.i.h.bf16 %v10505_v25  ;;  %v5013_v21 = vunpack.i.l.bf16 %v10510_v5  ;;  %v10511_v16 = vld [vmem:[#allocation2_spill] sm:$0xff] }
 0x1e0   : > { %v1816_v51 = vsel %vm1809_vm8, %v1783_v23, %v5323_v27  ;;  %v1817_v57 = vsel %vm1809_vm8, %v1784_v39, %v5324_v6  ;;  %v5009_v29 = vunpack.i.h.bf16 %v10506_v26  ;;  %v5088_v52 = vunpack.i.l.bf16 %v7281_v63  ;;  %v5477_v6 = vpop.permute.xlu2 %5476 }
 0x1e1   : > { %v1849_v43 = vsel %vm1842_vm10, %v1816_v51, %v5398_v7  ;;  %v1655_v40 = vsel %vm1646_vm4, %v10511_v16, %v4938_v1  ;;  %v1654_v25 = vsel %vm1646_vm4, %v10512_v55, %v4934_v11  ;;  %v5249_v35 = vunpack.i.h.bf16 %v7363_v41  ;;  %v5482_v55 = vpop.permute.xlu0 %5481 }
 0x1e2   : > { %v1882_v10 = vsel %vm1875_vm11, %v1849_v43, %v5473_v46  ;;  %v5248_v59 = vunpack.i.l.bf16 %v7363_v41  ;;  %v1687_v26 = vsel %vm1678_vm6, %v1655_v40, %v5013_v21  ;;  %v1686_v27 = vsel %vm1678_vm6, %v1654_v25, %v5009_v29 }
 0x1e3   : > { %v5329_v63 = vunpack.i.h.bf16 %v7463_v30  ;;  %v5328_v2 = vunpack.i.l.bf16 %v7463_v30  ;;  %v1720_v61 = vsel %vm1710_vm5, %v1687_v26, %v5089_v54  ;;  %v1719_v12 = vsel %vm1710_vm5, %v1686_v27, %v5088_v52 }
 0x1e4   : > { %v5403_v7 = vunpack.i.l.bf16 %v7493_v4  ;;  %v1752_v33 = vsel %vm1743_vm7, %v1719_v12, %v5168_v8  ;;  %v1753_v41 = vsel %vm1743_vm7, %v1720_v61, %v5169_v56  ;;  %v5479_v17 = vunpack.i.h.bf16 %v5477_v6  ;;  %v10514_v56 = vld [vmem:[#allocation3_spill] sm:$0xff] }
 0x1e5   : > { %v1785_v46 = vsel %vm1776_vm9, %v1752_v33, %v5248_v59  ;;  %v1786_v23 = vsel %vm1776_vm9, %v1753_v41, %v5249_v35  ;;  %v5014_v1 = vunpack.i.h.bf16 %v10510_v5  ;;  %v5018_v11 = vunpack.i.l.bf16 %v7171_v20 }
 0x1e6   : > { %v1818_v30 = vsel %vm1809_vm8, %v1785_v46, %v5328_v2  ;;  %v1819_v39 = vsel %vm1809_vm8, %v1786_v23, %v5329_v63  ;;  %v5094_v21 = vunpack.i.h.bf16 %v7275_v48  ;;  %v5093_v29 = vunpack.i.l.bf16 %v7275_v48  ;;  %v10516_v23 = vld [vmem:[#allocation33_spill] sm:$0xff] }
 0x1e7   : > { %v1851_v51 = vsel %vm1842_vm10, %v1818_v30, %v5403_v7  ;;  %v5174_v54 = vunpack.i.h.bf16 %v7295_v0  ;;  %v5173_v52 = vunpack.i.l.bf16 %v7295_v0  ;;  %v5254_v40 = vunpack.i.h.bf16 %v7411_v22 }
 0x1e8   : > { %v5253_v5 = vunpack.i.l.bf16 %v7411_v22  ;;  %v5334_v48 = vunpack.i.h.bf16 %v7457_v9  ;;  %v5333_v59 = vunpack.i.l.bf16 %v7457_v9  ;;  %v5409_v26 = vunpack.i.h.bf16 %v7498_v13 }
 0x1e9   : > { %v5408_v27 = vunpack.i.l.bf16 %v7498_v13  ;;  %v5484_v2 = vunpack.i.h.bf16 %v5482_v55  ;;  %v5483_v61 = vunpack.i.l.bf16 %v5482_v55  ;;  %v4948_v30 = vunpack.i.l.bf16 %v10516_v23 }
 0x1ea   : > { %4800 = vmatmul.msk.bf16.gmra.mxu0 %vm1947_vm12, %v1910_v58  ;;  %v1850_v58 = vsel %vm1842_vm10, %v1817_v57, %v5399_v42  ;;  %v5404_v42 = vunpack.i.h.bf16 %v7493_v4 }
 0x1eb   : > { %v1883_v14 = vsel %vm1875_vm11, %v1850_v58, %v5474_v24  ;;  %v5478_v24 = vunpack.i.l.bf16 %v5477_v6 }
 0x1ec   : > { %v1911_v62 = vpack.c.bf16 %v1883_v14, %v1882_v10  ;;  %v1852_v57 = vsel %vm1842_vm10, %v1819_v39, %v5404_v42  ;;  %v4939_v10 = vunpack.i.h.bf16 %v10509_v3  ;;  %v10513_v14 = vld [vmem:[#allocation72_spill] sm:$0xff] }
 0x1ed   : > { %v1884_v4 = vsel %vm1875_vm11, %v1851_v51, %v5478_v24  ;;  %v1885_v43 = vsel %vm1875_vm11, %v1852_v57, %v5479_v17  ;;  %v10515_v3 = vld [vmem:[#allocation4_spill] sm:$0xff]  ;;  %v4944_v46 = vunpack.i.h.bf16 %v10513_v14  ;;  %v5019_v57 = vunpack.i.h.bf16 %v7171_v20 }
 0x1ee   : > { %v1912_v58 = vpack.c.bf16 %v1885_v43, %v1884_v4  ;;  %v1656_v8 = vsel %vm1646_vm4, %v10514_v56, %v4939_v10  ;;  %v10517_v39 = vld [vmem:[#allocation32_spill] sm:$0xff]  ;;  %v10518_v4 = vld [vmem:[#allocation39_spill] sm:$0xff]  ;;  %v5179_v10 = vunpack.i.h.bf16 %v7353_v44 }
 0x1ef   : > { %v1688_v25 = vsel %vm1678_vm6, %v1656_v8, %v5014_v1  ;;  %v5023_v51 = vunpack.i.l.bf16 %v10517_v39  ;;  %v5099_v43 = vunpack.i.h.bf16 %v10518_v4  ;;  %v10519_v1 = vld [vmem:[#allocation16_spill] sm:$0xff]  ;;  %v5339_v8 = vunpack.i.h.bf16 %v7449_v18 }
 0x1f0   : > { %v1721_v0 = vsel %vm1710_vm5, %v1688_v25, %v5093_v29  ;;  %v5259_v29 = vunpack.i.h.bf16 %v7403_v34 }
 0x1f1   : > { %v1754_v63 = vsel %vm1743_vm7, %v1721_v0, %v5173_v52  ;;  %v5487_v52 = vpop.permute.xlu1 %5486 }
 0x1f2   : > { %v1787_v12 = vsel %vm1776_vm9, %v1754_v63, %v5253_v5  ;;  %v5413_v5 = vunpack.i.l.bf16 %v7511_v47  ;;  %v5489_v25 = vunpack.i.h.bf16 %v5487_v52 }
 0x1f3   : > { %v1820_v9 = vsel %vm1809_vm8, %v1787_v12, %v5333_v59  ;;  %v10522_v12 = vld [vmem:[#allocation19_spill] sm:$0xff] }
 0x1f4   : > { %v1853_v33 = vsel %vm1842_vm10, %v1820_v9, %v5408_v27  ;;  %v5024_v9 = vunpack.i.h.bf16 %v10517_v39 }
 0x1f5   : > { %v1886_v13 = vsel %vm1875_vm11, %v1853_v33, %v5483_v61  ;;  %v4949_v61 = vunpack.i.h.bf16 %v10516_v23  ;;  %v5103_v33 = vunpack.i.l.bf16 %v7293_v28 }
 0x1fa   : > { %4801 = vmatmul.msk.bf16.gmra.mxu0 %vm1947_vm12, %v1911_v62  ;;  %v4943_v62 = vunpack.i.l.bf16 %v10513_v14  ;;  %v10520_v14 = vld [vmem:[#allocation15_spill] sm:$0xff] }
 0x1fc   : > { %v1657_v16 = vsel %vm1646_vm4, %v10515_v3, %v4943_v62  ;;  %v5178_v62 = vunpack.i.l.bf16 %v7353_v44  ;;  %v5338_v3 = vunpack.i.l.bf16 %v7449_v18 }
 0x1fd   : > { %v1689_v35 = vsel %vm1678_vm6, %v1657_v16, %v5018_v11  ;;  %v1658_v11 = vsel %vm1646_vm4, %v10519_v1, %v4944_v46  ;;  %v10524_v46 = vld [vmem:[#allocation28_spill] sm:$0xff] }
 0x1fe   : > { %v1722_v6 = vsel %vm1710_vm5, %v1689_v35, %v5094_v21  ;;  %v1659_v21 = vsel %vm1646_vm4, %v10520_v14, %v4948_v30  ;;  %v1690_v56 = vsel %vm1678_vm6, %v1658_v11, %v5019_v57  ;;  %v5488_v35 = vunpack.i.l.bf16 %v5487_v52  ;;  %v5492_v57 = vpop.permute.xlu2 %5491 }
 0x1ff   : > { %v1755_v22 = vsel %vm1743_vm7, %v1722_v6, %v5174_v54  ;;  %v5258_v54 = vunpack.i.l.bf16 %v7403_v34  ;;  %v1691_v20 = vsel %vm1678_vm6, %v1659_v21, %v5023_v51  ;;  %v1660_v23 = vsel %vm1646_vm4, %v10524_v46, %v4949_v61 }
 0x200   : > { %v1788_v42 = vsel %vm1776_vm9, %v1755_v22, %v5254_v40  ;;  %v1724_v16 = vsel %vm1710_vm5, %v1691_v20, %v5099_v43  ;;  %v5414_v40 = vunpack.i.h.bf16 %v7511_v47  ;;  %v10521_v22 = vld [vmem:[#allocation20_spill] sm:$0xff]  ;;  %v5264_v30 = vunpack.i.h.bf16 %v7377_v38 }
 0x201   : > { %v1821_v7 = vsel %vm1809_vm8, %v1788_v42, %v5334_v48  ;;  %v1757_v34 = vsel %vm1743_vm7, %v1724_v16, %v5179_v10  ;;  %v5028_v42 = vunpack.i.l.bf16 %v10522_v12  ;;  %v5263_v51 = vunpack.i.l.bf16 %v7377_v38 }
 0x202   : > { %v1854_v41 = vsel %vm1842_vm10, %v1821_v7, %v5409_v26  ;;  %v1790_v59 = vsel %vm1776_vm9, %v1757_v34, %v5259_v29  ;;  %v5104_v7 = vunpack.i.h.bf16 %v7293_v28  ;;  %v5344_v28 = vunpack.i.h.bf16 %v7469_v60 }
 0x203   : > { %v1887_v17 = vsel %vm1875_vm11, %v1854_v41, %v5484_v2  ;;  %v1823_v0 = vsel %vm1809_vm8, %v1790_v59, %v5339_v8  ;;  %v4953_v2 = vunpack.i.l.bf16 %v10521_v22  ;;  %v5184_v41 = vunpack.i.h.bf16 %v7345_v19  ;;  %v10527_v59 = vld [vmem:[#allocation23_spill] sm:$0xff] }
 0x204   : > { %v1913_v24 = vpack.c.bf16 %v1887_v17, %v1886_v13  ;;  %v1856_v26 = vsel %vm1842_vm10, %v1823_v0, %v5414_v40  ;;  %v5183_v13 = vunpack.i.l.bf16 %v7345_v19  ;;  %v10523_v17 = vld [vmem:[#allocation27_spill] sm:$0xff]  ;;  %v5343_v43 = vunpack.i.l.bf16 %v7469_v60  ;;  %v10528_v0 = vld [vmem:[#allocation24_spill] sm:$0xff] }
 0x205   : > { %v1889_v27 = vsel %vm1875_vm11, %v1856_v26, %v5489_v25  ;;  %v5419_v10 = vunpack.i.h.bf16 %v7505_v45  ;;  %v5494_v11 = vunpack.i.h.bf16 %v5492_v57  ;;  %v5493_v14 = vunpack.i.l.bf16 %v5492_v57 }
 0x206   : > { %v4954_v16 = vunpack.i.h.bf16 %v10521_v22  ;;  %v5029_v40 = vunpack.i.h.bf16 %v10522_v12  ;;  %v5109_v34 = vunpack.i.h.bf16 %v7287_v32  ;;  %v5108_v25 = vunpack.i.l.bf16 %v7287_v32 }
 0x207   : > { %v5269_v26 = vunpack.i.h.bf16 %v7423_v53  ;;  %v5349_v32 = vunpack.i.h.bf16 %v7465_v36  ;;  %v5424_v12 = vunpack.i.h.bf16 %v7507_v37 }
 0x20a   : > { %4802 = vmatmul.msk.bf16.gmra.mxu0 %vm1947_vm12, %v1912_v58  ;;  %v5098_v58 = vunpack.i.l.bf16 %v10518_v4  ;;  %v1692_v4 = vsel %vm1678_vm6, %v1660_v23, %v5024_v9 }
 0x20c   : > { %v1723_v44 = vsel %vm1710_vm5, %v1690_v56, %v5098_v58  ;;  %v1725_v58 = vsel %vm1710_vm5, %v1692_v4, %v5103_v33  ;;  %v10529_v4 = vld [vmem:[#allocation8_spill] sm:$0xff] }
 0x20d   : > { %v1756_v55 = vsel %vm1743_vm7, %v1723_v44, %v5178_v62  ;;  %v5418_v62 = vunpack.i.l.bf16 %v7505_v45  ;;  %v1758_v1 = vsel %vm1743_vm7, %v1725_v58, %v5183_v13  ;;  %v10530_v58 = vld [vmem:[#allocation40_spill] sm:$0xff] }
 0x20e   : > { %v1789_v48 = vsel %vm1776_vm9, %v1756_v55, %v5258_v54  ;;  %v1791_v21 = vsel %vm1776_vm9, %v1758_v1, %v5263_v51  ;;  %v7821_v51 = vld [vmem:[%s10114_s4] ss:$0 sm:$0xff] }
 0x20f   : > { %v1822_v18 = vsel %vm1809_vm8, %v1789_v48, %v5338_v3  ;;  %v1824_v60 = vsel %vm1809_vm8, %v1791_v21, %v5343_v43  ;;  %v10525_v3 = vld [vmem:[#allocation73_spill] sm:$0xff]  ;;  %v5188_v48 = vunpack.i.l.bf16 %v7307_v31  ;;  %v10531_v1 = vld [vmem:[#allocation54_spill] sm:$0xff]  ;;  %v10532_v21 = vld [vmem:[#allocation67_spill] sm:$0xff] }
 0x210   : > { %v1855_v6 = vsel %vm1842_vm10, %v1822_v18, %v5413_v5  ;;  %v1857_v52 = vsel %vm1842_vm10, %v1824_v60, %v5418_v62  ;;  %v4958_v44 = vunpack.i.l.bf16 %v10525_v3  ;;  %v10526_v5 = vld [vmem:[#allocation43_spill] sm:$0xff]  ;;  %v5193_v60 = vunpack.i.l.bf16 %v10532_v21 }
 0x211   : > { %v1888_v47 = vsel %vm1875_vm11, %v1855_v6, %v5488_v35  ;;  %v1890_v45 = vsel %vm1875_vm11, %v1857_v52, %v5493_v14  ;;  %v5033_v55 = vunpack.i.l.bf16 %v10526_v5  ;;  %v5189_v35 = vunpack.i.h.bf16 %v7307_v31 }
 0x212   : > { %v1914_v63 = vpack.c.bf16 %v1889_v27, %v1888_v47  ;;  %v1663_v18 = vsel %vm1646_vm4, %v10527_v59, %v4958_v44  ;;  %v1662_v6 = vsel %vm1646_vm4, %v10528_v0, %v4954_v16  ;;  %v5268_v47 = vunpack.i.l.bf16 %v7423_v53  ;;  %v5497_v27 = vpop.permute.xlu0 %5496  ;;  %v10535_v44 = vld [vmem:[#allocation81_spill] sm:$0xff]  ;;  %v10537_v0 = vld [vmem:[#allocation94_spill] sm:$0xff] }
 0x213   : > { %v1695_v22 = vsel %vm1678_vm6, %v1663_v18, %v5033_v55  ;;  %v5498_v33 = vunpack.i.l.bf16 %v5497_v27  ;;  %v5034_v62 = vunpack.i.h.bf16 %v10526_v5  ;;  %v5274_v16 = vunpack.i.h.bf16 %v10535_v44  ;;  %v5502_v5 = vpop.permute.xlu1 %5501 }
 0x214   : > { %v1728_v61 = vsel %vm1710_vm5, %v1695_v22, %v5109_v34 }
 0x215   : > { %v1761_v53 = vsel %vm1743_vm7, %v1728_v61, %v5189_v35 }
 0x216   : > { %v1794_v13 = vsel %vm1776_vm9, %v1761_v53, %v5269_v26  ;;  %v5428_v26 = vunpack.i.l.bf16 %v10537_v0 }
 0x21a   : > { %4803 = vmatmul.msk.bf16.gmra.mxu0 %vm1947_vm12, %v1913_v24  ;;  %v1661_v24 = vsel %vm1646_vm4, %v10523_v17, %v4953_v2  ;;  %v5348_v2 = vunpack.i.l.bf16 %v7465_v36  ;;  %v1827_v17 = vsel %vm1809_vm8, %v1794_v13, %v5349_v32 }
 0x21b   : > { %v1693_v39 = vsel %vm1678_vm6, %v1661_v24, %v5028_v42  ;;  %v5423_v42 = vunpack.i.l.bf16 %v7507_v37  ;;  %v7812_v24 = vld [vmem:[%s10113_s3] ss:$0 sm:$0xff]  ;;  %v1860_v46 = vsel %vm1842_vm10, %v1827_v17, %v5424_v12 }
 0x21c   : > { %v1726_v19 = vsel %vm1710_vm5, %v1693_v39, %v5104_v7  ;;  %v5499_v7 = vunpack.i.h.bf16 %v5497_v27  ;;  %v4959_v39 = vunpack.i.h.bf16 %v10525_v3  ;;  %v5504_v27 = vunpack.i.h.bf16 %v5502_v5 }
 0x21d   : > { %v1759_v38 = vsel %vm1743_vm7, %v1726_v19, %v5184_v41 }
 0x21e   : > { %v1792_v29 = vsel %vm1776_vm9, %v1759_v38, %v5264_v30  ;;  %v1893_v30 = vsel %vm1875_vm11, %v1860_v46, %v5499_v7  ;;  %v5114_v38 = vunpack.i.h.bf16 %v10531_v1  ;;  %v10540_v46 = vld [vmem:[#allocation41_spill] sm:$0xff] }
 0x21f   : > { %v1825_v54 = vsel %vm1809_vm8, %v1792_v29, %v5344_v28  ;;  %v4963_v28 = vunpack.i.l.bf16 %v10529_v4  ;;  %v5194_v29 = vunpack.i.h.bf16 %v10532_v21 }
 0x220   : > { %v1858_v20 = vsel %vm1842_vm10, %v1825_v54, %v5419_v10  ;;  %v5038_v10 = vunpack.i.l.bf16 %v10530_v58  ;;  %v10533_v54 = vld [vmem:[#allocation26_spill] sm:$0xff] }
 0x221   : > { %v1891_v56 = vsel %vm1875_vm11, %v1858_v20, %v5494_v11  ;;  %v5113_v11 = vunpack.i.l.bf16 %v10531_v1  ;;  %v1664_v52 = vsel %vm1646_vm4, %v10533_v54, %v4959_v39  ;;  %v10534_v20 = vld [vmem:[#allocation25_spill] sm:$0xff]  ;;  %v10542_v39 = vld [vmem:[#allocation30_spill] sm:$0xff] }
 0x222   : > { %v1915_v8 = vpack.c.bf16 %v1891_v56, %v1890_v45  ;;  %v1665_v45 = vsel %vm1646_vm4, %v10534_v20, %v4963_v28  ;;  %v1696_v3 = vsel %vm1678_vm6, %v1664_v52, %v5034_v62 }
 0x223   : > { %v1729_v55 = vsel %vm1710_vm5, %v1696_v3, %v5113_v11 }
 0x224   : > { %v1762_v59 = vsel %vm1743_vm7, %v1729_v55, %v5193_v60 }
 0x22a   : > { %4804 = vmatmul.msk.bf16.gmra.mxu0 %vm1947_vm12, %v1914_v63  ;;  %v1694_v63 = vsel %vm1678_vm6, %v1662_v6, %v5029_v40  ;;  %v5273_v40 = vunpack.i.l.bf16 %v10535_v44  ;;  %v5429_v6 = vunpack.i.h.bf16 %v10537_v0  ;;  %v10547_v0 = vld [vmem:[#allocation69_spill] sm:$0xff] }
 0x22b   : > { %v1727_v31 = vsel %vm1710_vm5, %v1694_v63, %v5108_v25  ;;  %v10536_v25 = vld [vmem:[#allocation86_spill] sm:$0xff]  ;;  %v5503_v63 = vunpack.i.l.bf16 %v5502_v5 }
 0x22c   : > { %v1760_v9 = vsel %vm1743_vm7, %v1727_v31, %v5188_v48  ;;  %v5354_v35 = vunpack.i.h.bf16 %v10536_v25  ;;  %v5353_v48 = vunpack.i.l.bf16 %v10536_v25  ;;  %v1795_v61 = vsel %vm1776_vm9, %v1762_v59, %v5273_v40 }
 0x22d   : > { %v1793_v41 = vsel %vm1776_vm9, %v1760_v9, %v5268_v47 }
 0x22e   : > { %v1826_v36 = vsel %vm1809_vm8, %v1793_v41, %v5348_v2  ;;  %v10538_v2 = vld [vmem:[#allocation17_spill] sm:$0xff]  ;;  %v1828_v9 = vsel %vm1809_vm8, %v1795_v61, %v5353_v48 }
 0x22f   : > { %v1859_v37 = vsel %vm1842_vm10, %v1826_v36, %v5423_v42  ;;  %v4968_v31 = vunpack.i.l.bf16 %v10538_v2  ;;  %v4964_v42 = vunpack.i.h.bf16 %v10529_v4  ;;  %v5043_v4 = vunpack.i.l.bf16 %v10542_v39 }
 0x230   : > { %v1892_v23 = vsel %vm1875_vm11, %v1859_v37, %v5498_v33  ;;  %v1861_v33 = vsel %vm1842_vm10, %v1828_v9, %v5428_v26  ;;  %v5278_v26 = vunpack.i.l.bf16 %v10547_v0 }
 0x231   : > { %v1916_v19 = vpack.c.bf16 %v1893_v30, %v1892_v23  ;;  %v1894_v17 = vsel %vm1875_vm11, %v1861_v33, %v5503_v63  ;;  %v1667_v23 = vsel %vm1646_vm4, %v10540_v46, %v4968_v31  ;;  %v10541_v30 = vld [vmem:[#allocation42_spill] sm:$0xff] }
 0x232   : > { %v1699_v59 = vsel %vm1678_vm6, %v1667_v23, %v5043_v4  ;;  %v4969_v23 = vunpack.i.h.bf16 %v10538_v2  ;;  %v5044_v4 = vunpack.i.h.bf16 %v10542_v39 }
 0x23a   : > { %4805 = vmatmul.msk.bf16.gmra.mxu0 %vm1947_vm12, %v1915_v8  ;;  %v1697_v8 = vsel %vm1678_vm6, %v1665_v45, %v5038_v10  ;;  %v10545_v45 = vld [vmem:[#allocation65_spill] sm:$0xff] }
 0x23b   : > { %v1730_v34 = vsel %vm1710_vm5, %v1697_v8, %v5114_v38  ;;  %v5198_v8 = vunpack.i.l.bf16 %v10545_v45 }
 0x23c   : > { %v1763_v18 = vsel %vm1743_vm7, %v1730_v34, %v5194_v29  ;;  %v10546_v34 = vld [vmem:[#allocation10_spill] sm:$0xff] }
 0x23d   : > { %v1796_v12 = vsel %vm1776_vm9, %v1763_v18, %v5274_v16 }
 0x23e   : > { %v1829_v53 = vsel %vm1809_vm8, %v1796_v12, %v5354_v35 }
 0x23f   : > { %v1862_v41 = vsel %vm1842_vm10, %v1829_v53, %v5429_v6  ;;  %v5279_v6 = vunpack.i.h.bf16 %v10547_v0 }
 0x240   : > { %v1895_v37 = vsel %vm1875_vm11, %v1862_v41, %v5504_v27 }
 0x241   : > { %v1917_v1 = vpack.c.bf16 %v1895_v37, %v1894_v17  ;;  %v10550_v37 = vld [vmem:[#allocation74_spill] sm:$0xff] }
 0x242   : > { %v4973_v46 = vunpack.i.l.bf16 %v10550_v37 }
 0x247   : > { %v2011_v57 = vpop.f32.mrf.mxu0 }
 0x248   : > { %v2094_v43 = vmul.f32 %v7812_v24, %v2011_v57  ;;  %v1666_v57 = vsel %vm1646_vm4, %v10541_v30, %v4964_v42  ;;  %v10549_v42 = vld [vmem:[#allocation93_spill] sm:$0xff] }
 0x249   : > { %v5434_v9 = vunpack.i.h.bf16 %v10549_v42  ;;  %v5433_v53 = vunpack.i.l.bf16 %v10549_v42 }
 0x24a   : > { %v2129_v14 = vadd.f32 %v7821_v51, %v2094_v43  ;;  %4806 = vmatmul.msk.bf16.gmra.mxu0 %vm1947_vm12, %v1916_v19  ;;  %v5039_v43 = vunpack.i.h.bf16 %v10530_v58  ;;  %v10543_v19 = vld [vmem:[#allocation59_spill] sm:$0xff] }
 0x24b   : > { %v5119_v10 = vunpack.i.h.bf16 %v10543_v19  ;;  %v5118_v20 = vunpack.i.l.bf16 %v10543_v19 }
 0x24c   : > { %v2161_v56 = vmax.f32 %v2129_v14, 0.0  ;;  %v1698_v18 = vsel %vm1678_vm6, %v1666_v57, %v5039_v43 }
 0x24d   : > { %v1732_v27 = vsel %vm1710_vm5, %v1699_v59, %v5119_v10  ;;  %v1731_v63 = vsel %vm1710_vm5, %v1698_v18, %v5118_v20  ;;  %v10551_v10 = vld [vmem:[#allocation44_spill] sm:$0xff] }
 0x24e   : > { %v2236_v22 = vrot.slane %v2161_v56, 7  ;;  %v5199_v56 = vunpack.i.h.bf16 %v10545_v45  ;;  %v1764_v61 = vsel %vm1743_vm7, %v1731_v63, %v5198_v8  ;;  %v10554_v8 = vld [vmem:[#allocation55_spill] sm:$0xff] }
 0x24f   : > { %v2013_v47 = vpop.f32.mrf.mxu0  ;;  %v1797_v30 = vsel %vm1776_vm9, %v1764_v61, %v5278_v26 }
 0x250   : > { %v2095_v32 = vmul.f32 %v7812_v24, %v2013_v47  ;;  %v7861_v13 = vsel %vm566_vm0, 0.0, %v2236_v22  ;;  %v5507_v47 = vpop.permute.xlu2 %5506  ;;  %v1765_v12 = vsel %vm1743_vm7, %v1732_v27, %v5199_v56 }
 0x251   : > { %10539 = vst [vmem:[#allocation11_spill] sm:$0xff] %v7861_v13  ;;  %v2393_v38 = vrot.slane %v7861_v13, 1  ;;  %v2468_v29 = vrot.slane %v7861_v13, 2  ;;  %v5509_v33 = vunpack.i.h.bf16 %v5507_v47  ;;  %v5508_v41 = vunpack.i.l.bf16 %v5507_v47 }
 0x252   : > { %v2130_v7 = vadd.f32 %v7821_v51, %v2095_v32  ;;  %v1798_v57 = vsel %vm1776_vm9, %v1765_v12, %v5279_v6 }
 0x254   : > { %v2162_v36 = vmax.f32 %v2130_v7, 0.0 }
 0x256   : > { %v2237_v28 = vrot.slane %v2162_v36, 7 }
 0x257   : > { %v2016_v62 = vpop.f32.mrf.mxu0 }
 0x258   : > { %v7874_v11 = vsel %vm566_vm0, %v2236_v22, %v2237_v28  ;;  %v2347_v14 = vsel %vm566_vm0, %v2237_v28, 0.0  ;;  %v2096_v21 = vmul.f32 %v7812_v24, %v2016_v62  ;;  %v10548_v22 = vld [vmem:[#allocation89_spill] sm:$0xff]  ;;  %v5048_v62 = vunpack.i.l.bf16 %v10551_v10 }
 0x259   : > { %10544 = vst [vmem:[#allocation79_spill] sm:$0xff] %v7874_v11  ;;  %v2396_v60 = vrot.slane %v2347_v14, 1  ;;  %v2471_v54 = vrot.slane %v2347_v14, 2  ;;  %v2394_v52 = vrot.slane %v7874_v11, 1  ;;  %v2469_v58 = vrot.slane %v7874_v11, 2 }
 0x25a   : > { %v2131_v3 = vadd.f32 %v7821_v51, %v2096_v21  ;;  %4807 = vmatmul.msk.bf16.gmra.mxu0 %vm1947_vm12, %v1917_v1  ;;  %v5359_v32 = vunpack.i.h.bf16 %v10548_v22  ;;  %v5358_v31 = vunpack.i.l.bf16 %v10548_v22 }
 0x25b   : > { %v7887_v44 = vsel %vm725_vm1, %v2393_v38, %v2394_v52  ;;  %v7890_v16 = vsel %vm725_vm1, %v2394_v52, %v2396_v60  ;;  %v7893_v40 = vsel %vm803_vm2, %v2469_v58, %v2471_v54  ;;  %v7896_v5 = vsel %vm803_vm2, %v2468_v29, %v2469_v58  ;;  %v10552_v29 = vld [vmem:[#allocation38_spill] sm:$0xff]  ;;  %v10553_v52 = vld [vmem:[#allocation35_spill] sm:$0xff] }
 0x25c   : > { %v2163_v55 = vmax.f32 %v2131_v3, 0.0  ;;  %v5535_v25 = vpack.i.bf16 %v7887_v44, %v10546_v34  ;;  %v1830_v28 = vsel %vm1809_vm8, %v1797_v30, %v5358_v31  ;;  %v1831_v43 = vsel %vm1809_vm8, %v1798_v57, %v5359_v32  ;;  %v10555_v31 = vld [vmem:[#allocation63_spill] sm:$0xff] }
 0x25d   : > { %v1863_v1 = vsel %vm1842_vm10, %v1830_v28, %v5433_v53  ;;  %v1864_v38 = vsel %vm1842_vm10, %v1831_v43, %v5434_v9  ;;  %v1668_v60 = vsel %vm1646_vm4, %v10552_v29, %v4969_v23  ;;  %v4974_v54 = vunpack.i.h.bf16 %v10550_v37  ;;  %v10557_v23 = vld [vmem:[#allocation60_spill] sm:$0xff] }
 0x25e   : > { %5536 = vrot.lane.b32.xlu2 %v5535_v25, %s6215_s28  ;;  %v2239_v36 = vrot.slane %v2163_v55, 7  ;;  %v1896_v21 = vsel %vm1875_vm11, %v1863_v1, %v5508_v41  ;;  %v1897_v39 = vsel %vm1875_vm11, %v1864_v38, %v5509_v33  ;;  %v1669_v58 = vsel %vm1646_vm4, %v10553_v52, %v4973_v46  ;;  %v10556_v41 = vld [vmem:[#allocation83_spill] sm:$0xff]  ;;  %v10558_v1 = vld [vmem:[#allocation88_spill] sm:$0xff] }
 0x25f   : > { %v2018_v7 = vpop.f32.mrf.mxu0  ;;  %v1700_v20 = vsel %vm1678_vm6, %v1668_v60, %v5044_v4  ;;  %v1701_v56 = vsel %vm1678_vm6, %v1669_v58, %v5048_v62  ;;  %v5124_v3 = vunpack.i.h.bf16 %v10554_v8  ;;  %v1918_v25 = vpack.c.bf16 %v1897_v39, %v1896_v21  ;;  %v5512_v4 = vpop.permute.xlu0 %5511  ;;  %v10559_v29 = vld [vmem:[#allocation76_spill] sm:$0xff] }
 0x260   : > { %v2097_v17 = vmul.f32 %v7812_v24, %v2018_v7  ;;  %v7930_v2 = vsel %vm566_vm0, 0.0, %v2239_v36  ;;  %v5123_v32 = vunpack.i.l.bf16 %v10554_v8  ;;  %v5204_v61 = vunpack.i.h.bf16 %v10555_v31 }
 0x261   : > { %v2398_v59 = vrot.slane %v7930_v2, 1  ;;  %v2473_v26 = vrot.slane %v7930_v2, 2  ;;  %v5203_v12 = vunpack.i.l.bf16 %v10555_v31  ;;  %v5283_v57 = vunpack.i.l.bf16 %v10556_v41 }
 0x262   : > { %v2132_v19 = vadd.f32 %v7821_v51, %v2097_v17  ;;  %v1734_v62 = vsel %vm1710_vm5, %v1701_v56, %v5124_v3  ;;  %v5364_v38 = vunpack.i.h.bf16 %v10558_v1  ;;  %v5439_v60 = vunpack.i.h.bf16 %v10559_v29  ;;  %v10560_v3 = vld [vmem:[#allocation6_spill] sm:$0xff] }
 0x263   : > { %v1767_v39 = vsel %vm1743_vm7, %v1734_v62, %v5204_v61  ;;  %v5438_v52 = vunpack.i.l.bf16 %v10559_v29  ;;  %v10565_v62 = vld [vmem:[#allocation53_spill] sm:$0xff] }
 0x264   : > { %v2164_v14 = vmax.f32 %v2132_v19, 0.0  ;;  %v1733_v19 = vsel %vm1710_vm5, %v1700_v20, %v5123_v32  ;;  %v5514_v20 = vunpack.i.h.bf16 %v5512_v4 }
 0x265   : > { %v1766_v21 = vsel %vm1743_vm7, %v1733_v19, %v5203_v12 }
 0x266   : > { %v2240_v45 = vrot.slane %v2164_v14, 7  ;;  %v5363_v14 = vunpack.i.l.bf16 %v10558_v1  ;;  %v5129_v1 = vunpack.i.h.bf16 %v10565_v62 }
 0x267   : > { %v2021_v55 = vpop.f32.mrf.mxu0 }
 0x268   : > { %v7944_v18 = vsel %vm566_vm0, %v2239_v36, %v2240_v45  ;;  %v2348_v0 = vsel %vm566_vm0, %v2240_v45, 0.0  ;;  %v2098_v6 = vmul.f32 %v7812_v24, %v2021_v55  ;;  %v5284_v36 = vunpack.i.h.bf16 %v10556_v41 }
 0x269   : > { %v2401_v47 = vrot.slane %v2348_v0, 1  ;;  %v2476_v27 = vrot.slane %v2348_v0, 2  ;;  %v2399_v63 = vrot.slane %v7944_v18, 1  ;;  %v2474_v22 = vrot.slane %v7944_v18, 2 }
 0x26a   : > { %v2133_v42 = vadd.f32 %v7821_v51, %v2098_v6  ;;  %4808 = vmatmul.msk.bf16.gmra.mxu0 %vm1947_vm12, %v1918_v25  ;;  %v5513_v45 = vunpack.i.l.bf16 %v5512_v4  ;;  %v4978_v55 = vunpack.i.l.bf16 %v10560_v3  ;;  %v10561_v25 = vld [vmem:[#allocation46_spill] sm:$0xff]  ;;  %v1799_v0 = vsel %vm1776_vm9, %v1766_v21, %v5283_v57 }
 0x26b   : > { %v7957_v9 = vsel %vm725_vm1, %v2398_v59, %v2399_v63  ;;  %v7960_v53 = vsel %vm725_vm1, %v2399_v63, %v2401_v47  ;;  %v7963_v7 = vsel %vm803_vm2, %v2473_v26, %v2474_v22  ;;  %v7966_v33 = vsel %vm803_vm2, %v2474_v22, %v2476_v27 }
 0x26c   : > { %v2165_v17 = vmax.f32 %v2133_v42, 0.0  ;;  %v5540_v46 = vpack.i.bf16 %v7957_v9, %v7890_v16  ;;  %v5530_v30 = vpack.i.bf16 %v7957_v9, %v10557_v23  ;;  %v7978_v43 = vpack.i.bf16 %v7966_v33, %v7963_v7 }
 0x26d   : > { %v5053_v59 = vunpack.i.l.bf16 %v10561_v25  ;;  %v1800_v6 = vsel %vm1776_vm9, %v1767_v39, %v5284_v36  ;;  %v5049_v26 = vunpack.i.h.bf16 %v10551_v10  ;;  %v1832_v47 = vsel %vm1809_vm8, %v1799_v0, %v5363_v14  ;;  %v10562_v10 = vld [vmem:[#allocation36_spill] sm:$0xff]  ;;  %v10563_v36 = vld [vmem:[#allocation37_spill] sm:$0xff]  ;;  %v10567_v0 = vld [vmem:[#allocation82_spill] sm:$0xff] }
 0x26e   : > { %5541 = vrot.lane.b32.xlu0 %v5540_v46, %s6215_s28  ;;  %5531 = vrot.lane.b32.xlu1 %v5530_v30, %s6213_s27  ;;  %v2242_v56 = vrot.slane %v2165_v17, 7  ;;  %v1833_v27 = vsel %vm1809_vm8, %v1800_v6, %v5364_v38  ;;  %v1865_v22 = vsel %vm1842_vm10, %v1832_v47, %v5438_v52  ;;  %v1670_v41 = vsel %vm1646_vm4, %v10562_v10, %v4974_v54  ;;  %v10564_v46 = vld [vmem:[#allocation21_spill] sm:$0xff]  ;;  %v10569_v10 = vld [vmem:[#allocation87_spill] sm:$0xff] }
 0x26f   : > { %v2023_v58 = vpop.f32.mrf.mxu0  ;;  %v1866_v32 = vsel %vm1842_vm10, %v1833_v27, %v5439_v60  ;;  %v1898_v12 = vsel %vm1875_vm11, %v1865_v22, %v5513_v45  ;;  %v1671_v17 = vsel %vm1646_vm4, %v10563_v36, %v4978_v55  ;;  %v4983_v30 = vunpack.i.l.bf16 %v10564_v46 }
 0x270   : > { %v2099_v8 = vmul.f32 %v7812_v24, %v2023_v58  ;;  %v8002_v31 = vsel %vm566_vm0, 0.0, %v2242_v56  ;;  %v1899_v42 = vsel %vm1875_vm11, %v1866_v32, %v5514_v20  ;;  %v1703_v57 = vsel %vm1678_vm6, %v1671_v17, %v5053_v59  ;;  %v5517_v32 = vpop.permute.xlu1 %5516 }
 0x271   : > { %v1702_v4 = vsel %vm1678_vm6, %v1670_v41, %v5049_v26  ;;  %v5128_v38 = vunpack.i.l.bf16 %v10565_v62  ;;  %v1919_v21 = vpack.c.bf16 %v1899_v42, %v1898_v12  ;;  %v2403_v37 = vrot.slane %v8002_v31, 1 }
 0x272   : > { %v2134_v63 = vadd.f32 %v7821_v51, %v2099_v8  ;;  %v2478_v60 = vrot.slane %v8002_v31, 2  ;;  %v10566_v8 = vld [vmem:[#allocation68_spill] sm:$0xff]  ;;  %v5289_v6 = vunpack.i.h.bf16 %v10567_v0  ;;  %v5288_v22 = vunpack.i.l.bf16 %v10567_v0 }
 0x273   : > { %v5209_v55 = vunpack.i.h.bf16 %v10566_v8  ;;  %v5208_v59 = vunpack.i.l.bf16 %v10566_v8  ;;  %v5368_v41 = vunpack.i.l.bf16 %v10569_v10  ;;  %v1735_v17 = vsel %vm1710_vm5, %v1702_v4, %v5128_v38 }
 0x274   : > { %v2166_v61 = vmax.f32 %v2134_v63, 0.0  ;;  %v5369_v62 = vunpack.i.h.bf16 %v10569_v10  ;;  %v5519_v4 = vunpack.i.h.bf16 %v5517_v32  ;;  %v4984_v48 = vunpack.i.h.bf16 %v10564_v46 }
 0x276   : > { %v2243_v19 = vrot.slane %v2166_v61, 7 }
 0x277   : > { %v2026_v14 = vpop.f32.mrf.mxu0 }
 0x278   : > { %v8019_v54 = vsel %vm566_vm0, %v2242_v56, %v2243_v19  ;;  %v2349_v39 = vsel %vm566_vm0, %v2243_v19, 0.0  ;;  %v2100_v29 = vmul.f32 %v7812_v24, %v2026_v14  ;;  %v1736_v19 = vsel %vm1710_vm5, %v1703_v57, %v5129_v1 }
 0x279   : > { %v2406_v52 = vrot.slane %v2349_v39, 1  ;;  %v2481_v58 = vrot.slane %v2349_v39, 2  ;;  %v2404_v20 = vrot.slane %v8019_v54, 1  ;;  %v2479_v45 = vrot.slane %v8019_v54, 2 }
 0x27a   : > { %v2135_v56 = vadd.f32 %v7821_v51, %v2100_v29  ;;  %4809 = vmatmul.msk.bf16.gmra.mxu0 %vm1947_vm12, %v1919_v21  ;;  %v5443_v14 = vunpack.i.l.bf16 %v7547_v49  ;;  %v1768_v21 = vsel %vm1743_vm7, %v1735_v17, %v5208_v59  ;;  %v5444_v39 = vunpack.i.h.bf16 %v7547_v49 }
 0x27b   : > { %v8032_v26 = vsel %vm725_vm1, %v2403_v37, %v2404_v20  ;;  %v8035_v47 = vsel %vm725_vm1, %v2404_v20, %v2406_v52  ;;  %v8038_v27 = vsel %vm803_vm2, %v2478_v60, %v2479_v45  ;;  %v8041_v63 = vsel %vm803_vm2, %v2479_v45, %v2481_v58  ;;  %v10570_v58 = vld [vmem:[#allocation29_spill] sm:$0xff] }
 0x27c   : > { %v2167_v61 = vmax.f32 %v2135_v56, 0.0  ;;  %v8046_v12 = vpack.i.bf16 %v8032_v26, %v7960_v53  ;;  %v8053_v36 = vpack.i.bf16 %v8041_v63, %v8038_v27  ;;  %v1769_v37 = vsel %vm1743_vm7, %v1736_v19, %v5209_v55 }
 0x27d   : > { %v5518_v29 = vunpack.i.l.bf16 %v5517_v32  ;;  %v1801_v52 = vsel %vm1776_vm9, %v1768_v21, %v5288_v22  ;;  %v4979_v1 = vunpack.i.h.bf16 %v10560_v3  ;;  %v5058_v20 = vunpack.i.l.bf16 %v10570_v58  ;;  %v10573_v21 = vld [vmem:[#allocation58_spill] sm:$0xff] }
 0x27e   : > { %10568 = vst [vmem:[#allocation14_spill] sm:$0xff] %v8046_v12  ;;  %5546 = vrot.lane.b32.xlu1 %v8046_v12, %s6215_s28  ;;  %v2245_v38 = vrot.slane %v2167_v61, 7  ;;  %v1802_v45 = vsel %vm1776_vm9, %v1769_v37, %v5289_v6  ;;  %v1834_v8 = vsel %vm1809_vm8, %v1801_v52, %v5368_v41  ;;  %v5054_v55 = vunpack.i.h.bf16 %v10561_v25  ;;  %v10571_v25 = vld [vmem:[#allocation50_spill] sm:$0xff]  ;;  %v10572_v41 = vld [vmem:[#allocation52_spill] sm:$0xff] }
 0x27f   : > { %v2028_v60 = vpop.f32.mrf.mxu0  ;;  %v1835_v49 = vsel %vm1809_vm8, %v1802_v45, %v5369_v62  ;;  %v1867_v59 = vsel %vm1842_vm10, %v1834_v8, %v5443_v14  ;;  %v5565_v61 = vpack.i.bf16 %v7963_v7, %v7893_v40  ;;  %v1673_v10 = vsel %vm1646_vm4, %v10571_v25, %v4983_v30 }
 0x280   : > { %v2101_v57 = vmul.f32 %v7812_v24, %v2028_v60  ;;  %v1868_v56 = vsel %vm1842_vm10, %v1835_v49, %v5444_v39  ;;  %v1900_v22 = vsel %vm1875_vm11, %v1867_v59, %v5518_v29  ;;  %v8078_v32 = vsel %vm566_vm0, 0.0, %v2245_v38 }
 0x281   : > { %v1901_v3 = vsel %vm1875_vm11, %v1868_v56, %v5519_v4  ;;  %v1672_v17 = vsel %vm1646_vm4, %v10572_v41, %v4979_v1  ;;  %v1705_v19 = vsel %vm1678_vm6, %v1673_v10, %v5058_v20  ;;  %v5134_v37 = vunpack.i.h.bf16 %v10573_v21  ;;  %v5522_v10 = vpop.permute.xlu2 %5521 }
 0x282   : > { %v2136_v0 = vadd.f32 %v7821_v51, %v2101_v57  ;;  %v1704_v62 = vsel %vm1678_vm6, %v1672_v17, %v5054_v55  ;;  %v5133_v39 = vunpack.i.l.bf16 %v10573_v21  ;;  %v1920_v7 = vpack.c.bf16 %v1901_v3, %v1900_v22  ;;  %v10574_v55 = vld [vmem:[#allocation66_spill] sm:$0xff]  ;;  %v10577_v21 = vld [vmem:[#allocation92_spill] sm:$0xff] }
 0x283   : > { %v2408_v60 = vrot.slane %v8078_v32, 1  ;;  %v2483_v57 = vrot.slane %v8078_v32, 2  ;;  %v5214_v49 = vunpack.i.h.bf16 %v10574_v55  ;;  %v5213_v59 = vunpack.i.l.bf16 %v10574_v55 }
 0x284   : > { %v2168_v6 = vmax.f32 %v2136_v0, 0.0  ;;  %v10575_v0 = vld [vmem:[#allocation80_spill] sm:$0xff]  ;;  %v5523_v55 = vunpack.i.l.bf16 %v5522_v10 }
 0x285   : > { %v5294_v56 = vunpack.i.h.bf16 %v10575_v0  ;;  %v5293_v25 = vunpack.i.l.bf16 %v10575_v0 }
 0x286   : > { %v2246_v14 = vrot.slane %v2168_v6, 7  ;;  %5566 = vrot.lane.b32.xlu1 %v5565_v61, %s6216_s15 }
 0x287   : > { %v2031_v29 = vpop.f32.mrf.mxu0 }
 0x288   : > { %v8093_v30 = vsel %vm566_vm0, %v2245_v38, %v2246_v14  ;;  %v2350_v52 = vsel %vm566_vm0, %v2246_v14, 0.0  ;;  %v2102_v4 = vmul.f32 %v7812_v24, %v2031_v29  ;;  %v5373_v29 = vunpack.i.l.bf16 %v10577_v21 }
 0x289   : > { %v2411_v1 = vrot.slane %v2350_v52, 1  ;;  %v2486_v20 = vrot.slane %v2350_v52, 2  ;;  %v2409_v45 = vrot.slane %v8093_v30, 1  ;;  %v2484_v8 = vrot.slane %v8093_v30, 2 }
 0x28a   : > { %v2137_v38 = vadd.f32 %v7821_v51, %v2102_v4  ;;  %4810 = vmatmul.msk.bf16.gmra.mxu0 %vm1947_vm12, %v1920_v7  ;;  %v1737_v52 = vsel %vm1710_vm5, %v1704_v62, %v5133_v39  ;;  %v5374_v4 = vunpack.i.h.bf16 %v10577_v21  ;;  %v10579_v39 = vld [vmem:[#allocation77_spill] sm:$0xff]  ;;  %v5453_v14 = vunpack.i.l.bf16 %v7538_v15 }
 0x28b   : > { %v8106_v22 = vsel %vm725_vm1, %v2408_v60, %v2409_v45  ;;  %v8109_v3 = vsel %vm725_vm1, %v2409_v45, %v2411_v1  ;;  %v8112_v6 = vsel %vm803_vm2, %v2483_v57, %v2484_v8  ;;  %v8115_v61 = vsel %vm803_vm2, %v2484_v8, %v2486_v20  ;;  %v10578_v57 = vld [vmem:[#allocation45_spill] sm:$0xff] }
 0x28c   : > { %v2169_v41 = vmax.f32 %v2137_v38, 0.0  ;;  %v8120_v17 = vpack.i.bf16 %v8106_v22, %v8035_v47  ;;  %v8127_v7 = vpack.i.bf16 %v8115_v61, %v8112_v6  ;;  %v1738_v60 = vsel %vm1710_vm5, %v1705_v19, %v5134_v37 }
 0x28d   : > { %v5448_v1 = vunpack.i.l.bf16 %v10578_v57  ;;  %v1770_v20 = vsel %vm1743_vm7, %v1737_v52, %v5213_v59  ;;  %v1771_v45 = vsel %vm1743_vm7, %v1738_v60, %v5214_v49  ;;  %v5449_v8 = vunpack.i.h.bf16 %v10578_v57 }
 0x28e   : > { %10576 = vst [vmem:[#allocation12_spill] sm:$0xff] %v8120_v17  ;;  %5551 = vrot.lane.b32.xlu2 %v8120_v17, %s6215_s28  ;;  %v1803_v38 = vsel %vm1776_vm9, %v1770_v20, %v5293_v25  ;;  %v5524_v19 = vunpack.i.h.bf16 %v5522_v10  ;;  %v2248_v37 = vrot.slane %v2169_v41, 7  ;;  %v4988_v21 = vunpack.i.l.bf16 %v10579_v39 }
 0x28f   : > { %v2033_v0 = vpop.f32.mrf.mxu0  ;;  %v1804_v42 = vsel %vm1776_vm9, %v1771_v45, %v5294_v56  ;;  %v1836_v59 = vsel %vm1809_vm8, %v1803_v38, %v5373_v29  ;;  %v5059_v49 = vunpack.i.h.bf16 %v10570_v58  ;;  %v5570_v29 = vpack.i.bf16 %v8038_v27, %v7966_v33  ;;  %v10580_v58 = vld [vmem:[#allocation51_spill] sm:$0xff] }
 0x290   : > { %v2103_v62 = vmul.f32 %v7812_v24, %v2033_v0  ;;  %v1837_v60 = vsel %vm1809_vm8, %v1804_v42, %v5374_v4  ;;  %v1869_v52 = vsel %vm1842_vm10, %v1836_v59, %v5448_v1  ;;  %v8152_v46 = vsel %vm566_vm0, 0.0, %v2248_v37  ;;  %v10581_v4 = vld [vmem:[#allocation47_spill] sm:$0xff]  ;;  %v10583_v0 = vld [vmem:[#allocation61_spill] sm:$0xff] }
 0x291   : > { %v1870_v10 = vsel %vm1842_vm10, %v1837_v60, %v5449_v8  ;;  %v1902_v41 = vsel %vm1875_vm11, %v1869_v52, %v5523_v55  ;;  %v1674_v42 = vsel %vm1646_vm4, %v10580_v58, %v4984_v48  ;;  %v1675_v1 = vsel %vm1646_vm4, %v10581_v4, %v4988_v21  ;;  %v10582_v8 = vld [vmem:[#allocation56_spill] sm:$0xff] }
 0x292   : > { %v2138_v25 = vadd.f32 %v7821_v51, %v2103_v62  ;;  %v1903_v57 = vsel %vm1875_vm11, %v1870_v10, %v5524_v19  ;;  %v1706_v20 = vsel %vm1678_vm6, %v1674_v42, %v5059_v49  ;;  %v5063_v55 = vunpack.i.l.bf16 %v10582_v8 }
 0x293   : > { %v5139_v38 = vunpack.i.h.bf16 %v10583_v0  ;;  %v1921_v62 = vpack.c.bf16 %v1903_v57, %v1902_v41  ;;  %v2413_v59 = vrot.slane %v8152_v46, 1  ;;  %v2488_v21 = vrot.slane %v8152_v46, 2  ;;  %v10584_v41 = vld [vmem:[#allocation62_spill] sm:$0xff] }
 0x294   : > { %v2170_v56 = vmax.f32 %v2138_v25, 0.0  ;;  %v5138_v10 = vunpack.i.l.bf16 %v10583_v0  ;;  %v5219_v57 = vunpack.i.h.bf16 %v10584_v41 }
 0x296   : > { %v2249_v45 = vrot.slane %v2170_v56, 7  ;;  %5571 = vrot.lane.b32.xlu2 %v5570_v29, %s6216_s15  ;;  %v5218_v56 = vunpack.i.l.bf16 %v10584_v41 }
 0x297   : > { %v2036_v19 = vpop.f32.mrf.mxu0 }
 0x298   : > { %v8166_v33 = vsel %vm566_vm0, %v2248_v37, %v2249_v45  ;;  %v2351_v48 = vsel %vm566_vm0, %v2249_v45, 0.0  ;;  %v2104_v27 = vmul.f32 %v7812_v24, %v2036_v19  ;;  %v10585_v45 = vld [vmem:[#allocation85_spill] sm:$0xff] }
 0x299   : > { %v2416_v49 = vrot.slane %v2351_v48, 1  ;;  %v2491_v60 = vrot.slane %v2351_v48, 2  ;;  %v2414_v52 = vrot.slane %v8166_v33, 1  ;;  %v2489_v25 = vrot.slane %v8166_v33, 2 }
 0x29a   : > { %v2139_v37 = vadd.f32 %v7821_v51, %v2104_v27  ;;  %4811 = vmatmul.msk.bf16.gmra.mxu0 %vm1947_vm12, %v1921_v62  ;;  %v5299_v0 = vunpack.i.h.bf16 %v10585_v45  ;;  %v5298_v19 = vunpack.i.l.bf16 %v10585_v45 }
 0x29b   : > { %v8179_v29 = vsel %vm725_vm1, %v2413_v59, %v2414_v52  ;;  %v2492_v58 = vsel %vm803_vm2, %v2489_v25, %v2491_v60  ;;  %v8183_v42 = vsel %vm725_vm1, %v2414_v52, %v2416_v49  ;;  %v8186_v4 = vsel %vm803_vm2, %v2488_v21, %v2489_v25  ;;  %v5527_v59 = vpop.permute.xlu0 %5526  ;;  %v10588_v52 = vld [vmem:[#allocation91_spill] sm:$0xff] }
 0x29c   : > { %v8192_v48 = vpack.i.bf16 %v8179_v29, %v8109_v3  ;;  %v2171_v27 = vmax.f32 %v2139_v37, 0.0  ;;  %v8197_v60 = vpack.i.bf16 %v2492_v58, %v8186_v4  ;;  %v1707_v49 = vsel %vm1678_vm6, %v1675_v1, %v5063_v55 }
 0x29d   : > { %v1739_v21 = vsel %vm1710_vm5, %v1706_v20, %v5138_v10  ;;  %v5379_v25 = vunpack.i.h.bf16 %v10588_v52  ;;  %v5378_v41 = vunpack.i.l.bf16 %v10588_v52  ;;  %v1740_v45 = vsel %vm1710_vm5, %v1707_v49, %v5139_v38 }
 0x29e   : > { %10586 = vst [vmem:[#allocation75_spill] sm:$0xff] %v8192_v48  ;;  %5556 = vrot.lane.b32.xlu0 %v8192_v48, %s6215_s28  ;;  %v1772_v62 = vsel %vm1743_vm7, %v1739_v21, %v5218_v56  ;;  %v5454_v37 = vunpack.i.h.bf16 %v7538_v15  ;;  %v1773_v1 = vsel %vm1743_vm7, %v1740_v45, %v5219_v57  ;;  %v5529_v55 = vunpack.i.h.bf16 %v5527_v59 }
 0x29f   : > { %10587 = vst [vmem:[#allocation22_spill] sm:$0xff] %v8197_v60  ;;  %v2038_v28 = vpop.f32.mrf.mxu0  ;;  %v5528_v20 = vunpack.i.l.bf16 %v5527_v59  ;;  %v1805_v52 = vsel %vm1776_vm9, %v1772_v62, %v5298_v19  ;;  %v1806_v35 = vsel %vm1776_vm9, %v1773_v1, %v5299_v0  ;;  %v2251_v34 = vrot.slane %v2171_v27, 7 }
 0x2a0   : > { %v2105_v10 = vmul.f32 %v7812_v24, %v2038_v28  ;;  %v1838_v38 = vsel %vm1809_vm8, %v1805_v52, %v5378_v41  ;;  %v1839_v56 = vsel %vm1809_vm8, %v1806_v35, %v5379_v25  ;;  %v5560_v19 = vpack.i.bf16 %v7896_v5, %v10557_v23 }
 0x2a1   : > { %v1871_v15 = vsel %vm1842_vm10, %v1838_v38, %v5453_v14  ;;  %v1872_v21 = vsel %vm1842_vm10, %v1839_v56, %v5454_v37  ;;  %v8223_v0 = vsel %vm566_vm0, 0.0, %v2251_v34  ;;  %v5575_v56 = vpack.i.bf16 %v8112_v6, %v8041_v63 }
 0x2a2   : > { %v2140_v49 = vadd.f32 %v7821_v51, %v2105_v10  ;;  %v1904_v57 = vsel %vm1875_vm11, %v1871_v15, %v5528_v20  ;;  %v1905_v59 = vsel %vm1875_vm11, %v1872_v21, %v5529_v55  ;;  %v2493_v45 = vrot.slane %v8223_v0, 2 }
 0x2a3   : > { %v1922_v27 = vpack.c.bf16 %v1905_v59, %v1904_v57  ;;  %v2418_v55 = vrot.slane %v8223_v0, 1 }
 0x2a4   : > { %v2172_v28 = vmax.f32 %v2140_v49, 0.0 }
 0x2a6   : > { %v2252_v62 = vrot.slane %v2172_v28, 7  ;;  %5561 = vrot.lane.b32.xlu0 %v5560_v19, %s6216_s15 }
 0x2a7   : > { %v2041_v35 = vpop.f32.mrf.mxu0 }
 0x2a8   : > { %v8227_v14 = vsel %vm566_vm0, %v2251_v34, %v2252_v62  ;;  %v2352_v25 = vsel %vm566_vm0, %v2252_v62, 0.0  ;;  %v2106_v41 = vmul.f32 %v7812_v24, %v2041_v35  ;;  %v5585_v62 = vpack.i.bf16 %v8186_v4, %v8115_v61 }
 0x2a9   : > { %v2496_v37 = vrot.slane %v2352_v25, 2  ;;  %v2494_v1 = vrot.slane %v8227_v14, 2  ;;  %v2419_v20 = vrot.slane %v8227_v14, 1 }
 0x2aa   : > { %v2141_v10 = vadd.f32 %v7821_v51, %v2106_v41  ;;  %4812 = vmatmul.msk.bf16.gmra.mxu0 %vm1947_vm12, %v1922_v27 }
 0x2ab   : > { %v2495_v34 = vsel %vm803_vm2, %v2493_v45, %v2494_v1  ;;  %v8239_v52 = vsel %vm725_vm1, %v2418_v55, %v2419_v20  ;;  %v2497_v38 = vsel %vm803_vm2, %v2494_v1, %v2496_v37  ;;  %v2421_v45 = vrot.slane %v2352_v25, 1 }
 0x2ac   : > { %v5595_v49 = vpack.i.bf16 %v2495_v34, %v2492_v58  ;;  %v8246_v15 = vpack.i.bf16 %v8239_v52, %v8183_v42  ;;  %v8248_v21 = vpack.i.bf16 %v2497_v38, %v2495_v34  ;;  %v2173_v57 = vmax.f32 %v2141_v10, 0.0 }
 0x2ad   : > { %v8258_v58 = vpack.i.bf16 %v7944_v18, %v7930_v2 }
 0x2ae   : > { %10589 = vst [vmem:[#allocation5_spill] sm:$0xff] %v8246_v15  ;;  %5576 = vrot.lane.b32.xlu0 %v5575_v56, %s6216_s15  ;;  %5596 = vrot.lane.b32.xlu2 %v5595_v49, %s6216_s15  ;;  %v2254_v19 = vrot.slane %v2173_v57, 7  ;;  %v8280_v57 = vsel %vm725_vm1, %v2419_v20, %v2421_v45 }
 0x2af   : > { %5581 = vrot.lane.b32.xlu1 %v8246_v15, %s6215_s28  ;;  %v2043_v59 = vpop.f32.mrf.mxu0  ;;  %10590 = vst [vmem:[#allocation78_spill] sm:$0xff] %v8258_v58 }
 0x2b0   : > { %v2107_v28 = vmul.f32 %v7812_v24, %v2043_v59  ;;  %v8263_v35 = vsel %vm566_vm0, 0.0, %v2254_v19 }
 0x2b1   : > { %v2498_v4 = vrot.slane %v8263_v35, 2  ;;  %v2423_v56 = vrot.slane %v8263_v35, 1 }
 0x2b2   : > { %v2142_v63 = vadd.f32 %v7821_v51, %v2107_v28 }
 0x2b4   : > { %v2174_v6 = vmax.f32 %v2142_v63, 0.0 }
 0x2b6   : > { %v2255_v27 = vrot.slane %v2174_v6, 7  ;;  %5601 = vrot.lane.b32.xlu2 %v8258_v58, %s6217_s16 }
 0x2b7   : > { %5586 = vrot.lane.b32.xlu1 %v5585_v62, %s6216_s15  ;;  %v2046_v41 = vpop.f32.mrf.mxu0 }
 0x2b8   : > { %v8269_v37 = vsel %vm566_vm0, %v2254_v19, %v2255_v27  ;;  %v2353_v1 = vsel %vm566_vm0, %v2255_v27, 0.0  ;;  %v2108_v55 = vmul.f32 %v7812_v24, %v2046_v41  ;;  %v5590_v19 = vpack.i.bf16 %v7874_v11, %v7861_v13 }
 0x2b9   : > { %v2501_v61 = vrot.slane %v2353_v1, 2  ;;  %v2499_v34 = vrot.slane %v8269_v37, 2  ;;  %v2424_v49 = vrot.slane %v8269_v37, 1 }
 0x2ba   : > { %v2143_v10 = vadd.f32 %v7821_v51, %v2108_v55 }
 0x2bb   : > { %v2500_v25 = vsel %vm803_vm2, %v2498_v4, %v2499_v34  ;;  %v8283_v59 = vsel %vm725_vm1, %v2423_v56, %v2424_v49  ;;  %v2502_v28 = vsel %vm803_vm2, %v2499_v34, %v2501_v61  ;;  %v8302_v61 = vpack.i.bf16 %v8093_v30, %v8078_v32 }
 0x2bc   : > { %v5610_v63 = vpack.i.bf16 %v2500_v25, %v2497_v38  ;;  %v8290_v6 = vpack.i.bf16 %v8283_v59, %v8280_v57  ;;  %v8292_v62 = vpack.i.bf16 %v2502_v28, %v2500_v25  ;;  %v2175_v27 = vmax.f32 %v2143_v10, 0.0 }
 0x2bd   : > { %10592 = vst [vmem:[#allocation7_spill] sm:$0xff] %v8302_v61  ;;  %v8306_v4 = vpack.i.bf16 %v8019_v54, %v8002_v31  ;;  %v8313_v56 = vpack.i.bf16 %v8166_v33, %v8152_v46 }
 0x2be   : > { %10591 = vst [vmem:[#allocation34_spill] sm:$0xff] %v8290_v6  ;;  %5611 = vrot.lane.b32.xlu0 %v5610_v63, %s6216_s15  ;;  %5606 = vrot.lane.b32.xlu2 %v8290_v6, %s6215_s28  ;;  %v2257_v45 = vrot.slane %v2175_v27, 7 }
 0x2bf   : > { %5591 = vrot.lane.b32.xlu1 %v5590_v19, %s6217_s16  ;;  %v2048_v20 = vpop.f32.mrf.mxu0  ;;  %10593 = vst [vmem:[#allocation9_spill] sm:$0xff] %v8306_v4  ;;  %v2426_v19 = vrot.slane %v2353_v1, 1 }
 0x2c0   : > { %v2109_v41 = vmul.f32 %v7812_v24, %v2048_v20  ;;  %v8309_v10 = vsel %vm566_vm0, 0.0, %v2257_v45  ;;  %10594 = vst [vmem:[#allocation71_spill] sm:$0xff] %v8313_v56 }
 0x2c1   : > { %v2428_v23 = vrot.slane %v8309_v10, 1  ;;  %v8336_v12 = vsel %vm725_vm1, %v2424_v49, %v2426_v19 }
 0x2c2   : > { %v2144_v38 = vadd.f32 %v7821_v51, %v2109_v41  ;;  %v2503_v41 = vrot.slane %v8309_v10, 2 }
 0x2c4   : > { %v2176_v55 = vmax.f32 %v2144_v38, 0.0 }
 0x2c6   : > { %v2258_v34 = vrot.slane %v2176_v55, 7  ;;  %5616 = vrot.lane.b32.xlu0 %v8306_v4, %s6217_s16  ;;  %5626 = vrot.lane.b32.xlu2 %v8313_v56, %s6217_s16 }
 0x2c7   : > { %5621 = vrot.lane.b32.xlu1 %v8302_v61, %s6217_s16  ;;  %v2051_v25 = vpop.f32.mrf.mxu0 }
 0x2c8   : > { %v8320_v63 = vsel %vm566_vm0, %v2257_v45, %v2258_v34  ;;  %v2354_v27 = vsel %vm566_vm0, %v2258_v34, 0.0  ;;  %v2110_v20 = vmul.f32 %v7812_v24, %v2051_v25 }
 0x2c9   : > { %v2506_v38 = vrot.slane %v2354_v27, 2  ;;  %v2504_v55 = vrot.slane %v8320_v63, 2  ;;  %v2429_v1 = vrot.slane %v8320_v63, 1 }
 0x2ca   : > { %v2145_v48 = vadd.f32 %v7821_v51, %v2110_v20 }
 0x2cb   : > { %v2505_v45 = vsel %vm803_vm2, %v2503_v41, %v2504_v55  ;;  %v8333_v34 = vsel %vm803_vm2, %v2504_v55, %v2506_v38  ;;  %v8339_v25 = vsel %vm725_vm1, %v2428_v23, %v2429_v1  ;;  %v8350_v41 = vpack.i.bf16 %v8320_v63, %v8309_v10 }
 0x2cc   : > { %v5640_v15 = vpack.i.bf16 %v2505_v45, %v2502_v28  ;;  %v8343_v11 = vpack.i.bf16 %v8339_v25, %v8336_v12  ;;  %v8346_v20 = vpack.i.bf16 %v8333_v34, %v2505_v45  ;;  %v2177_v13 = vmax.f32 %v2145_v48, 0.0 }
 0x2cd   : > { %10597 = vst [vmem:[#allocation13_spill] sm:$0xff] %v8350_v41  ;;  %v4989_v28 = vunpack.i.h.bf16 %v10579_v39  ;;  %v5064_v38 = vunpack.i.h.bf16 %v10582_v8  ;;  %v8367_v45 = vpack.i.bf16 %v8227_v14, %v8223_v0  ;;  %v10601_v39 = vld [vmem:[#allocation31_spill] sm:$0xff] }
 0x2ce   : > { %10595 = vst [vmem:[#allocation18_spill] sm:$0xff] %v8343_v11  ;;  %5631 = vrot.lane.b32.xlu0 %v8343_v11, %s6215_s28  ;;  %5651 = vrot.lane.b32.xlu2 %v8350_v41, %s6217_s16  ;;  %v2260_v19 = vrot.slane %v2177_v13, 7  ;;  %v10600_v11 = vld [vmem:[#allocation49_spill] sm:$0xff] }
 0x2cf   : > { %10596 = vst [vmem:[#allocation2_spill] sm:$0xff] %v8346_v20  ;;  %5641 = vrot.lane.b32.xlu1 %v5640_v15, %s6216_s15  ;;  %v2053_v49 = vpop.f32.mrf.mxu0  ;;  %v8363_v15 = vpack.i.bf16 %v8269_v37, %v8263_v35  ;;  %v1676_v6 = vsel %vm1646_vm4, %v10600_v11, %v4989_v28  ;;  %v10603_v41 = vld [vmem:[#allocation57_spill] sm:$0xff]  ;;  %v2431_v11 = vrot.slane %v2354_v27, 1 }
 0x2d0   : > { %v2111_v23 = vmul.f32 %v7812_v24, %v2053_v49  ;;  %10599 = vst [vmem:[#allocation3_spill] sm:$0xff] %v8367_v45  ;;  %v8372_v49 = vsel %vm566_vm0, 0.0, %v2260_v19  ;;  %v5144_v17 = vunpack.i.h.bf16 %v10603_v41 }
 0x2d1   : > { %10598 = vst [vmem:[#allocation72_spill] sm:$0xff] %v8363_v15  ;;  %v8409_v61 = vsel %vm725_vm1, %v2429_v1, %v2431_v11 }
 0x2d2   : > { %v2146_v48 = vadd.f32 %v7821_v51, %v2111_v23  ;;  %v10602_v23 = vld [vmem:[#allocation48_spill] sm:$0xff] }
 0x2d3   : > { %v1677_v8 = vsel %vm1646_vm4, %v10602_v23, %v10601_v39  ;;  %v5143_v39 = vunpack.i.l.bf16 %v10603_v41  ;;  %v2508_v23 = vrot.slane %v8372_v49, 2 }
 0x2d4   : > { %v2178_v55 = vmax.f32 %v2146_v48, 0.0  ;;  %v1708_v48 = vsel %vm1678_vm6, %v1676_v6, %v5064_v38  ;;  %v10604_v6 = vpack.i.bf16 %v7890_v16, %v7887_v44  ;;  %v10606_v16 = vld [vmem:[#allocation84_spill] sm:$0xff] }
 0x2d6   : > { %v2261_v13 = vrot.slane %v2178_v55, 7  ;;  %5636 = vrot.lane.b32.xlu0 %v8367_v45, %s6217_s16  ;;  %5661 = vrot.lane.b32.xlu2 %v10604_v6, %s6218_s17  ;;  %v10605_v45 = vld [vmem:[#allocation70_spill] sm:$0xff]  ;;  %v5303_v6 = vunpack.i.l.bf16 %v10606_v16 }
 0x2d7   : > { %5646 = vrot.lane.b32.xlu1 %v8363_v15, %s6217_s16  ;;  %v2056_v56 = vpop.f32.mrf.mxu0  ;;  %v5224_v58 = vunpack.i.h.bf16 %v10605_v45  ;;  %v5223_v44 = vunpack.i.l.bf16 %v10605_v45 }
 0x2d8   : > { %v8384_v28 = vsel %vm566_vm0, %v2260_v19, %v2261_v13  ;;  %v8387_v55 = vsel %vm566_vm0, %v2261_v13, 0.0  ;;  %v2112_v38 = vmul.f32 %v7812_v24, %v2056_v56  ;;  %v2433_v13 = vrot.slane %v8372_v49, 1 }
 0x2d9   : > { %v2511_v27 = vrot.slane %v8387_v55, 2  ;;  %v2509_v19 = vrot.slane %v8384_v28, 2  ;;  %v2434_v15 = vrot.slane %v8384_v28, 1  ;;  %v5304_v24 = vunpack.i.h.bf16 %v10606_v16 }
 0x2da   : > { %v2147_v4 = vadd.f32 %v7821_v51, %v2112_v38  ;;  %v8416_v51 = vpack.i.bf16 %v8384_v28, %v8372_v49 }
 0x2db   : > { %v2510_v56 = vsel %vm803_vm2, %v2508_v23, %v2509_v19  ;;  %v2512_v41 = vsel %vm803_vm2, %v2509_v19, %v2511_v27  ;;  %v8412_v60 = vsel %vm725_vm1, %v2433_v13, %v2434_v15  ;;  %v10610_v23 = vld [vmem:[#allocation64_spill] sm:$0xff] }
 0x2dc   : > { %v5675_v20 = vpack.i.bf16 %v2510_v56, %v8333_v34  ;;  %10607 = vst [vmem:[#allocation4_spill] sm:$0xff] %v8416_v51  ;;  %v8420_v45 = vpack.i.bf16 %v8412_v60, %v8409_v61  ;;  %v8422_v38 = vpack.i.bf16 %v2512_v41, %v2510_v56  ;;  %v1709_v27 = vsel %vm1678_vm6, %v1677_v8, %v10610_v23 }
 0x2dd   : > { %v1741_v34 = vsel %vm1710_vm5, %v1708_v48, %v5143_v39  ;;  %v2179_v1 = vmax.f32 %v2147_v4, 0.0  ;;  %v1742_v11 = vsel %vm1710_vm5, %v1709_v27, %v5144_v17  ;;  %v8439_v4 = vld [vmem:[%s10113_s3] ss:$0 sm:$0xff]  ;;  %vm3661_vm5 = vcmask 1043456  }
 0x2de   : > { %10608 = vst [vmem:[#allocation33_spill] sm:$0xff] %v8420_v45  ;;  %v1774_v19 = vsel %vm1743_vm7, %v1741_v34, %v5223_v44  ;;  %5656 = vrot.lane.b32.xlu0 %v8416_v51, %s6217_s16  ;;  %v1775_v16 = vsel %vm1743_vm7, %v1742_v11, %v5224_v58  ;;  %5676 = vrot.lane.b32.xlu2 %v5675_v20, %s6216_s15  ;;  %v10612_v39 = vld [vmem:[#allocation90_spill] sm:$0xff]  ;;  %vm3923_vm6 = vcmask 1042432   ;;  %vm3612_vm7 = vcmask 588800  }
 0x2df   : > { %10609 = vst [vmem:[#allocation32_spill] sm:$0xff] %v8422_v38  ;;  %5671 = vrot.lane.b32.xlu1 %v8420_v45, %s6215_s28  ;;  %v2058_v13 = vpop.f32.mrf.mxu0  ;;  %v1807_v56 = vsel %vm1776_vm9, %v1774_v19, %v5303_v6  ;;  %v1808_v48 = vsel %vm1776_vm9, %v1775_v16, %v5304_v24  ;;  %v2263_v6 = vrot.slane %v2179_v1, 7  ;;  %v8452_v20 = vld [vmem:[%s10114_s4] ss:$0 sm:$0xff] }
 0x2e0   : > { %v2113_v17 = vmul.f32 %v8439_v4, %v2058_v13  ;;  %v8442_v8 = vpop.permute.xlu1 %5531  ;;  %v1840_v44 = vsel %vm1809_vm8, %v1807_v56, %v10612_v39  ;;  %v1841_v58 = vsel %vm1809_vm8, %v1808_v48, %v10612_v39 }
 0x2e1   : > { %10611 = vst [vmem:[#allocation39_spill] sm:$0xff] %v8442_v8  ;;  %v5533_v27 = vunpack.i.l.bf16 %v8442_v8  ;;  %v1873_v34 = vsel %vm1842_vm10, %v1840_v44, %v7576_v50  ;;  %v1874_v24 = vsel %vm1842_vm10, %v1841_v58, %v7576_v50  ;;  %v8463_v16 = vsel %vm566_vm0, 0.0, %v2263_v6 }
 0x2e2   : > { %v2148_v23 = vadd.f32 %v8452_v20, %v2113_v17  ;;  %v10613_v17 = vpack.i.bf16 %v7960_v53, %v7957_v9  ;;  %v2436_v50 = vrot.slane %v8387_v55, 1  ;;  %v10615_v58 = vpack.i.bf16 %v8109_v3, %v8106_v22 }
 0x2e3   : > { %v1906_v19 = vsel %vm1875_vm11, %v1873_v34, %v5533_v27  ;;  %v1907_v1 = vsel %vm1875_vm11, %v1874_v24, %v5533_v27  ;;  %v2438_v27 = vrot.slane %v8463_v16, 1  ;;  %v2513_v9 = vrot.slane %v8463_v16, 2 }
 0x2e4   : > { %v2180_v11 = vmax.f32 %v2148_v23, 0.0  ;;  %v1923_v13 = vpack.c.bf16 %v1907_v1, %v1906_v19  ;;  %v8493_v3 = vsel %vm725_vm1, %v2434_v15, %v2436_v50 }
 0x2e6   : > { %v2264_v56 = vrot.slane %v2180_v11, 7  ;;  %4813 = vmatmul.msk.bf16.gmra.mxu0 %vm1947_vm12, %v1923_v13  ;;  %5666 = vrot.lane.b32.xlu0 %v10613_v17, %s6218_s17 }
 0x2e7   : > { %v2061_v48 = vpop.f32.mrf.mxu0  ;;  %5691 = vrot.lane.b32.xlu2 %v10615_v58, %s6218_s17 }
 0x2e8   : > { %v8472_v39 = vsel %vm566_vm0, %v2263_v6, %v2264_v56  ;;  %v2356_v44 = vsel %vm566_vm0, %v2264_v56, 0.0  ;;  %v2114_v23 = vmul.f32 %v8439_v4, %v2061_v48  ;;  %v8503_v56 = vpop.permute.xlu2 %5536 }
 0x2e9   : > { %10614 = vst [vmem:[#allocation16_spill] sm:$0xff] %v8472_v39  ;;  %v2516_v53 = vrot.slane %v2356_v44, 2  ;;  %v8485_v55 = vpack.i.bf16 %v8472_v39, %v8463_v16  ;;  %v2514_v6 = vrot.slane %v8472_v39, 2  ;;  %v2439_v24 = vrot.slane %v8472_v39, 1 }
 0x2ea   : > { %v2149_v34 = vadd.f32 %v8452_v20, %v2114_v23  ;;  %10618 = vst [vmem:[#allocation19_spill] sm:$0xff] %v8503_v56 }
 0x2eb   : > { %10616 = vst [vmem:[#allocation15_spill] sm:$0xff] %v8485_v55  ;;  %5681 = vrot.lane.b32.xlu1 %v8485_v55, %s6217_s16  ;;  %v2515_v22 = vsel %vm803_vm2, %v2513_v9, %v2514_v6  ;;  %v8496_v11 = vsel %vm725_vm1, %v2438_v27, %v2439_v24  ;;  %v2517_v13 = vsel %vm803_vm2, %v2514_v6, %v2516_v53  ;;  %v2441_v6 = vrot.slane %v2356_v44, 1 }
 0x2ec   : > { %v5700_v19 = vpack.i.bf16 %v2515_v22, %v2512_v41  ;;  %v8500_v1 = vpack.i.bf16 %v8496_v11, %v8493_v3  ;;  %v2181_v17 = vmax.f32 %v2149_v34, 0.0  ;;  %v8505_v48 = vpack.i.bf16 %v2517_v13, %v2515_v22 }
 0x2ed   : > { %v10620_v27 = vpack.i.bf16 %v8035_v47, %v8032_v26  ;;  %v10622_v22 = vpack.i.bf16 %v8183_v42, %v8179_v29  ;;  %v5710_v44 = vpack.i.bf16 %v8280_v57, %v8239_v52 }
 0x2ee   : > { %10617 = vst [vmem:[#allocation20_spill] sm:$0xff] %v8500_v1  ;;  %5701 = vrot.lane.b32.xlu0 %v5700_v19, %s6216_s15  ;;  %v2266_v41 = vrot.slane %v2181_v17, 7 }
 0x2ef   : > { %10619 = vst [vmem:[#allocation27_spill] sm:$0xff] %v8505_v48  ;;  %v2063_v58 = vpop.f32.mrf.mxu0  ;;  %5696 = vrot.lane.b32.xlu2 %v8500_v1, %s6215_s28 }
 0x2f0   : > { %v2115_v15 = vmul.f32 %v8439_v4, %v2063_v58  ;;  %v8517_v9 = vsel %vm566_vm0, 0.0, %v2266_v41  ;;  %v8519_v53 = vpop.permute.xlu2 %5551 }
 0x2f1   : > { %10621 = vst [vmem:[#allocation28_spill] sm:$0xff] %v8517_v9  ;;  %v2443_v47 = vrot.slane %v8517_v9, 1 }
 0x2f2   : > { %v2150_v50 = vadd.f32 %v8452_v20, %v2115_v15  ;;  %v2518_v15 = vrot.slane %v8517_v9, 2 }
 0x2f3   : > { %5686 = vrot.lane.b32.xlu1 %v10620_v27, %s6218_s17  ;;  %v2442_v27 = vsel %vm725_vm1, %v2439_v24, %v2441_v6 }
 0x2f4   : > { %v2182_v23 = vmax.f32 %v2150_v50, 0.0 }
 0x2f6   : > { %v2267_v34 = vrot.slane %v2182_v23, 7  ;;  %5706 = vrot.lane.b32.xlu0 %v10622_v22, %s6218_s17 }
 0x2f7   : > { %v2066_v19 = vpop.f32.mrf.mxu0 }
 0x2f8   : > { %v8526_v17 = vsel %vm566_vm0, %v2266_v41, %v2267_v34  ;;  %v2357_v58 = vsel %vm566_vm0, %v2267_v34, 0.0  ;;  %v2116_v26 = vmul.f32 %v8439_v4, %v2066_v19  ;;  %v8557_v6 = vpop.permute.xlu2 %5571 }
 0x2f9   : > { %10623 = vst [vmem:[#allocation73_spill] sm:$0xff] %v8526_v17  ;;  %v2521_v50 = vrot.slane %v2357_v58, 2  ;;  %v8537_v29 = vpack.i.bf16 %v8526_v17, %v8517_v9  ;;  %v2444_v42 = vrot.slane %v8526_v17, 1  ;;  %v2519_v41 = vrot.slane %v8526_v17, 2 }
 0x2fa   : > { %v2151_v23 = vadd.f32 %v8452_v20, %v2116_v26 }
 0x2fb   : > { %10624 = vst [vmem:[#allocation43_spill] sm:$0xff] %v8537_v29  ;;  %5711 = vrot.lane.b32.xlu1 %v5710_v44, %s6218_s17  ;;  %5716 = vrot.lane.b32.xlu2 %v8537_v29, %s6217_s16  ;;  %v8546_v34 = vsel %vm725_vm1, %v2443_v47, %v2444_v42  ;;  %v2520_v52 = vsel %vm803_vm2, %v2518_v15, %v2519_v41 }
 0x2fc   : > { %v2522_v57 = vsel %vm803_vm2, %v2519_v41, %v2521_v50  ;;  %v8551_v22 = vpack.i.bf16 %v8546_v34, %v2442_v27  ;;  %v2183_v26 = vmax.f32 %v2151_v23, 0.0  ;;  %v5720_v15 = vpack.i.bf16 %v8336_v12, %v8283_v59 }
 0x2fd   : > { %v8553_v19 = vpack.i.bf16 %v2522_v57, %v2520_v52  ;;  %v5730_v50 = vpack.i.bf16 %v2520_v52, %v2517_v13  ;;  %v2446_v13 = vrot.slane %v2357_v58, 1  ;;  %v8591_v58 = vpop.permute.xlu0 %5541 }
 0x2fe   : > { %10625 = vst [vmem:[#allocation23_spill] sm:$0xff] %v8551_v22  ;;  %5726 = vrot.lane.b32.xlu0 %v8551_v22, %s6215_s28  ;;  %v2269_v47 = vrot.slane %v2183_v26, 7 }
 0x2ff   : > { %10626 = vst [vmem:[#allocation24_spill] sm:$0xff] %v8553_v19  ;;  %v2068_v24 = vpop.f32.mrf.mxu0 }
 0x300   : > { %v2117_v44 = vmul.f32 %v8439_v4, %v2068_v24  ;;  %v8566_v23 = vsel %vm566_vm0, 0.0, %v2269_v47  ;;  %v5745_v24 = vpack.i.bf16 %v8493_v3, %v8412_v60 }
 0x301   : > { %10627 = vst [vmem:[#allocation8_spill] sm:$0xff] %v8566_v23  ;;  %v2448_v52 = vrot.slane %v8566_v23, 1 }
 0x302   : > { %v2152_v8 = vadd.f32 %v8452_v20, %v2117_v44 }
 0x303   : > { %5721 = vrot.lane.b32.xlu2 %v5720_v15, %s6218_s17  ;;  %5731 = vrot.lane.b32.xlu1 %v5730_v50, %s6216_s15  ;;  %v2523_v15 = vrot.slane %v8566_v23, 2 }
 0x304   : > { %v2184_v41 = vmax.f32 %v2152_v8, 0.0  ;;  %v5750_v8 = vpack.i.bf16 %v2442_v27, %v8496_v11  ;;  %v2447_v27 = vsel %vm725_vm1, %v2444_v42, %v2446_v13  ;;  %v5740_v42 = vpack.i.bf16 %v8409_v61, %v8339_v25 }
 0x306   : > { %v2270_v1 = vrot.slane %v2184_v41, 7 }
 0x307   : > { %v2071_v45 = vpop.f32.mrf.mxu0 }
 0x308   : > { %v8571_v26 = vsel %vm566_vm0, %v2269_v47, %v2270_v1  ;;  %v2358_v44 = vsel %vm566_vm0, %v2270_v1, 0.0  ;;  %v2118_v12 = vmul.f32 %v8439_v4, %v2071_v45  ;;  %v8575_v59 = vpop.permute.xlu2 %5596 }
 0x309   : > { %10628 = vst [vmem:[#allocation40_spill] sm:$0xff] %v8571_v26  ;;  %v2526_v50 = vrot.slane %v2358_v44, 2  ;;  %v8583_v60 = vpack.i.bf16 %v8571_v26, %v8566_v23  ;;  %v2524_v3 = vrot.slane %v8571_v26, 2  ;;  %v2449_v45 = vrot.slane %v8571_v26, 1 }
 0x30a   : > { %v2153_v41 = vadd.f32 %v8452_v20, %v2118_v12 }
 0x30b   : > { %10629 = vst [vmem:[#allocation54_spill] sm:$0xff] %v8583_v60  ;;  %5751 = vrot.lane.b32.xlu2 %v5750_v8, %s6218_s17  ;;  %5746 = vrot.lane.b32.xlu1 %v5745_v24, %s6218_s17  ;;  %v2525_v11 = vsel %vm803_vm2, %v2523_v15, %v2524_v3  ;;  %v2450_v1 = vsel %vm725_vm1, %v2448_v52, %v2449_v45  ;;  %v8601_v8 = vpop.permute.xlu1 %5546 }
 0x30c   : > { %5736 = vrot.lane.b32.xlu0 %v8583_v60, %s6217_s16  ;;  %v2527_v47 = vsel %vm803_vm2, %v2524_v3, %v2526_v50  ;;  %v2185_v12 = vmax.f32 %v2153_v41, 0.0  ;;  %v8599_v29 = vpack.i.bf16 %v2450_v1, %v2447_v27  ;;  %v5765_v60 = vpack.i.bf16 %v2525_v11, %v2522_v57 }
 0x30d   : > { %v8597_v22 = vpack.i.bf16 %v2527_v47, %v2525_v11 }
 0x30e   : > { %10631 = vst [vmem:[#allocation26_spill] sm:$0xff] %v8599_v29  ;;  %v2272_v56 = vrot.slane %v2185_v12, 7 }
 0x30f   : > { %10630 = vst [vmem:[#allocation67_spill] sm:$0xff] %v8597_v22  ;;  %v2073_v24 = vpop.f32.mrf.mxu0 }
 0x310   : > { %v2119_v15 = vmul.f32 %v8439_v4, %v2073_v24  ;;  %v8604_v52 = vpop.permute.xlu2 %5601  ;;  %v8612_v50 = vpop.permute.xlu0 %5556  ;;  %v8616_v41 = vsel %vm566_vm0, 0.0, %v2272_v56  ;;  %v2451_v24 = vrot.slane %v2358_v44, 1 }
 0x311   : > { %10632 = vst [vmem:[#allocation25_spill] sm:$0xff] %v8604_v52  ;;  %v2528_v11 = vrot.slane %v8616_v41, 2 }
 0x312   : > { %v2154_v51 = vadd.f32 %v8452_v20, %v2119_v15  ;;  %10633 = vst [vmem:[#allocation81_spill] sm:$0xff] %v8616_v41 }
 0x313   : > { %5766 = vrot.lane.b32.xlu2 %v5765_v60, %s6216_s15  ;;  %5761 = vrot.lane.b32.xlu1 %v8599_v29, %s6215_s28  ;;  %v2453_v60 = vrot.slane %v8616_v41, 1 }
 0x314   : > { %v2186_v13 = vmax.f32 %v2154_v51, 0.0  ;;  %5741 = vrot.lane.b32.xlu0 %v5740_v42, %s6218_s17  ;;  %v8623_v51 = vpop.permute.xlu1 %5566 }
 0x316   : > { %v2273_v3 = vrot.slane %v2186_v13, 7 }
 0x317   : > { %v2076_v12 = vpop.f32.mrf.mxu0 }
 0x318   : > { %v8619_v57 = vsel %vm566_vm0, %v2272_v56, %v2273_v3  ;;  %v2359_v61 = vsel %vm566_vm0, %v2273_v3, 0.0  ;;  %v2120_v25 = vmul.f32 %v8439_v4, %v2076_v12  ;;  %v8628_v29 = vpop.permute.xlu2 %5606  ;;  %v5755_v3 = vpack.i.bf16 %v2447_v27, %v8546_v34 }
 0x319   : > { %10634 = vst [vmem:[#allocation86_spill] sm:$0xff] %v8619_v57  ;;  %v2531_v15 = vrot.slane %v2359_v61, 2  ;;  %v8632_v44 = vpack.i.bf16 %v8619_v57, %v8616_v41  ;;  %v2454_v56 = vrot.slane %v8619_v57, 1  ;;  %v2529_v13 = vrot.slane %v8619_v57, 2  ;;  %v8646_v57 = vpop.permute.xlu0 %5561 }
 0x31a   : > { %v2155_v42 = vadd.f32 %v8452_v20, %v2120_v25  ;;  %v2452_v12 = vsel %vm725_vm1, %v2449_v45, %v2451_v24  ;;  %v2456_v41 = vrot.slane %v2359_v61, 1  ;;  %10637 = vst [vmem:[#allocation41_spill] sm:$0xff] %v8646_v57 }
 0x31b   : > { %10635 = vst [vmem:[#allocation94_spill] sm:$0xff] %v8632_v44  ;;  %5771 = vrot.lane.b32.xlu1 %v8632_v44, %s6217_s16  ;;  %v2455_v52 = vsel %vm725_vm1, %v2453_v60, %v2454_v56  ;;  %v2530_v25 = vsel %vm803_vm2, %v2528_v11, %v2529_v13  ;;  %v2532_v19 = vsel %vm803_vm2, %v2529_v13, %v2531_v15 }
 0x31c   : > { %5756 = vrot.lane.b32.xlu0 %v5755_v3, %s6218_s17  ;;  %v8643_v26 = vpack.i.bf16 %v2455_v52, %v2452_v12  ;;  %v2187_v55 = vmax.f32 %v2155_v42, 0.0  ;;  %v8650_v27 = vpack.i.bf16 %v2532_v19, %v2530_v25  ;;  %v5775_v61 = vpack.i.bf16 %v2452_v12, %v2450_v1 }
 0x31d   : > { %v2457_v15 = vsel %vm725_vm1, %v2454_v56, %v2456_v41  ;;  %v5785_v42 = vpack.i.bf16 %v2530_v25, %v2527_v47 }
 0x31e   : > { %10636 = vst [vmem:[#allocation17_spill] sm:$0xff] %v8643_v26  ;;  %5781 = vrot.lane.b32.xlu2 %v8643_v26, %s6215_s28  ;;  %v2275_v60 = vrot.slane %v2187_v55, 7  ;;  %v5790_v26 = vpack.i.bf16 %v2457_v15, %v2455_v52 }
 0x31f   : > { %v2078_v34 = vpop.f32.mrf.mxu0  ;;  %10638 = vst [vmem:[#allocation42_spill] sm:$0xff] %v8650_v27 }
 0x320   : > { %v2121_v45 = vmul.f32 %v8439_v4, %v2078_v34  ;;  %v8656_v3 = vpop.permute.xlu2 %5626  ;;  %v8662_v57 = vsel %vm566_vm0, 0.0, %v2275_v60 }
 0x321   : > { %v8653_v24 = vpop.permute.xlu1 %5581  ;;  %10639 = vst [vmem:[#allocation30_spill] sm:$0xff] %v8662_v57  ;;  %v2533_v41 = vrot.slane %v8662_v57, 2  ;;  %v8671_v12 = vpop.permute.xlu0 %5576 }
 0x322   : > { %v2156_v11 = vadd.f32 %v8452_v20, %v2121_v45 }
 0x323   : > { %5776 = vrot.lane.b32.xlu1 %v5775_v61, %s6218_s17  ;;  %v2458_v61 = vrot.slane %v8662_v57, 1 }
 0x324   : > { %v2188_v13 = vmax.f32 %v2156_v11, 0.0  ;;  %5786 = vrot.lane.b32.xlu0 %v5785_v42, %s6216_s15 }
 0x326   : > { %v2276_v34 = vrot.slane %v2188_v13, 7  ;;  %5791 = vrot.lane.b32.xlu2 %v5790_v26, %s6218_s17 }
 0x327   : > { %v2081_v55 = vpop.f32.mrf.mxu0 }
 0x328   : > { %v8666_v45 = vsel %vm566_vm0, %v2275_v60, %v2276_v34  ;;  %v2360_v1 = vsel %vm566_vm0, %v2276_v34, 0.0  ;;  %v2122_v47 = vmul.f32 %v8439_v4, %v2081_v55  ;;  %v8677_v26 = vpop.permute.xlu2 %5651 }
 0x329   : > { %10640 = vst [vmem:[#allocation59_spill] sm:$0xff] %v8666_v45  ;;  %v2536_v56 = vrot.slane %v2360_v1, 2  ;;  %v8673_v52 = vpop.permute.xlu1 %5586  ;;  %v2534_v25 = vrot.slane %v8666_v45, 2  ;;  %v2459_v60 = vrot.slane %v8666_v45, 1  ;;  %v8687_v55 = vpack.i.bf16 %v8666_v45, %v8662_v57 }
 0x32a   : > { %v2157_v11 = vadd.f32 %v8452_v20, %v2122_v47  ;;  %v2461_v23 = vrot.slane %v2360_v1, 1 }
 0x32b   : > { %v2535_v42 = vsel %vm803_vm2, %v2533_v41, %v2534_v25  ;;  %v8683_v13 = vsel %vm803_vm2, %v2534_v25, %v2536_v56  ;;  %10641 = vst [vmem:[#allocation65_spill] sm:$0xff] %v8687_v55  ;;  %v2460_v44 = vsel %vm725_vm1, %v2458_v61, %v2459_v60  ;;  %v5609_v41 = vunpack.i.h.bf16 %v8628_v29 }
 0x32c   : > { %v5805_v34 = vpack.i.bf16 %v2535_v42, %v2532_v19  ;;  %v8691_v47 = vpack.i.bf16 %v8683_v13, %v2535_v42  ;;  %v2189_v22 = vmax.f32 %v2157_v11, 0.0  ;;  %v8694_v17 = vpack.i.bf16 %v2460_v44, %v2457_v15 }
 0x32d   : > { %v5608_v56 = vunpack.i.l.bf16 %v8628_v29  ;;  %v5653_v29 = vunpack.i.l.bf16 %v8677_v26 }
 0x32e   : > { %10642 = vst [vmem:[#allocation69_spill] sm:$0xff] %v8691_v47  ;;  %5806 = vrot.lane.b32.xlu1 %v5805_v34, %s6216_s15  ;;  %5796 = vrot.lane.b32.xlu2 %v8687_v55, %s6217_s16  ;;  %v2278_v15 = vrot.slane %v2189_v22, 7  ;;  %v3322_v55 = vsel %vm3308_vm13, %v8263_v35, %v5609_v41 }
 0x32f   : > { %10643 = vst [vmem:[#allocation89_spill] sm:$0xff] %v8694_v17  ;;  %v2083_v19 = vpop.f32.mrf.mxu0  ;;  %5801 = vrot.lane.b32.xlu0 %v8694_v17, %s6215_s28  ;;  %v2462_v17 = vsel %vm725_vm1, %v2459_v60, %v2461_v23 }
 0x330   : > { %v2123_v25 = vmul.f32 %v8439_v4, %v2083_v19  ;;  %v5612_v61 = vpop.permute.xlu0 %5611  ;;  %v8706_v34 = vpop.permute.xlu2 %5661  ;;  %v3321_v19 = vsel %vm3308_vm13, %v8227_v14, %v5608_v56  ;;  %v8722_v35 = vsel %vm566_vm0, 0.0, %v2278_v15 }
 0x331   : > { %v8703_v11 = vpop.permute.xlu1 %5591  ;;  %v5614_v1 = vunpack.i.h.bf16 %v5612_v61  ;;  %10645 = vst [vmem:[#allocation74_spill] sm:$0xff] %v8706_v34  ;;  %v5613_v45 = vunpack.i.l.bf16 %v5612_v61  ;;  %v5810_v61 = vpack.i.bf16 %v2462_v17, %v2460_v44  ;;  %v2463_v14 = vrot.slane %v8722_v35, 1 }
 0x332   : > { %10644 = vst [vmem:[#allocation93_spill] sm:$0xff] %v8703_v11  ;;  %v2158_v42 = vadd.f32 %v8452_v20, %v2123_v25 }
 0x333   : > { %v3354_v22 = vsel %vm3340_vm14, %v3322_v55, %v5614_v1  ;;  %v8716_v25 = vsel %vm3340_vm14, %v3321_v19, %v5613_v45  ;;  %10647 = vst [vmem:[#allocation38_spill] sm:$0xff] %v8722_v35  ;;  %v5549_v1 = vunpack.i.h.bf16 %v8601_v8  ;;  %v5553_v19 = vunpack.i.l.bf16 %v8519_v53 }
 0x334   : > { %v2190_v11 = vmax.f32 %v2158_v42, 0.0  ;;  %v8719_v34 = vsel %vm3372_vm15, %v3354_v22, %v5653_v29  ;;  %v5574_v22 = vunpack.i.h.bf16 %v8557_v6 }
 0x335   : > { %10646 = vst [vmem:[#allocation44_spill] sm:$0xff] %v8719_v34 }
 0x336   : > { %v2279_v41 = vrot.slane %v2190_v11, 7 }
 0x337   : > { %5811 = vrot.lane.b32.xlu0 %v5810_v61, %s6218_s17 }
 0x338   : > { %v8725_v23 = vsel %vm566_vm0, %v2278_v15, %v2279_v41  ;;  %v2361_v60 = vsel %vm566_vm0, %v2279_v41, 0.0  ;;  %v8730_v56 = vpop.permute.xlu0 %5616  ;;  %v8734_v29 = vpop.permute.xlu2 %5676  ;;  %v2538_v41 = vrot.slane %v8722_v35, 2 }
 0x339   : > { %10648 = vst [vmem:[#allocation35_spill] sm:$0xff] %v8725_v23  ;;  %v2466_v55 = vrot.slane %v2361_v60, 1  ;;  %v5622_v45 = vpop.permute.xlu1 %5621  ;;  %v2464_v42 = vrot.slane %v8725_v23, 1  ;;  %v2541_v44 = vrot.slane %v2361_v60, 2  ;;  %v2539_v57 = vrot.slane %v8725_v23, 2 }
 0x33a   : > { %v3314_v60 = vsel %vm3308_vm13, %v8002_v31, %v5549_v1  ;;  %v5623_v34 = vunpack.i.l.bf16 %v5622_v45  ;;  %v3315_v31 = vsel %vm3308_vm13, %v8019_v54, %v5553_v19 }
 0x33b   : > { %v8737_v11 = vsel %vm725_vm1, %v2464_v42, %v2466_v55  ;;  %v2465_v15 = vsel %vm725_vm1, %v2463_v14, %v2464_v42  ;;  %v8752_v55 = vpack.i.bf16 %v8725_v23, %v8722_v35  ;;  %v5578_v14 = vunpack.i.l.bf16 %v8671_v12 }
 0x33c   : > { %2615 = vrot.lane.b32.xlu2 %v8737_v11, %s6215_s28  ;;  %v8745_v61 = vpack.i.bf16 %v2465_v15, %v2462_v17  ;;  %v2540_v42 = vsel %vm803_vm2, %v2538_v41, %v2539_v57  ;;  %v2542_v47 = vsel %vm803_vm2, %v2539_v57, %v2541_v44  ;;  %v5624_v17 = vunpack.i.h.bf16 %v5622_v45 }
 0x33d   : > { %10650 = vst [vmem:[#allocation63_spill] sm:$0xff] %v8752_v55  ;;  %v8761_v38 = vpack.i.bf16 %v2542_v47, %v2540_v42  ;;  %v3346_v1 = vsel %vm3340_vm14, %v3314_v60, %v5574_v22  ;;  %v3347_v9 = vsel %vm3340_vm14, %v3315_v31, %v5578_v14  ;;  %v5678_v31 = vunpack.i.l.bf16 %v8734_v29 }
 0x33e   : > { %10649 = vst [vmem:[#allocation55_spill] sm:$0xff] %v8745_v61  ;;  %5821 = vrot.lane.b32.xlu1 %v8745_v61, %s6215_s28  ;;  %v5825_v61 = vpack.i.bf16 %v2540_v42, %v8683_v13  ;;  %v3380_v54 = vsel %vm3372_vm15, %v3347_v9, %v5624_v17  ;;  %v3379_v19 = vsel %vm3372_vm15, %v3346_v1, %v5623_v34  ;;  %s6221_s28 = smov 64  }
 0x33f   : > { %5816 = vrot.lane.b32.xlu0 %v8752_v55, %s6217_s16  ;;  %10651 = vst [vmem:[#allocation83_spill] sm:$0xff] %v8761_v38  ;;  %v5654_v55 = vunpack.i.h.bf16 %v8677_v26 }
 0x340   : > { %v5632_v35 = vpop.permute.xlu0 %5631 }
 0x341   : > { %v5642_v23 = vpop.permute.xlu1 %5641  ;;  %v5634_v57 = vunpack.i.h.bf16 %v5632_v35  ;;  %v5633_v44 = vunpack.i.l.bf16 %v5632_v35  ;;  %v5692_v45 = vpop.permute.xlu2 %5691 }
 0x342   : > { %v5644_v41 = vunpack.i.h.bf16 %v5642_v23  ;;  %v5643_v39 = vunpack.i.l.bf16 %v5642_v23  ;;  %v5694_v38 = vunpack.i.h.bf16 %v5692_v45  ;;  %v5693_v27 = vunpack.i.l.bf16 %v5692_v45 }
 0x343   : > { %v3324_v22 = vsel %vm3308_vm13, %v8309_v10, %v5634_v57  ;;  %v3323_v13 = vsel %vm3308_vm13, %v8269_v37, %v5633_v44  ;;  %v5548_v44 = vunpack.i.l.bf16 %v8601_v8 }
 0x344   : > { %5826 = vrot.lane.b32.xlu2 %v5825_v61, %s6216_s15  ;;  %v3355_v35 = vsel %vm3340_vm14, %v3323_v13, %v5643_v39  ;;  %v8778_v23 = vsel %vm3405_vm3, %v3380_v54, %v5694_v38  ;;  %v8781_v26 = vsel %vm3405_vm3, %v3379_v19, %v5693_v27  ;;  %v3356_v9 = vsel %vm3340_vm14, %v3324_v22, %v5644_v41 }
 0x345   : > { %v8785_v34 = vsel %vm3372_vm15, %v3355_v35, %v5654_v55  ;;  %v5850_v27 = vpack.i.bf16 %v8737_v11, %v2465_v15  ;;  %v5584_v54 = vunpack.i.h.bf16 %v8653_v24  ;;  %v5573_v19 = vunpack.i.l.bf16 %v8557_v6 }
 0x346   : > { %5836 = vrot.lane.b32.xlu1 %v7978_v43, %s6219_s23  ;;  %v5569_v22 = vunpack.i.h.bf16 %v8623_v51  ;;  %v3313_v8 = vsel %vm3308_vm13, %v7944_v18, %v5548_v44  ;;  %v5598_v18 = vunpack.i.l.bf16 %v8575_v59 }
 0x347   : > { %2708 = vrot.lane.b32.xlu0 %v2542_v47, %s6216_s15  ;;  %v10652_v47 = vpack.i.bf16 %v7893_v40, %v7896_v5  ;;  %v3320_v35 = vsel %vm3308_vm13, %v8223_v0, %v5584_v54 }
 0x348   : > { %v8790_v10 = vpop.permute.xlu0 %5636 }
 0x349   : > { %v5647_v37 = vpop.permute.xlu1 %5646  ;;  %v8797_v61 = vpop.permute.xlu2 %5696 }
 0x34a   : > { %v5649_v39 = vunpack.i.h.bf16 %v5647_v37 }
 0x34c   : > { %v3386_v38 = vsel %vm3372_vm15, %v8716_v25, %v5649_v39  ;;  %5841 = vrot.lane.b32.xlu2 %v8053_v36, %s6219_s23  ;;  %v5679_v25 = vunpack.i.h.bf16 %v8734_v29  ;;  %v5599_v39 = vunpack.i.h.bf16 %v8575_v59 }
 0x34e   : > { %5851 = vrot.lane.b32.xlu1 %v5850_v27, %s6218_s17  ;;  %v5579_v27 = vunpack.i.h.bf16 %v8671_v12  ;;  %v3352_v0 = vsel %vm3340_vm14, %v3320_v35, %v5599_v39  ;;  %v5698_v12 = vunpack.i.l.bf16 %v8797_v61 }
 0x34f   : > { %5831 = vrot.lane.b32.xlu0 %v10652_v47, %s6219_s23  ;;  %v3345_v47 = vsel %vm3340_vm14, %v3313_v8, %v5573_v19 }
 0x350   : > { %v5657_v60 = vpop.permute.xlu0 %5656  ;;  %v3327_v8 = vsel %vm3308_vm13, %v8384_v28, %v5698_v12 }
 0x351   : > { %v5672_v55 = vpop.permute.xlu1 %5671  ;;  %v5658_v14 = vunpack.i.l.bf16 %v5657_v60  ;;  %v5659_v1 = vunpack.i.h.bf16 %v5657_v60 }
 0x352   : > { %v5674_v42 = vunpack.i.h.bf16 %v5672_v55  ;;  %v5673_v17 = vunpack.i.l.bf16 %v5672_v55  ;;  %v5559_v55 = vunpack.i.h.bf16 %v8612_v50 }
 0x353   : > { %v8807_v15 = vsel %vm3372_vm15, %v3356_v9, %v5658_v14 }
 0x354   : > { %v3326_v41 = vsel %vm3308_vm13, %v8372_v49, %v5674_v42  ;;  %v3325_v40 = vsel %vm3308_vm13, %v8320_v63, %v5673_v17  ;;  %5866 = vrot.lane.b32.xlu2 %v8248_v21, %s6219_s23  ;;  %v5544_v49 = vunpack.i.h.bf16 %v8591_v58  ;;  %v5554_v63 = vunpack.i.h.bf16 %v8519_v53 }
 0x355   : > { %v3357_v5 = vsel %vm3340_vm14, %v3325_v40, %v5678_v31  ;;  %v3358_v57 = vsel %vm3340_vm14, %v3326_v41, %v5679_v25  ;;  %v8818_v29 = vpop.permute.xlu2 %5716  ;;  %v5648_v53 = vunpack.i.l.bf16 %v5647_v37  ;;  %v5628_v40 = vunpack.i.l.bf16 %v8656_v3 }
 0x356   : > { %v8821_v45 = vsel %vm3372_vm15, %v3357_v5, %v5659_v1  ;;  %v3312_v9 = vsel %vm3308_vm13, %v7930_v2, %v5544_v49  ;;  %v3316_v6 = vsel %vm3308_vm13, %v8078_v32, %v5554_v63  ;;  %v5699_v2 = vunpack.i.h.bf16 %v8797_v61 }
 0x357   : > { %5846 = vrot.lane.b32.xlu0 %v8127_v7, %s6219_s23  ;;  %v3344_v60 = vsel %vm3340_vm14, %v3312_v9, %v5569_v22  ;;  %v5558_v32 = vunpack.i.l.bf16 %v8612_v50  ;;  %v3348_v31 = vsel %vm3340_vm14, %v3316_v6, %v5579_v27  ;;  %v5583_v1 = vunpack.i.l.bf16 %v8653_v24  ;;  %v10654_v50 = vld [vmem:[#allocation42_spill] sm:$0xff] }
 0x358   : > { %v8830_v13 = vpop.permute.xlu0 %5666  ;;  %v3385_v41 = vsel %vm3372_vm15, %v3352_v0, %v5648_v53  ;;  %v5588_v49 = vunpack.i.l.bf16 %v8673_v52  ;;  %v5619_v24 = vunpack.i.h.bf16 %v8730_v56  ;;  %v3328_v22 = vsel %vm3308_vm13, %v8463_v16, %v5699_v2 }
 0x359   : > { %v3317_v35 = vsel %vm3308_vm13, %v8093_v30, %v5558_v32  ;;  %v5618_v9 = vunpack.i.l.bf16 %v8730_v56  ;;  %v5629_v6 = vunpack.i.h.bf16 %v8656_v3  ;;  %v3319_v2 = vsel %vm3308_vm13, %v8166_v33, %v5583_v1 }
 0x35a   : > { %v3381_v30 = vsel %vm3372_vm15, %v3348_v31, %v5628_v40  ;;  %v3349_v56 = vsel %vm3340_vm14, %v3317_v35, %v5588_v49  ;;  %v5638_v35 = vunpack.i.l.bf16 %v8790_v10 }
 0x35b   : > { %v3377_v32 = vsel %vm3372_vm15, %v3344_v60, %v5618_v9  ;;  %v3856_v60 = vld [vmem:[%s10118_s8] sm:$0xf] }
 0x35d   : > { %v5682_v14 = vpop.permute.xlu1 %5681  ;;  %v5722_v42 = vpop.permute.xlu2 %5721 }
 0x35e   : > { %v5683_v37 = vunpack.i.l.bf16 %v5682_v14  ;;  %v5724_v17 = vunpack.i.h.bf16 %v5722_v42  ;;  %v5723_v25 = vunpack.i.l.bf16 %v5722_v42 }
 0x35f   : > { %5871 = vrot.lane.b32.xlu0 %v8292_v62, %s6219_s23 }
 0x360   : > { %v3391_v5 = vsel %vm3372_vm15, %v3358_v57, %v5683_v37  ;;  %v8858_v61 = vsel %vm3405_vm3, %v3386_v38, %v5724_v17  ;;  %v8861_v44 = vsel %vm3405_vm3, %v3385_v41, %v5723_v25  ;;  %v5702_v54 = vpop.permute.xlu0 %5701  ;;  %v5718_v57 = vunpack.i.l.bf16 %v8818_v29 }
 0x361   : > { %v5704_v63 = vunpack.i.h.bf16 %v5702_v54  ;;  %v5703_v19 = vunpack.i.l.bf16 %v5702_v54  ;;  %v5684_v38 = vunpack.i.h.bf16 %v5682_v14  ;;  %v3378_v14 = vsel %vm3372_vm15, %v3345_v47, %v5619_v24 }
 0x363   : > { %v3359_v39 = vsel %vm3340_vm14, %v3327_v8, %v5703_v19  ;;  %v3360_v27 = vsel %vm3340_vm14, %v3328_v22, %v5704_v63  ;;  %v2086_v53 = vpop.f32.mrf.mxu0  ;;  %v10653_v63 = vmov 65535   ;;  %v5589_v22 = vunpack.i.h.bf16 %v8673_v52  ;;  %v6163_v52 = vld [vmem:[%s6313_s19] sm:$0xff] }
 0x364   : > { %v2124_v16 = vmul.f32 %v8439_v4, %v2086_v53  ;;  %v3392_v0 = vsel %vm3372_vm15, %v3359_v39, %v5684_v38  ;;  %v8879_v28 = vsel %vm3372_vm15, %v3360_v27, %v5718_v57  ;;  %v3924_v19 = vsel %vm3923_vm6, 4294967295, %v10653_v63 }
 0x365   : > { %v5687_v42 = vpop.permute.xlu1 %5686  ;;  %v5752_v12 = vpop.permute.xlu2 %5751  ;;  %v5639_v8 = vunpack.i.h.bf16 %v8790_v10  ;;  %v3382_v57 = vsel %vm3372_vm15, %v3349_v56, %v5629_v6  ;;  %v3925_v38 = vsel %vm3661_vm5, %v3924_v19, 0  ;;  %v3318_v6 = vsel %vm3308_vm13, %v8152_v46, %v5559_v55 }
 0x366   : > { %v2159_v3 = vadd.f32 %v8452_v20, %v2124_v16  ;;  %v5689_v37 = vunpack.i.h.bf16 %v5687_v42  ;;  %v5688_v17 = vunpack.i.l.bf16 %v5687_v42  ;;  %v5754_v25 = vunpack.i.h.bf16 %v5752_v12 }
 0x367   : > { %v5753_v41 = vunpack.i.l.bf16 %v5752_v12  ;;  %5891 = vrot.lane.b32.xlu0 %v8505_v48, %s6219_s23  ;;  %v3927_v27 = vand.u32 %v3925_v38, %v3856_v60  ;;  %v3351_v10 = vsel %vm3340_vm14, %v3319_v2, %v5598_v18  ;;  %v10692_v48 = vld [vmem:[#allocation11_spill] sm:$0xff] }
 0x368   : > { %v2191_v33 = vmax.f32 %v2159_v3, 0.0  ;;  %v8891_v31 = vsel %vm3405_vm3, %v3378_v14, %v5689_v37  ;;  %v8894_v47 = vsel %vm3405_vm3, %v3377_v32, %v5688_v17  ;;  %v8897_v1 = vsel %vm3405_vm3, %v3392_v0, %v5754_v25  ;;  %v5707_v40 = vpop.permute.xlu0 %5706  ;;  %v6164_v0 = vld [vmem:[%s6313_s19 + $0x8] sm:$0xff] }
 0x369   : > { %v8903_v54 = vsel %vm3405_vm3, %v3391_v5, %v5753_v41  ;;  %v5709_v49 = vunpack.i.h.bf16 %v5707_v40  ;;  %v5708_v24 = vunpack.i.l.bf16 %v5707_v40  ;;  %v3859_v14 = vpack.c.bf16 %v6164_v0, %v6163_v52  ;;  %3936 = vmatpush.bf16.msra.mxu2 %v3927_v27 }
 0x36a   : > { %v2281_v53 = vrot.slane %v2191_v33, 7  ;;  %v3384_v3 = vsel %vm3372_vm15, %v3351_v10, %v5639_v8  ;;  %v5719_v41 = vunpack.i.h.bf16 %v8818_v29 }
 0x36b   : > { %v8912_v9 = vsel %vm3405_vm3, %v3382_v57, %v5709_v49  ;;  %v8915_v5 = vsel %vm3405_vm3, %v3381_v30, %v5708_v24  ;;  %v2088_v39 = vpop.f32.mrf.mxu0  ;;  %v3350_v30 = vsel %vm3340_vm14, %v3318_v6, %v5589_v22  ;;  %v10655_v24 = vld [vmem:[#allocation28_spill] sm:$0xff] }
 0x36c   : > { %v2125_v16 = vmul.f32 %v8439_v4, %v2088_v39  ;;  %v3383_v37 = vsel %vm3372_vm15, %v3350_v30, %v5638_v35  ;;  %v2346_v46 = vsel %vm566_vm0, 0.0, %v2281_v53  ;;  %4846 = vmatmul.msk.bf16.vlgmr.msra.gmra.mxu2 %vm1646_vm4, %v3859_v14  ;;  %v10656_v35 = vld [vmem:[#allocation16_spill] sm:$0xff] }
 0x36d   : > { %v5712_v56 = vpop.permute.xlu1 %5711  ;;  %v2545_v33 = vrot.slane %v2346_v46, 1  ;;  %v2550_v40 = vrot.slane %v2346_v46, 2 }
 0x36e   : > { %v2160_v42 = vadd.f32 %v8452_v20, %v2125_v16  ;;  %v5714_v12 = vunpack.i.h.bf16 %v5712_v56  ;;  %v5713_v4 = vunpack.i.l.bf16 %v5712_v56  ;;  %v8941_v20 = vpop.permute.xlu2 %5766 }
 0x36f   : > { %5906 = vrot.lane.b32.xlu0 %v10654_v50, %s6219_s23  ;;  %v10690_v50 = vld [vmem:[#allocation59_spill] sm:$0xff] }
 0x370   : > { %v2192_v59 = vmax.f32 %v2160_v42, 0.0  ;;  %v8935_v18 = vsel %vm3405_vm3, %v3384_v3, %v5714_v12  ;;  %v8938_v55 = vsel %vm3405_vm3, %v3383_v37, %v5713_v4  ;;  %v5727_v2 = vpop.permute.xlu0 %5726  ;;  %v6165_v3 = vld [vmem:[%s6313_s19 + $0x10] sm:$0xff]  ;;  %v6166_v37 = vld [vmem:[%s6313_s19 + $0x18] sm:$0xff] }
 0x371   : > { %v5729_v17 = vunpack.i.h.bf16 %v5727_v2  ;;  %v5728_v32 = vunpack.i.l.bf16 %v5727_v2 }
 0x372   : > { %v2282_v25 = vrot.slane %v2192_v59, 7 }
 0x373   : > { %v3330_v63 = vsel %vm3308_vm13, %v10655_v24, %v5729_v17  ;;  %v3329_v39 = vsel %vm3308_vm13, %v10656_v35, %v5728_v32  ;;  %v10660_v24 = vld [vmem:[#allocation32_spill] sm:$0xff]  ;;  %v5769_v35 = vunpack.i.h.bf16 %v8941_v20 }
 0x374   : > { %v2283_v60 = vsel %vm566_vm0, %v2281_v53, %v2282_v25  ;;  %v2362_v49 = vsel %vm566_vm0, %v2282_v25, 0.0  ;;  %vm3438_vm0 = vcmask 326656  }
 0x375   : > { %v2546_v19 = vrot.slane %v2283_v60, 1  ;;  %v2548_v22 = vrot.slane %v2362_v49, 1  ;;  %v2551_v8 = vrot.slane %v2283_v60, 2  ;;  %v2553_v57 = vrot.slane %v2362_v49, 2  ;;  %v5732_v38 = vpop.permute.xlu1 %5731  ;;  %v10659_v49 = vld [vmem:[#allocation7_spill] sm:$0xff] }
 0x376   : > { %v5734_v27 = vunpack.i.h.bf16 %v5732_v38  ;;  %v5733_v16 = vunpack.i.l.bf16 %v5732_v38  ;;  %v8950_v29 = vpack.i.bf16 %v2283_v60, %v2346_v46  ;;  %v3860_v46 = vpack.c.bf16 %v6166_v37, %v6165_v3  ;;  %v10665_v37 = vld [vmem:[#allocation72_spill] sm:$0xff] }
 0x377   : > { %v2552_v53 = vsel %vm803_vm2, %v2550_v40, %v2551_v8  ;;  %v2554_v52 = vsel %vm803_vm2, %v2551_v8, %v2553_v57  ;;  %v8955_v0 = vsel %vm725_vm1, %v2545_v33, %v2546_v19  ;;  %v8958_v14 = vsel %vm725_vm1, %v2546_v19, %v2548_v22  ;;  %v10658_v40 = vld [vmem:[#allocation22_spill] sm:$0xff] }
 0x378   : > { %v3361_v6 = vsel %vm3340_vm14, %v3329_v39, %v5733_v16  ;;  %v3362_v10 = vsel %vm3340_vm14, %v3330_v63, %v5734_v27  ;;  %5856 = vrot.lane.b32.xlu1 %v8950_v29, %s6217_s16  ;;  %v8964_v56 = vpack.i.bf16 %v2554_v52, %v2552_v53  ;;  %v5880_v30 = vpack.i.bf16 %v8958_v14, %v8955_v0  ;;  %v8968_v42 = vpop.permute.xlu2 %5781  ;;  %v10661_v27 = vld [vmem:[#allocation8_spill] sm:$0xff]  ;;  %v10662_v53 = vld [vmem:[#allocation73_spill] sm:$0xff] }
 0x379   : > { %v3394_v12 = vsel %vm3372_vm15, %v3361_v6, %v5719_v41  ;;  %v5768_v8 = vunpack.i.l.bf16 %v8941_v20  ;;  %v10663_v6 = vld [vmem:[#allocation2_spill] sm:$0xff]  ;;  %vm3471_vm1 = vcmask 392192   ;;  %vm3536_vm2 = vcmask 523264  }
 0x37a   : > { %10657 = vst [vmem:[#allocation88_spill] sm:$0xff] %v8964_v56  ;;  %5921 = vrot.lane.b32.xlu0 %v8964_v56, %s6219_s23  ;;  %5881 = vrot.lane.b32.xlu2 %v5880_v30, %s6218_s17  ;;  %v10664_v30 = vld [vmem:[#allocation44_spill] sm:$0xff]  ;;  %v10689_v56 = vld [vmem:[#allocation38_spill] sm:$0xff] }
 0x37c   : > { %4847 = vmatmul.msk.bf16.gmra.mxu2 %vm1646_vm4, %v3860_v46  ;;  %v10666_v46 = vld [vmem:[#allocation67_spill] sm:$0xff] }
 0x37d   : > { %v5747_v59 = vpop.permute.xlu1 %5746 }
 0x37e   : > { %v5749_v2 = vunpack.i.h.bf16 %v5747_v59  ;;  %v5748_v17 = vunpack.i.l.bf16 %v5747_v59  ;;  %v5737_v25 = vpop.permute.xlu0 %5736 }
 0x37f   : > { %v5738_v32 = vunpack.i.l.bf16 %v5737_v25  ;;  %v5739_v39 = vunpack.i.h.bf16 %v5737_v25  ;;  %v6168_v25 = vld [vmem:[%s6313_s19 + $0x28] sm:$0xff] }
 0x380   : > { %v8980_v33 = vsel %vm3405_vm3, %v8821_v45, %v5749_v2  ;;  %v8984_v41 = vsel %vm3405_vm3, %v8807_v15, %v5748_v17  ;;  %5861 = vrot.lane.b32.xlu1 %v10658_v40, %s6219_s23  ;;  %v8994_v45 = vpop.permute.xlu2 %5791  ;;  %v6167_v17 = vld [vmem:[%s6313_s19 + $0x20] sm:$0xff] }
 0x381   : > { %v3395_v60 = vsel %vm3372_vm15, %v3362_v10, %v5738_v32 }
 0x382   : > { %5936 = vrot.lane.b32.xlu0 %v10659_v49, %s6220_s26  ;;  %5886 = vrot.lane.b32.xlu2 %v10660_v24, %s6219_s23 }
 0x385   : > { %v5762_v63 = vpop.permute.xlu1 %5761 }
 0x386   : > { %v5742_v19 = vpop.permute.xlu0 %5741  ;;  %v5764_v15 = vunpack.i.h.bf16 %v5762_v63  ;;  %v5763_v22 = vunpack.i.l.bf16 %v5762_v63 }
 0x387   : > { %v5744_v57 = vunpack.i.h.bf16 %v5742_v19  ;;  %v5743_v38 = vunpack.i.l.bf16 %v5742_v19 }
 0x388   : > { %v3332_v16 = vsel %vm3308_vm13, %v10661_v27, %v5764_v15  ;;  %v3331_v52 = vsel %vm3308_vm13, %v10662_v53, %v5763_v22  ;;  %5876 = vrot.lane.b32.xlu1 %v10663_v6, %s6219_s23  ;;  %v9021_v32 = vpop.permute.xlu2 %5796  ;;  %v5793_v15 = vunpack.i.l.bf16 %v8994_v45  ;;  %v10669_v53 = vld [vmem:[#allocation83_spill] sm:$0xff] }
 0x389   : > { %v9006_v10 = vsel %vm3405_vm3, %v8785_v34, %v5744_v57  ;;  %v9010_v3 = vsel %vm3405_vm3, %v10664_v30, %v5743_v38  ;;  %v3363_v20 = vsel %vm3340_vm14, %v3331_v52, %v5768_v8  ;;  %v3364_v59 = vsel %vm3340_vm14, %v3332_v16, %v5769_v35  ;;  %v10667_v38 = vld [vmem:[#allocation24_spill] sm:$0xff]  ;;  %v10668_v16 = vld [vmem:[#allocation15_spill] sm:$0xff] }
 0x38a   : > { %5951 = vrot.lane.b32.xlu0 %v10665_v37, %s6220_s26  ;;  %5901 = vrot.lane.b32.xlu2 %v10666_v46, %s6219_s23  ;;  %v3396_v2 = vsel %vm3372_vm15, %v3363_v20, %v5739_v39  ;;  %v3861_v34 = vpack.c.bf16 %v6168_v25, %v6167_v17  ;;  %v5784_v52 = vunpack.i.h.bf16 %v8968_v42  ;;  %v5783_v30 = vunpack.i.l.bf16 %v8968_v42  ;;  %v10670_v17 = vld [vmem:[#allocation81_spill] sm:$0xff] }
 0x38c   : > { %4848 = vmatmul.msk.bf16.gmra.mxu2 %vm1646_vm4, %v3861_v34  ;;  %v3334_v25 = vsel %vm3308_vm13, %v10670_v17, %v5784_v52  ;;  %v10671_v34 = vld [vmem:[#allocation40_spill] sm:$0xff]  ;;  %v5794_v52 = vunpack.i.h.bf16 %v8994_v45  ;;  %v10673_v17 = vld [vmem:[#allocation94_spill] sm:$0xff] }
 0x38d   : > { %v5772_v49 = vpop.permute.xlu1 %5771 }
 0x38e   : > { %v5757_v63 = vpop.permute.xlu0 %5756  ;;  %v5773_v19 = vunpack.i.l.bf16 %v5772_v49 }
 0x38f   : > { %v5759_v22 = vunpack.i.h.bf16 %v5757_v63  ;;  %v5758_v8 = vunpack.i.l.bf16 %v5757_v63  ;;  %v3333_v63 = vsel %vm3308_vm13, %v10671_v34, %v5783_v30 }
 0x390   : > { %v3397_v57 = vsel %vm3372_vm15, %v3364_v59, %v5773_v19  ;;  %5896 = vrot.lane.b32.xlu1 %v10667_v38, %s6219_s23 }
 0x391   : > { %v9029_v35 = vsel %vm3405_vm3, %v3394_v12, %v5759_v22  ;;  %v9033_v39 = vsel %vm3405_vm3, %v8879_v28, %v5758_v8  ;;  %v9036_v27 = vsel %vm3405_vm3, %v3397_v57, %v5793_v15  ;;  %v5798_v22 = vunpack.i.l.bf16 %v9021_v32 }
 0x392   : > { %5966 = vrot.lane.b32.xlu0 %v10668_v16, %s6220_s26  ;;  %5916 = vrot.lane.b32.xlu2 %v10669_v53, %s6219_s23  ;;  %v5774_v8 = vunpack.i.h.bf16 %v5772_v49  ;;  %v10672_v16 = vld [vmem:[#allocation69_spill] sm:$0xff] }
 0x395   : > { %v5777_v20 = vpop.permute.xlu1 %5776 }
 0x396   : > { %v9044_v12 = vpop.permute.xlu2 %2615  ;;  %v5779_v37 = vunpack.i.h.bf16 %v5777_v20  ;;  %v5778_v59 = vunpack.i.l.bf16 %v5777_v20  ;;  %v5787_v28 = vpop.permute.xlu0 %5786 }
 0x397   : > { %v5789_v19 = vunpack.i.h.bf16 %v5787_v28  ;;  %v5788_v15 = vunpack.i.l.bf16 %v5787_v28 }
 0x398   : > { %v9052_v42 = vsel %vm3405_vm3, %v3396_v2, %v5779_v37  ;;  %v9055_v57 = vsel %vm3405_vm3, %v3395_v60, %v5778_v59  ;;  %5911 = vrot.lane.b32.xlu1 %v10672_v16, %s6219_s23  ;;  %v10674_v2 = vld [vmem:[#allocation9_spill] sm:$0xff]  ;;  %v6169_v37 = vld [vmem:[%s6313_s19 + $0x30] sm:$0xff] }
 0x399   : > { %v3365_v30 = vsel %vm3340_vm14, %v3333_v63, %v5788_v15  ;;  %v3366_v20 = vsel %vm3340_vm14, %v3334_v25, %v5789_v19  ;;  %v6170_v59 = vld [vmem:[%s6313_s19 + $0x38] sm:$0xff]  ;;  %v10675_v25 = vld [vmem:[#allocation78_spill] sm:$0xff] }
 0x39a   : > { %v3398_v28 = vsel %vm3372_vm15, %v3365_v30, %v5774_v8  ;;  %5981 = vrot.lane.b32.xlu0 %v10673_v17, %s6220_s26  ;;  %5931 = vrot.lane.b32.xlu2 %v10674_v2, %s6220_s26  ;;  %v3399_v60 = vsel %vm3372_vm15, %v3366_v20, %v5798_v22  ;;  %v3862_v45 = vpack.c.bf16 %v6170_v59, %v6169_v37  ;;  %v10676_v22 = vld [vmem:[#allocation3_spill] sm:$0xff]  ;;  %v10677_v20 = vld [vmem:[#allocation30_spill] sm:$0xff] }
 0x39b   : > { %v9069_v49 = vsel %vm3405_vm3, %v3398_v28, %v5794_v52  ;;  %v5799_v52 = vunpack.i.h.bf16 %v9021_v32  ;;  %v10678_v2 = vld [vmem:[#allocation86_spill] sm:$0xff] }
 0x39c   : > { %4849 = vmatmul.msk.bf16.gmra.mxu2 %vm1646_vm4, %v3862_v45 }
 0x39e   : > { %v5827_v34 = vpop.permute.xlu2 %5826 }
 0x3a0   : > { %v5807_v63 = vpop.permute.xlu1 %5806  ;;  %5926 = vrot.lane.b32.xlu1 %v10675_v25, %s6220_s26 }
 0x3a1   : > { %v5809_v19 = vunpack.i.h.bf16 %v5807_v63  ;;  %v5808_v15 = vunpack.i.l.bf16 %v5807_v63  ;;  %v5802_v8 = vpop.permute.xlu0 %5801 }
 0x3a2   : > { %v5804_v30 = vunpack.i.h.bf16 %v5802_v8  ;;  %v5803_v17 = vunpack.i.l.bf16 %v5802_v8  ;;  %5996 = vrot.lane.b32.xlu0 %v8950_v29, %s6220_s26  ;;  %5946 = vrot.lane.b32.xlu2 %v10676_v22, %s6220_s26 }
 0x3a4   : > { %v3336_v28 = vsel %vm3308_vm13, %v10677_v20, %v5804_v30  ;;  %v3335_v37 = vsel %vm3308_vm13, %v10678_v2, %v5803_v17  ;;  %v6172_v2 = vld [vmem:[%s6313_s19 + $0x48] sm:$0xff] }
 0x3a5   : > { %v3367_v59 = vsel %vm3340_vm14, %v3335_v37, %v5808_v15  ;;  %v3368_v63 = vsel %vm3340_vm14, %v3336_v28, %v5809_v19  ;;  %v10679_v15 = vld [vmem:[#allocation71_spill] sm:$0xff]  ;;  %v10680_v19 = vld [vmem:[#allocation12_spill] sm:$0xff] }
 0x3a6   : > { %v5842_v45 = vpop.permute.xlu2 %5841  ;;  %v3400_v8 = vsel %vm3372_vm15, %v3367_v59, %v5799_v52  ;;  %v10681_v28 = vld [vmem:[#allocation4_spill] sm:$0xff] }
 0x3a7   : > { %v5844_v29 = vunpack.i.h.bf16 %v5842_v45  ;;  %v5843_v25 = vunpack.i.l.bf16 %v5842_v45 }
 0x3a8   : > { %5941 = vrot.lane.b32.xlu1 %v10679_v15, %s6220_s26 }
 0x3a9   : > { %v9090_v32 = vsel %vm3438_vm0, %v8891_v31, %v5844_v29  ;;  %v9094_v30 = vsel %vm3438_vm0, %v8894_v47, %v5843_v25  ;;  %v5812_v17 = vpop.permute.xlu0 %5811  ;;  %v6171_v47 = vld [vmem:[%s6313_s19 + $0x40] sm:$0xff] }
 0x3aa   : > { %v5814_v22 = vunpack.i.h.bf16 %v5812_v17  ;;  %v5813_v20 = vunpack.i.l.bf16 %v5812_v17  ;;  %6006 = vrot.lane.b32.xlu0 %v10680_v19, %s6213_s27  ;;  %5961 = vrot.lane.b32.xlu2 %v10681_v28, %s6220_s26  ;;  %v3863_v37 = vpack.c.bf16 %v6172_v2, %v6171_v47  ;;  %v10686_v2 = vld [vmem:[#allocation41_spill] sm:$0xff] }
 0x3ac   : > { %v9103_v52 = vsel %vm3405_vm3, %v3399_v60, %v5813_v20  ;;  %v9106_v31 = vsel %vm3405_vm3, %v3400_v8, %v5814_v22  ;;  %v10684_v60 = vld [vmem:[#allocation13_spill] sm:$0xff]  ;;  %4850 = vmatmul.msk.bf16.gmra.mxu2 %vm1646_vm4, %v3863_v37  ;;  %v10685_v8 = vld [vmem:[#allocation19_spill] sm:$0xff]  ;;  %v5543_v20 = vunpack.i.l.bf16 %v8591_v58  ;;  %v5568_v37 = vunpack.i.l.bf16 %v8623_v51 }
 0x3ad   : > { %10682 = vst [vmem:[#allocation76_spill] sm:$0xff] %v9103_v52  ;;  %v5539_v22 = vunpack.i.h.bf16 %v10685_v8  ;;  %v10691_v52 = vld [vmem:[#allocation25_spill] sm:$0xff]  ;;  %v10693_v51 = vld [vmem:[#allocation79_spill] sm:$0xff] }
 0x3ae   : > { %10683 = vst [vmem:[#allocation6_spill] sm:$0xff] %v9106_v31  ;;  %v5867_v59 = vpop.permute.xlu2 %5866  ;;  %v5604_v31 = vunpack.i.h.bf16 %v10691_v52 }
 0x3af   : > { %v5869_v45 = vunpack.i.h.bf16 %v5867_v59  ;;  %v5868_v29 = vunpack.i.l.bf16 %v5867_v59  ;;  %v5829_v59 = vunpack.i.h.bf16 %v5827_v34 }
 0x3b0   : > { %5956 = vrot.lane.b32.xlu1 %v10684_v60, %s6220_s26  ;;  %v5822_v17 = vpop.permute.xlu1 %5821 }
 0x3b1   : > { %v9112_v25 = vsel %vm3438_vm0, %v8935_v18, %v5869_v45  ;;  %v9116_v15 = vsel %vm3438_vm0, %v8938_v55, %v5868_v29  ;;  %v5817_v19 = vpop.permute.xlu0 %5816  ;;  %v5824_v28 = vunpack.i.h.bf16 %v5822_v17  ;;  %v5823_v47 = vunpack.i.l.bf16 %v5822_v17  ;;  %v10687_v55 = vld [vmem:[#allocation34_spill] sm:$0xff] }
 0x3b2   : > { %v5564_v18 = vunpack.i.h.bf16 %v10686_v2  ;;  %v5828_v45 = vunpack.i.l.bf16 %v5827_v34  ;;  %v5818_v4 = vunpack.i.l.bf16 %v5817_v19  ;;  %6021 = vrot.lane.b32.xlu0 %v10687_v55, %s6213_s27  ;;  %v10688_v29 = vld [vmem:[#allocation54_spill] sm:$0xff]  ;;  %v5819_v60 = vunpack.i.h.bf16 %v5817_v19 }
 0x3b3   : > { %5976 = vrot.lane.b32.xlu2 %v10688_v29, %s6220_s26  ;;  %v3338_v58 = vsel %vm3308_vm13, %v10689_v56, %v5824_v28  ;;  %v3337_v17 = vsel %vm3308_vm13, %v10690_v50, %v5823_v47  ;;  %v3310_v29 = vsel %vm3308_vm13, %v10692_v48, %v5539_v22  ;;  %v3311_v19 = vsel %vm3308_vm13, %v10693_v51, %v5543_v20  ;;  %v10697_v51 = vld [vmem:[#allocation93_spill] sm:$0xff] }
 0x3b4   : > { %v3401_v34 = vsel %vm3372_vm15, %v3368_v63, %v5818_v4  ;;  %v3369_v16 = vsel %vm3340_vm14, %v3337_v17, %v5828_v45  ;;  %v9137_v55 = vsel %vm3340_vm14, %v3338_v58, %v5829_v59  ;;  %v3342_v28 = vsel %vm3340_vm14, %v3310_v29, %v5564_v18  ;;  %v10694_v45 = vld [vmem:[#allocation43_spill] sm:$0xff] }
 0x3b5   : > { %v3402_v56 = vsel %vm3372_vm15, %v3369_v16, %v5819_v60  ;;  %v5669_v50 = vunpack.i.h.bf16 %v8830_v13  ;;  %v5668_v47 = vunpack.i.l.bf16 %v8830_v13  ;;  %v3343_v4 = vsel %vm3340_vm14, %v3311_v19, %v5568_v37  ;;  %v10695_v16 = vld [vmem:[#allocation35_spill] sm:$0xff] }
 0x3b6   : > { %v5603_v63 = vunpack.i.l.bf16 %v10691_v52  ;;  %v3376_v59 = vsel %vm3372_vm15, %v3343_v4, %v5604_v31  ;;  %v3339_v20 = vsel %vm3308_vm13, %v10695_v16, %v9044_v12  ;;  %v5538_v37 = vunpack.i.l.bf16 %v10685_v8  ;;  %v10696_v12 = vld [vmem:[#allocation63_spill] sm:$0xff]  ;;  %v10699_v16 = vld [vmem:[#allocation65_spill] sm:$0xff] }
 0x3b7   : > { %v3409_v52 = vsel %vm3405_vm3, %v3376_v59, %v5669_v50  ;;  %v5563_v17 = vunpack.i.l.bf16 %v10686_v2  ;;  %v5594_v19 = vunpack.i.h.bf16 %v10697_v51  ;;  %v6173_v50 = vld [vmem:[%s6313_s19 + $0x50] sm:$0xff]  ;;  %v10698_v59 = vld [vmem:[#allocation74_spill] sm:$0xff] }
 0x3b8   : > { %5971 = vrot.lane.b32.xlu1 %v10694_v45, %s6220_s26  ;;  %v5837_v48 = vpop.permute.xlu1 %5836  ;;  %v3375_v22 = vsel %vm3372_vm15, %v3342_v28, %v5603_v63  ;;  %v5593_v28 = vunpack.i.l.bf16 %v10697_v51  ;;  %v5664_v45 = vunpack.i.h.bf16 %v10698_v59  ;;  %v5663_v2 = vunpack.i.l.bf16 %v10698_v59 }
 0x3b9   : > { %v2709_v18 = vpop.permute.xlu0 %2708  ;;  %v5839_v13 = vunpack.i.h.bf16 %v5837_v48  ;;  %v5838_v60 = vunpack.i.l.bf16 %v5837_v48  ;;  %v3408_v31 = vsel %vm3405_vm3, %v3375_v22, %v5668_v47  ;;  %v6174_v47 = vld [vmem:[%s6313_s19 + $0x58] sm:$0xff] }
 0x3ba   : > { %v9160_v58 = vsel %vm3340_vm14, %v3339_v20, %v2709_v18  ;;  %6036 = vrot.lane.b32.xlu0 %v7978_v43, %s6221_s28  ;;  %v3864_v4 = vpack.c.bf16 %v6174_v47, %v6173_v50  ;;  %v3309_v43 = vsel %vm3308_vm13, 0.0, %v5538_v37 }
 0x3bb   : > { %5991 = vrot.lane.b32.xlu2 %v10696_v12, %s6220_s26  ;;  %v9168_v29 = vsel %vm3438_vm0, %v3409_v52, %v5839_v13  ;;  %v9171_v8 = vsel %vm3438_vm0, %v3408_v31, %v5838_v60  ;;  %v3341_v63 = vsel %vm3340_vm14, %v3309_v43, %v5563_v17  ;;  %v10700_v31 = vld [vmem:[#allocation23_spill] sm:$0xff]  ;;  %v10701_v12 = vld [vmem:[#allocation14_spill] sm:$0xff] }
 0x3bc   : > { %v3374_v48 = vsel %vm3372_vm15, %v3341_v63, %v5594_v19  ;;  %v3373_v22 = vsel %vm3372_vm15, %v3341_v63, %v5593_v28  ;;  %4851 = vmatmul.msk.bf16.gmra.mxu2 %vm1646_vm4, %v3864_v4  ;;  %v10702_v4 = vmov 0.0  }
 0x3bd   : > { %v3407_v17 = vsel %vm3405_vm3, %v3374_v48, %v5664_v45  ;;  %v3406_v51 = vsel %vm3405_vm3, %v3373_v22, %v5663_v2  ;;  %v10703_v45 = vld [vmem:[#allocation17_spill] sm:$0xff]  ;;  %v6175_v48 = vld [vmem:[%s6313_s19 + $0x60] sm:$0xff]  ;;  %v6176_v22 = vld [vmem:[%s6313_s19 + $0x68] sm:$0xff] }
 0x3c0   : > { %5986 = vrot.lane.b32.xlu1 %v10699_v16, %s6220_s26  ;;  %v5852_v20 = vpop.permute.xlu1 %5851  ;;  %v3865_v16 = vpack.c.bf16 %v6176_v22, %v6175_v48  ;;  %v6178_v48 = vld [vmem:[%s6313_s19 + $0x78] sm:$0xff] }
 0x3c1   : > { %v5832_v18 = vpop.permute.xlu0 %5831  ;;  %v5854_v13 = vunpack.i.h.bf16 %v5852_v20  ;;  %v5853_v60 = vunpack.i.l.bf16 %v5852_v20  ;;  %v10705_v20 = vld [vmem:[#allocation75_spill] sm:$0xff] }
 0x3c2   : > { %v5834_v37 = vunpack.i.h.bf16 %v5832_v18  ;;  %v5833_v52 = vunpack.i.l.bf16 %v5832_v18  ;;  %6051 = vrot.lane.b32.xlu0 %v10700_v31, %s6213_s27 }
 0x3c3   : > { %6001 = vrot.lane.b32.xlu2 %v10701_v12, %s6213_s27  ;;  %v9193_v19 = vsel %vm3405_vm3, %v3401_v34, %v5853_v60  ;;  %v9196_v28 = vsel %vm3405_vm3, %v3402_v56, %v5854_v13  ;;  %v10704_v34 = vld [vmem:[#allocation5_spill] sm:$0xff]  ;;  %v10708_v12 = vld [vmem:[#allocation18_spill] sm:$0xff] }
 0x3c4   : > { %v9199_v50 = vsel %vm3438_vm0, %v3407_v17, %v5834_v37  ;;  %v9202_v47 = vsel %vm3438_vm0, %v3406_v51, %v5833_v52  ;;  %v10706_v37 = vld [vmem:[#allocation55_spill] sm:$0xff]  ;;  %v10709_v17 = vld [vmem:[#allocation10_spill] sm:$0xff] }
 0x3c5   : > { %v6095_v51 = vpack.i.bf16 %v10709_v17, %v8958_v14  ;;  %v6177_v14 = vld [vmem:[%s6313_s19 + $0x70] sm:$0xff] }
 0x3c6   : > { %v3866_v22 = vpack.c.bf16 %v6178_v48, %v6177_v14  ;;  %v6180_v14 = vld [vmem:[%s6313_s19 + $0x88] sm:$0xff] }
 0x3c8   : > { %3089 = vrot.lane.b32.xlu1 %v10702_v4, %s6220_s26 }
 0x3c9   : > { %v5847_v43 = vpop.permute.xlu0 %5846 }
 0x3ca   : > { %v5849_v63 = vunpack.i.h.bf16 %v5847_v43  ;;  %v5848_v59 = vunpack.i.l.bf16 %v5847_v43  ;;  %6066 = vrot.lane.b32.xlu0 %v10703_v45, %s6213_s27 }
 0x3cb   : > { %6016 = vrot.lane.b32.xlu2 %v10704_v34, %s6213_s27 }
 0x3cc   : > { %v9212_v56 = vsel %vm3438_vm0, %v8778_v23, %v5849_v63  ;;  %v9216_v2 = vsel %vm3438_vm0, %v8781_v26, %v5848_v59  ;;  %4852 = vmatmul.msk.bf16.gmra.mxu2 %vm1646_vm4, %v3865_v16  ;;  %v10707_v23 = vld [vmem:[#allocation33_spill] sm:$0xff] }
 0x3d0   : > { %6011 = vrot.lane.b32.xlu1 %v10705_v20, %s6213_s27 }
 0x3d1   : > { %v5872_v18 = vpop.permute.xlu0 %5871 }
 0x3d2   : > { %v5874_v13 = vunpack.i.h.bf16 %v5872_v18  ;;  %v5873_v60 = vunpack.i.l.bf16 %v5872_v18  ;;  %6081 = vrot.lane.b32.xlu0 %v10706_v37, %s6213_s27 }
 0x3d3   : > { %6031 = vrot.lane.b32.xlu2 %v10707_v23, %s6213_s27 }
 0x3d4   : > { %v9229_v26 = vsel %vm3438_vm0, %v8858_v61, %v5874_v13  ;;  %v9233_v52 = vsel %vm3438_vm0, %v8861_v44, %v5873_v60  ;;  %v5882_v31 = vpop.permute.xlu2 %5881 }
 0x3d5   : > { %v5883_v17 = vunpack.i.l.bf16 %v5882_v31 }
 0x3d8   : > { %6026 = vrot.lane.b32.xlu1 %v10708_v12, %s6213_s27 }
 0x3d9   : > { %v5892_v4 = vpop.permute.xlu0 %5891 }
 0x3da   : > { %v5894_v43 = vunpack.i.h.bf16 %v5892_v4  ;;  %v5893_v63 = vunpack.i.l.bf16 %v5892_v4  ;;  %6096 = vrot.lane.b32.xlu0 %v6095_v51, %s6213_s27 }
 0x3db   : > { %6046 = vrot.lane.b32.xlu2 %v8053_v36, %s6221_s28 }
 0x3dc   : > { %v9244_v61 = vsel %vm3438_vm0, %v8897_v1, %v5894_v43  ;;  %v9248_v44 = vsel %vm3438_vm0, %v8903_v54, %v5893_v63  ;;  %v5887_v59 = vpop.permute.xlu2 %5886  ;;  %v10710_v1 = vld [vmem:[#allocation20_spill] sm:$0xff]  ;;  %4853 = vmatmul.msk.bf16.gmra.mxu2 %vm1646_vm4, %v3866_v22 }
 0x3dd   : > { %v5889_v45 = vunpack.i.h.bf16 %v5887_v59  ;;  %v5888_v34 = vunpack.i.l.bf16 %v5887_v59 }
 0x3df   : > { %v9254_v16 = vsel %vm3438_vm0, %v8980_v33, %v5889_v45  ;;  %v9258_v36 = vsel %vm3438_vm0, %v8984_v41, %v5888_v34 }
 0x3e0   : > { %6041 = vrot.lane.b32.xlu1 %v10710_v1, %s6213_s27  ;;  %v10712_v1 = vld [vmem:[#allocation89_spill] sm:$0xff] }
 0x3e1   : > { %v5907_v54 = vpop.permute.xlu0 %5906 }
 0x3e2   : > { %v5909_v20 = vunpack.i.h.bf16 %v5907_v54  ;;  %v5908_v18 = vunpack.i.l.bf16 %v5907_v54  ;;  %6111 = vrot.lane.b32.xlu0 %v10660_v24, %s6221_s28  ;;  %v9314_v54 = vld [vmem:[%s10119_s9] ss:$0 sm:$0xff] }
 0x3e3   : > { %6061 = vrot.lane.b32.xlu2 %v8127_v7, %s6221_s28  ;;  %v10711_v7 = vld [vmem:[#allocation26_spill] sm:$0xff] }
 0x3e4   : > { %v9269_v33 = vsel %vm3438_vm0, %v9069_v49, %v5909_v20  ;;  %v9273_v41 = vsel %vm3438_vm0, %v9036_v27, %v5908_v18  ;;  %v5902_v13 = vpop.permute.xlu2 %5901 }
 0x3e5   : > { %v5904_v60 = vunpack.i.h.bf16 %v5902_v13  ;;  %v5903_v37 = vunpack.i.l.bf16 %v5902_v13 }
 0x3e7   : > { %v9277_v23 = vsel %vm3438_vm0, %v9052_v42, %v5904_v60  ;;  %v9281_v24 = vsel %vm3438_vm0, %v9055_v57, %v5903_v37  ;;  %v5884_v42 = vunpack.i.h.bf16 %v5882_v31 }
 0x3e8   : > { %6056 = vrot.lane.b32.xlu1 %v10711_v7, %s6213_s27 }
 0x3ea   : > { %v5857_v49 = vpop.permute.xlu1 %5856  ;;  %6126 = vrot.lane.b32.xlu0 %v10666_v46, %s6221_s28  ;;  %v6179_v46 = vld [vmem:[%s6313_s19 + $0x80] sm:$0xff] }
 0x3eb   : > { %6076 = vrot.lane.b32.xlu2 %v10658_v40, %s6221_s28  ;;  %v5859_v27 = vunpack.i.h.bf16 %v5857_v49  ;;  %v5858_v12 = vunpack.i.l.bf16 %v5857_v49  ;;  %v3867_v48 = vpack.c.bf16 %v6180_v14, %v6179_v46 }
 0x3ec   : > { %v5922_v51 = vpop.permute.xlu0 %5921  ;;  %v5917_v4 = vpop.permute.xlu2 %5916 }
 0x3ed   : > { %v3404_v57 = vsel %vm3372_vm15, %v9160_v58, %v5859_v27  ;;  %v3403_v43 = vsel %vm3372_vm15, %v9137_v55, %v5858_v12  ;;  %v5924_v63 = vunpack.i.h.bf16 %v5922_v51  ;;  %v5923_v59 = vunpack.i.l.bf16 %v5922_v51  ;;  %4854 = vmatmul.msk.bf16.gmra.mxu2 %vm1646_vm4, %v3867_v48  ;;  %v9331_v27 = vld [vmem:[%s10120_s10] ss:$0 sm:$0xff] }
 0x3ee   : > { %v5919_v45 = vunpack.i.h.bf16 %v5917_v4  ;;  %v5918_v34 = vunpack.i.l.bf16 %v5917_v4  ;;  %v3436_v40 = vsel %vm3405_vm3, %v3403_v43, %v5883_v17  ;;  %v3437_v22 = vsel %vm3405_vm3, %v3404_v57, %v5884_v42 }
 0x3ef   : > { %v9298_v31 = vsel %vm3438_vm0, %v3436_v40, %v5923_v59  ;;  %v9317_v20 = vsel %vm3438_vm0, %v3437_v22, %v5924_v63  ;;  %v3938_v60 = vpop.f32.mrf.mxu2  ;;  %v6181_v40 = vld [vmem:[%s6313_s19 + $0x90] sm:$0xff]  ;;  %v6182_v22 = vld [vmem:[%s6313_s19 + $0x98] sm:$0xff] }
 0x3f0   : > { %v9302_v58 = vsel %vm3438_vm0, %v9196_v28, %v5919_v45  ;;  %v9306_v55 = vsel %vm3438_vm0, %v9193_v19, %v5918_v34  ;;  %6071 = vrot.lane.b32.xlu1 %v10712_v1, %s6213_s27  ;;  %v10713_v19 = vpack.i.bf16 %v8955_v0, %v8737_v11  ;;  %v4021_v49 = vmul.f32 %v9314_v54, %v3938_v60 }
 0x3f1   : > { %v3868_v1 = vpack.c.bf16 %v6182_v22, %v6181_v40 }
 0x3f2   : > { %v5862_v18 = vpop.permute.xlu1 %5861  ;;  %6141 = vrot.lane.b32.xlu0 %v10669_v53, %s6221_s28  ;;  %v4056_v51 = vadd.f32 %v9331_v27, %v4021_v49 }
 0x3f3   : > { %6091 = vrot.lane.b32.xlu2 %v10713_v19, %s6213_s27  ;;  %v5864_v28 = vunpack.i.h.bf16 %v5862_v18  ;;  %v5863_v13 = vunpack.i.l.bf16 %v5862_v18  ;;  %s4778_s27 = sshll.u32 %s6304_s30, 5  ;;  %s4781_s30 = sshll.u32 %s10725_s21, 3 }
 0x3f4   : > { %v5937_v37 = vpop.permute.xlu0 %5936  ;;  %v9325_v7 = vpop.permute.xlu2 %5931  ;;  %v4088_v63 = vmax.f32 %v4056_v51, 0.0  ;;  %p480_p4 = scmp.lt.s32.totalorder %s4778_s27, 63  ;;  %s10089_s23 = scalar_lea.vmem %s10124_s14, %s4781_s30 }
 0x3f5   : > { %v3448_v53 = vsel %vm3438_vm0, %v8912_v9, %v5864_v28  ;;  %v3447_v11 = vsel %vm3438_vm0, %v8915_v5, %v5863_v13  ;;  %v5939_v0 = vunpack.i.h.bf16 %v5937_v37  ;;  %v5938_v12 = vunpack.i.l.bf16 %v5937_v37 }
 0x3f6   : > { %s10723_s27 = smov (!%p480_p4, %s4778_s27), 63 }
 0x3f7   : > { %v9339_v42 = vsel %vm3471_vm1, %v9090_v32, %v5939_v0  ;;  %v9343_v17 = vsel %vm3471_vm1, %v9094_v30, %v5938_v12  ;;  %v3940_v57 = vpop.f32.mrf.mxu2  ;;  %s4779_s20 = sshll.u32 %s10723_s27, 3 }
 0x3f8   : > { %6086 = vrot.lane.b32.xlu1 %v8248_v21, %s6221_s28  ;;  %v4022_v30 = vmul.f32 %v9314_v54, %v3940_v57  ;;  %s9485_s22 = scalar_lea.vmem %s10111_s1, %s4779_s20 }
 0x3fa   : > { %v5877_v4 = vpop.permute.xlu1 %5876  ;;  %v4057_v48 = vadd.f32 %v9331_v27, %v4022_v30 }
 0x3fb   : > { %6106 = vrot.lane.b32.xlu2 %v10663_v6, %s6221_s28  ;;  %v5879_v9 = vunpack.i.h.bf16 %v5877_v4  ;;  %v5878_v5 = vunpack.i.l.bf16 %v5877_v4  ;;  %v4120_v6 = vld [vmem:[%s10121_s11] sm:$0xf] }
 0x3fc   : > { %v5952_v32 = vpop.permute.xlu0 %5951  ;;  %v5947_v43 = vpop.permute.xlu2 %5946  ;;  %v4188_v19 = vsel %vm3661_vm5, %v4120_v6, 0  ;;  %v4089_v37 = vmax.f32 %v4057_v48, 0.0 }
 0x3fd   : > { %v3454_v59 = vsel %vm3438_vm0, %v9006_v10, %v5879_v9  ;;  %v3453_v21 = vsel %vm3438_vm0, %v9010_v3, %v5878_v5  ;;  %v5954_v45 = vunpack.i.h.bf16 %v5952_v32  ;;  %v5953_v34 = vunpack.i.l.bf16 %v5952_v32  ;;  %v2201_v10 = vld [vmem:[%s10115_s5 + $0x20] sm:$0xf]  ;;  %4855 = vmatmul.msk.bf16.gmra.mxu2 %vm1646_vm4, %v3868_v1  ;;  %4197 = vmatpush.bf16.msra.mxu3 %v4188_v19  ;;  %v4888_v32 = vld [vmem:[%s10115_s5 + $0x18] sm:$0xff] }
 0x3fe   : > { %v5949_v46 = vunpack.i.h.bf16 %v5947_v43  ;;  %v5948_v14 = vunpack.i.l.bf16 %v5947_v43  ;;  %v3602_v28 = vunpack.c.l.b16 %v2201_v10  ;;  %v10716_v10 = vld [vmem:[#allocation6_spill] sm:$0xff] }
 0x3ff   : > { %v9366_v3 = vsel %vm3471_vm1, %v9112_v25, %v5954_v45  ;;  %v9370_v18 = vsel %vm3471_vm1, %v9116_v15, %v5953_v34  ;;  %v4123_v15 = vpack.c.bf16 %v4089_v37, %v4088_v63  ;;  %v10714_v34 = vld [vmem:[#allocation27_spill] sm:$0xff] }
 0x400   : > { %v9374_v13 = vsel %vm3471_vm1, %v3448_v53, %v5949_v46  ;;  %v9377_v60 = vsel %vm3471_vm1, %v3447_v11, %v5948_v14  ;;  %6101 = vrot.lane.b32.xlu1 %v8292_v62, %s6221_s28  ;;  %v3607_v25 = vpack.c.b16 %v3602_v28, %v3602_v28  ;;  %v3943_v53 = vpop.f32.mrf.mxu2  ;;  %v10717_v28 = vld [vmem:[#allocation76_spill] sm:$0xff] }
 0x401   : > { %v4023_v9 = vmul.f32 %v9314_v54, %v3943_v53  ;;  %4862 = vmatmul.msk.bf16.vlgmr.msra.gmra.mxu3 %vm3308_vm13, %v4123_v15  ;;  %v4886_v15 = vld [vmem:[%s10115_s5 + $0x8] sm:$0xff] }
 0x402   : > { %v5897_v49 = vpop.permute.xlu1 %5896  ;;  %v3663_v51 = vsel %vm3661_vm5, %v3607_v25, 0 }
 0x403   : > { %6121 = vrot.lane.b32.xlu2 %v10667_v38, %s6221_s28  ;;  %v5899_v0 = vunpack.i.h.bf16 %v5897_v49  ;;  %v5898_v12 = vunpack.i.l.bf16 %v5897_v49  ;;  %3668 = vmatpush.bf16.msra.mxu1 %v3663_v51  ;;  %v4058_v6 = vadd.f32 %v9331_v27, %v4023_v9  ;;  %v6183_v51 = vld [vmem:[%s6313_s19 + $0xa0] sm:$0xff] }
 0x404   : > { %v5967_v11 = vpop.permute.xlu0 %5966  ;;  %v5962_v4 = vpop.permute.xlu2 %5961 }
 0x405   : > { %v3460_v62 = vsel %vm3438_vm0, %v9029_v35, %v5899_v0  ;;  %v3459_v5 = vsel %vm3438_vm0, %v9033_v39, %v5898_v12  ;;  %v5969_v38 = vunpack.i.h.bf16 %v5967_v11  ;;  %v5968_v57 = vunpack.i.l.bf16 %v5967_v11  ;;  %v6184_v11 = vld [vmem:[%s6313_s19 + $0xa8] sm:$0xff] }
 0x406   : > { %v5964_v43 = vunpack.i.h.bf16 %v5962_v4  ;;  %v5963_v63 = vunpack.i.l.bf16 %v5962_v4  ;;  %v4090_v22 = vmax.f32 %v4058_v6, 0.0  ;;  %v3869_v4 = vpack.c.bf16 %v6184_v11, %v6183_v51 }
 0x407   : > { %v9396_v30 = vsel %vm3471_vm1, %v9258_v36, %v5968_v57  ;;  %v9400_v45 = vsel %vm3471_vm1, %v9254_v16, %v5969_v38  ;;  %3669 = vmatpush.bf16.msra.mxu1 %v4888_v32  ;;  %v4887_v36 = vld [vmem:[%s10115_s5 + $0x10] sm:$0xff]  ;;  %v10715_v16 = vld [vmem:[#allocation69_spill] sm:$0xff] }
 0x408   : > { %v9403_v35 = vsel %vm3471_vm1, %v3454_v59, %v5964_v43  ;;  %v9406_v39 = vsel %vm3471_vm1, %v3453_v21, %v5963_v63  ;;  %6116 = vrot.lane.b32.xlu1 %v10714_v34, %s6221_s28  ;;  %v3945_v21 = vpop.f32.mrf.mxu2  ;;  %v10718_v43 = vld [vmem:[#allocation42_spill] sm:$0xff] }
 0x409   : > { %v4024_v1 = vmul.f32 %v9314_v54, %v3945_v21 }
 0x40a   : > { %v5912_v46 = vpop.permute.xlu1 %5911 }
 0x40b   : > { %6136 = vrot.lane.b32.xlu2 %v10715_v16, %s6221_s28  ;;  %v5914_v14 = vunpack.i.h.bf16 %v5912_v46  ;;  %v5913_v59 = vunpack.i.l.bf16 %v5912_v46  ;;  %3670 = vmatpush.bf16.msra.mxu1 %v4887_v36  ;;  %v4059_v53 = vadd.f32 %v9331_v27, %v4024_v1 }
 0x40c   : > { %v5982_v48 = vpop.permute.xlu0 %5981 }
 0x40d   : > { %v5977_v40 = vpop.permute.xlu2 %5976  ;;  %v3466_v19 = vsel %vm3438_vm0, %v10716_v10, %v5914_v14  ;;  %v3465_v37 = vsel %vm3438_vm0, %v10717_v28, %v5913_v59  ;;  %v5984_v25 = vunpack.i.h.bf16 %v5982_v48  ;;  %v5983_v49 = vunpack.i.l.bf16 %v5982_v48  ;;  %4856 = vmatmul.msk.bf16.gmra.mxu2 %vm1646_vm4, %v3869_v4  ;;  %v10720_v10 = vld [vmem:[#allocation88_spill] sm:$0xff] }
 0x40e   : > { %v5979_v0 = vunpack.i.h.bf16 %v5977_v40  ;;  %v5978_v12 = vunpack.i.l.bf16 %v5977_v40  ;;  %v4091_v63 = vmax.f32 %v4059_v53, 0.0 }
 0x40f   : > { %v9429_v9 = vsel %vm3471_vm1, %v9281_v24, %v5983_v49  ;;  %v9433_v38 = vsel %vm3471_vm1, %v9277_v23, %v5984_v25  ;;  %3671 = vmatpush.bf16.msra.mxu1 %v4886_v15  ;;  %v4885_v24 = vld [vmem:[%s10115_s5] sm:$0xff]  ;;  %v10719_v23 = vld [vmem:[#allocation60_spill] sm:$0xff] }
 0x410   : > { %v9436_v57 = vsel %vm3471_vm1, %v3460_v62, %v5979_v0  ;;  %v9439_v32 = vsel %vm3471_vm1, %v3459_v5, %v5978_v12  ;;  %6131 = vrot.lane.b32.xlu1 %v10718_v43, %s6221_s28  ;;  %v4124_v62 = vpack.c.bf16 %v4091_v63, %v4090_v22  ;;  %v3948_v6 = vpop.f32.mrf.mxu2  ;;  %v6186_v0 = vld [vmem:[%s6313_s19 + $0xb8] sm:$0xff] }
 0x411   : > { %v4025_v21 = vmul.f32 %v9314_v54, %v3948_v6 }
 0x412   : > { %v9447_v34 = vpop.permute.xlu1 %5926  ;;  %4863 = vmatmul.msk.bf16.gmra.mxu3 %vm3308_vm13, %v4124_v62 }
 0x413   : > { %3275 = vrot.lane.b32.xlu2 %v10719_v23, %s6221_s28  ;;  %3672 = vmatpush.bf16.msra.mxu1 %v4885_v24  ;;  %v4060_v25 = vadd.f32 %v9331_v27, %v4025_v21  ;;  %v5928_v23 = vunpack.i.l.bf16 %v9447_v34  ;;  %v5929_v21 = vunpack.i.h.bf16 %v9447_v34 }
 0x414   : > { %v5997_v5 = vpop.permute.xlu0 %5996 }
 0x415   : > { %v5992_v36 = vpop.permute.xlu2 %5991  ;;  %v5999_v46 = vunpack.i.h.bf16 %v5997_v5  ;;  %v5998_v16 = vunpack.i.l.bf16 %v5997_v5  ;;  %v3472_v34 = vsel %vm3471_vm1, %v9202_v47, %v5928_v23 }
 0x416   : > { %v5994_v14 = vunpack.i.h.bf16 %v5992_v36  ;;  %v5993_v59 = vunpack.i.l.bf16 %v5992_v36 }
 0x417   : > { %v9456_v48 = vsel %vm3471_vm1, %v9306_v55, %v5998_v16  ;;  %v9460_v40 = vsel %vm3471_vm1, %v9302_v58, %v5999_v46 }
 0x418   : > { %v9463_v22 = vsel %vm3471_vm1, %v3466_v19, %v5994_v14  ;;  %v9466_v1 = vsel %vm3471_vm1, %v3465_v37, %v5993_v59  ;;  %6146 = vrot.lane.b32.xlu1 %v10720_v10, %s6221_s28  ;;  %v3950_v55 = vpop.f32.mrf.mxu2  ;;  %v6185_v19 = vld [vmem:[%s6313_s19 + $0xb0] sm:$0xff]  ;;  %v4092_v37 = vmax.f32 %v4060_v25, 0.0  ;;  %v4381_v59 = vld [vmem:[%s9485_s22] sm:$0xff] }
 0x419   : > { %v4026_v15 = vmul.f32 %v9314_v54, %v3950_v55  ;;  %v3870_v12 = vpack.c.bf16 %v6186_v0, %v6185_v19  ;;  %v6222_v55 = vmov 0  }
 0x41a   : > { %v9470_v28 = vpop.permute.xlu1 %5941  ;;  %6150 = vset.pattern.permute.xlu0 %v6222_v55  ;;  %6151 = vset.pattern.permute.xlu1 %v6222_v55 }
 0x41b   : > { %v4061_v53 = vadd.f32 %v9331_v27, %v4026_v15  ;;  %4415 = vperm.xlu0 %6150, %v4381_v59   ;;  %6152 = vset.pattern.permute.xlu2 %v6222_v55  ;;  %v10721_v15 = vld [vmem:[#allocation39_spill] sm:$0xff]  ;;  %v6187_v59 = vld [vmem:[%s6313_s19 + $0xc0] sm:$0xff] }
 0x41c   : > { %v9473_v49 = vpop.permute.xlu0 %6006  ;;  %v5534_v19 = vunpack.i.h.bf16 %v10721_v15 }
 0x41d   : > { %v9475_v58 = vpop.permute.xlu2 %6001  ;;  %v4093_v51 = vmax.f32 %v4061_v53, 0.0  ;;  %4857 = vmatmul.msk.bf16.gmra.mxu2 %vm1646_vm4, %v3870_v12 }
 0x41f   : > { %v4125_v4 = vpack.c.bf16 %v4093_v51, %v4092_v37 }
 0x420   : > { %v3953_v24 = vpop.f32.mrf.mxu2 }
 0x421   : > { %v4027_v5 = vmul.f32 %v9314_v54, %v3953_v24 }
 0x422   : > { %v5957_v11 = vpop.permute.xlu1 %5956  ;;  %4864 = vmatmul.msk.bf16.gmra.mxu3 %vm3308_vm13, %v4125_v4  ;;  %v3504_v4 = vsel %vm1875_vm11, %v3472_v34, %v5534_v19  ;;  %v5934_v19 = vunpack.i.h.bf16 %v9325_v7 }
 0x423   : > { %v5959_v43 = vunpack.i.h.bf16 %v5957_v11  ;;  %v5958_v63 = vunpack.i.l.bf16 %v5957_v11 }
 0x424   : > { %v6022_v62 = vpop.permute.xlu0 %6021 }
 0x425   : > { %v9488_v6 = vpop.permute.xlu2 %6016  ;;  %v3485_v36 = vsel %vm3471_vm1, %v9229_v26, %v5959_v43  ;;  %v9496_v46 = vsel %vm3471_vm1, %v9233_v52, %v5958_v63  ;;  %v6024_v16 = vunpack.i.h.bf16 %v6022_v62  ;;  %v6023_v14 = vunpack.i.l.bf16 %v6022_v62  ;;  %v4382_v62 = vld [vmem:[%s9485_s22 + $0x8] sm:$0xff] }
 0x426   : > { %v6003_v26 = vunpack.i.l.bf16 %v9475_v58  ;;  %v4062_v52 = vadd.f32 %v9331_v27, %v4027_v5  ;;  %4420 = vperm.xlu1 %6151, %v4382_v62   ;;  %v4386_v62 = vld [vmem:[%s9485_s22 + $0x28] sm:$0xff] }
 0x427   : > { %v9502_v10 = vsel %vm1875_vm11, %v9374_v13, %v6023_v14  ;;  %v9506_v25 = vsel %vm1875_vm11, %v9370_v18, %v6024_v16  ;;  %v3473_v18 = vsel %vm3471_vm1, %v9199_v50, %v5929_v21  ;;  %v6188_v21 = vld [vmem:[%s6313_s19 + $0xc8] sm:$0xff]  ;;  %4440 = vperm.xlu0 %6150, %v4386_v62  }
 0x428   : > { %v3955_v37 = vpop.f32.mrf.mxu2  ;;  %v3505_v53 = vsel %vm1875_vm11, %v3473_v18, %v6003_v26  ;;  %v4094_v47 = vmax.f32 %v4062_v52, 0.0  ;;  %v3871_v55 = vpack.c.bf16 %v6188_v21, %v6187_v59 }
 0x429   : > { %v4028_v43 = vmul.f32 %v9314_v54, %v3955_v37 }
 0x42a   : > { %v5972_v13 = vpop.permute.xlu1 %5971 }
 0x42b   : > { %v5974_v0 = vunpack.i.h.bf16 %v5972_v13  ;;  %v5973_v12 = vunpack.i.l.bf16 %v5972_v13  ;;  %v4063_v14 = vadd.f32 %v9331_v27, %v4028_v43  ;;  %v5933_v13 = vunpack.i.l.bf16 %v9325_v7 }
 0x42c   : > { %v6037_v51 = vpop.permute.xlu0 %6036  ;;  %v3475_v7 = vsel %vm3471_vm1, %v9168_v29, %v5934_v19 }
 0x42d   : > { %v6032_v11 = vpop.permute.xlu2 %6031  ;;  %v9520_v63 = vsel %vm3471_vm1, %v9244_v61, %v5974_v0  ;;  %v9524_v50 = vsel %vm3471_vm1, %v9248_v44, %v5973_v12  ;;  %v6039_v24 = vunpack.i.h.bf16 %v6037_v51  ;;  %v6038_v23 = vunpack.i.l.bf16 %v6037_v51  ;;  %4858 = vmatmul.msk.bf16.gmra.mxu2 %vm1646_vm4, %v3871_v55 }
 0x42e   : > { %v6034_v5 = vunpack.i.h.bf16 %v6032_v11  ;;  %v6033_v16 = vunpack.i.l.bf16 %v6032_v11  ;;  %v4095_v15 = vmax.f32 %v4063_v14, 0.0  ;;  %v6004_v12 = vunpack.i.h.bf16 %v9475_v58 }
 0x42f   : > { %v3537_v26 = vsel %vm3536_vm2, %v3504_v4, %v6038_v23  ;;  %v3538_v61 = vsel %vm3536_vm2, %v3505_v53, %v6039_v24  ;;  %v3474_v58 = vsel %vm3471_vm1, %v9171_v8, %v5933_v13  ;;  %v4384_v13 = vld [vmem:[%s9485_s22 + $0x18] sm:$0xff] }
 0x430   : > { %v9533_v52 = vsel %vm1875_vm11, %v3485_v36, %v6033_v16  ;;  %v9537_v44 = vsel %vm1875_vm11, %v9406_v39, %v6034_v5  ;;  %v3569_v34 = vpack.c.bf16 %v3538_v61, %v3537_v26  ;;  %v4126_v0 = vpack.c.bf16 %v4095_v15, %v4094_v47  ;;  %v3958_v53 = vpop.f32.mrf.mxu2  ;;  %4430 = vperm.xlu1 %6151, %v4384_v13  }
 0x431   : > { %v6008_v36 = vunpack.i.l.bf16 %v9473_v49  ;;  %v4029_v23 = vmul.f32 %v9314_v54, %v3958_v53  ;;  %v3506_v29 = vsel %vm1875_vm11, %v3474_v58, %v6004_v12  ;;  %v6190_v12 = vld [vmem:[%s6313_s19 + $0xd8] sm:$0xff]  ;;  %v6018_v58 = vunpack.i.l.bf16 %v9488_v6 }
 0x432   : > { %v5987_v18 = vpop.permute.xlu1 %5986  ;;  %4830 = vmatmul.msk.bf16.vlgmr.msra.gmra.mxu1 %vm3612_vm7, %v3569_v34  ;;  %4865 = vmatmul.msk.bf16.gmra.mxu3 %vm3308_vm13, %v4126_v0 }
 0x433   : > { %v5989_v37 = vunpack.i.h.bf16 %v5987_v18  ;;  %v5988_v39 = vunpack.i.l.bf16 %v5987_v18  ;;  %v3507_v5 = vsel %vm1875_vm11, %v3475_v7, %v6008_v36  ;;  %v4064_v8 = vadd.f32 %v9331_v27, %v4029_v23  ;;  %v6189_v36 = vld [vmem:[%s6313_s19 + $0xd0] sm:$0xff] }
 0x434   : > { %v9545_v51 = vpop.permute.xlu0 %6051  ;;  %v6009_v7 = vunpack.i.h.bf16 %v9473_v49 }
 0x435   : > { %v6047_v11 = vpop.permute.xlu2 %6046  ;;  %v9552_v4 = vsel %vm3471_vm1, %v9269_v33, %v5989_v37  ;;  %v9556_v47 = vsel %vm3471_vm1, %v9273_v41, %v5988_v39  ;;  %v4096_v18 = vmax.f32 %v4064_v8, 0.0  ;;  %v3872_v37 = vpack.c.bf16 %v6190_v12, %v6189_v36 }
 0x436   : > { %v6049_v43 = vunpack.i.h.bf16 %v6047_v11  ;;  %v6048_v24 = vunpack.i.l.bf16 %v6047_v11  ;;  %v5944_v39 = vunpack.i.h.bf16 %v9470_v28  ;;  %v5943_v11 = vunpack.i.l.bf16 %v9470_v28 }
 0x438   : > { %v3539_v33 = vsel %vm3536_vm2, %v3506_v29, %v6048_v24  ;;  %v3540_v41 = vsel %vm3536_vm2, %v3507_v5, %v6049_v43  ;;  %v3960_v55 = vpop.f32.mrf.mxu2  ;;  %v3478_v49 = vsel %vm3471_vm1, %v9216_v2, %v5943_v11  ;;  %v3508_v29 = vsel %vm1875_vm11, %v9343_v17, %v6009_v7  ;;  %v4383_v2 = vld [vmem:[%s9485_s22 + $0x10] sm:$0xff]  ;;  %v4385_v7 = vld [vmem:[%s9485_s22 + $0x20] sm:$0xff] }
 0x439   : > { %v3570_v16 = vpack.c.bf16 %v3540_v41, %v3539_v33  ;;  %v4030_v34 = vmul.f32 %v9314_v54, %v3960_v55  ;;  %4425 = vperm.xlu2 %6152, %v4383_v2  }
 0x43a   : > { %v3090_v14 = vpop.permute.xlu1 %3089 }
 0x43b   : > { %v9569_v59 = vsel %vm3471_vm1, %v9298_v31, %v3090_v14  ;;  %v9573_v21 = vsel %vm3471_vm1, %v9317_v20, %v3090_v14  ;;  %v4065_v0 = vadd.f32 %v9331_v27, %v4030_v34  ;;  %v4389_v31 = vld [vmem:[%s9485_s22 + $0x40] sm:$0xff]  ;;  %v4387_v34 = vld [vmem:[%s9485_s22 + $0x30] sm:$0xff] }
 0x43c   : > { %v6067_v26 = vpop.permute.xlu0 %6066  ;;  %4455 = vperm.xlu0 %6150, %v4389_v31   ;;  %4445 = vperm.xlu1 %6151, %v4387_v34   ;;  %v4392_v31 = vld [vmem:[%s9485_s22 + $0x58] sm:$0xff] }
 0x43d   : > { %v6062_v61 = vpop.permute.xlu2 %6061  ;;  %v6069_v15 = vunpack.i.h.bf16 %v6067_v26  ;;  %v6068_v19 = vunpack.i.l.bf16 %v6067_v26  ;;  %v4097_v43 = vmax.f32 %v4065_v0, 0.0  ;;  %4859 = vmatmul.msk.bf16.gmra.mxu2 %vm1646_vm4, %v3872_v37 }
 0x43e   : > { %v6063_v24 = vunpack.i.l.bf16 %v6062_v61  ;;  %v6064_v41 = vunpack.i.h.bf16 %v6062_v61 }
 0x43f   : > { %v9584_v20 = vsel %vm1875_vm11, %v9436_v57, %v6068_v19  ;;  %v9588_v53 = vsel %vm1875_vm11, %v9429_v9, %v6069_v15  ;;  %v4127_v57 = vpack.c.bf16 %v4097_v43, %v4096_v18  ;;  %v3479_v9 = vsel %vm3471_vm1, %v9212_v56, %v5944_v39 }
 0x440   : > { %v3963_v28 = vpop.f32.mrf.mxu2  ;;  %v3511_v33 = vsel %vm1875_vm11, %v3479_v9, %v6018_v58  ;;  %v3541_v26 = vsel %vm3536_vm2, %v3508_v29, %v6063_v24 }
 0x441   : > { %v4031_v61 = vmul.f32 %v9314_v54, %v3963_v28  ;;  %4435 = vperm.xlu2 %6152, %v4385_v7  }
 0x442   : > { %v6012_v23 = vpop.permute.xlu1 %6011  ;;  %4831 = vmatmul.msk.bf16.gmra.mxu1 %vm3612_vm7, %v3570_v16  ;;  %4866 = vmatmul.msk.bf16.gmra.mxu3 %vm3308_vm13, %v4127_v57  ;;  %v6192_v57 = vld [vmem:[%s6313_s19 + $0xe8] sm:$0xff] }
 0x443   : > { %v6014_v62 = vunpack.i.h.bf16 %v6012_v23  ;;  %v6013_v5 = vunpack.i.l.bf16 %v6012_v23  ;;  %v6191_v23 = vld [vmem:[%s6313_s19 + $0xe0] sm:$0xff] }
 0x444   : > { %v6082_v14 = vpop.permute.xlu0 %6081  ;;  %4470 = vperm.xlu0 %6150, %v4392_v31   ;;  %v3873_v9 = vpack.c.bf16 %v6192_v57, %v6191_v23 }
 0x445   : > { %v6077_v16 = vpop.permute.xlu2 %6076  ;;  %v3509_v56 = vsel %vm1875_vm11, %v9339_v42, %v6013_v5  ;;  %v6084_v8 = vunpack.i.h.bf16 %v6082_v14  ;;  %v6083_v55 = vunpack.i.l.bf16 %v6082_v14  ;;  %v3510_v13 = vsel %vm1875_vm11, %v3478_v49, %v6014_v62 }
 0x446   : > { %v6079_v15 = vunpack.i.h.bf16 %v6077_v16  ;;  %v6078_v19 = vunpack.i.l.bf16 %v6077_v16  ;;  %v3542_v17 = vsel %vm3536_vm2, %v3509_v56, %v6064_v41  ;;  %v4395_v56 = vld [vmem:[%s9485_s22 + $0x70] sm:$0xff] }
 0x447   : > { %v9613_v42 = vsel %vm1875_vm11, %v9552_v4, %v6083_v55  ;;  %v9617_v18 = vsel %vm1875_vm11, %v9466_v1, %v6084_v8  ;;  %v3571_v0 = vpack.c.bf16 %v3542_v17, %v3541_v26  ;;  %v4066_v4 = vadd.f32 %v9331_v27, %v4031_v61  ;;  %v4390_v1 = vld [vmem:[%s9485_s22 + $0x48] sm:$0xff] }
 0x448   : > { %v9620_v36 = vsel %vm3536_vm2, %v3510_v13, %v6078_v19  ;;  %v9623_v12 = vsel %vm3536_vm2, %v3511_v33, %v6079_v15  ;;  %v3965_v11 = vpop.f32.mrf.mxu2  ;;  %4460 = vperm.xlu1 %6151, %v4390_v1   ;;  %v4388_v19 = vld [vmem:[%s9485_s22 + $0x38] sm:$0xff] }
 0x449   : > { %v3572_v37 = vpack.c.bf16 %v9623_v12, %v9620_v36  ;;  %v4032_v24 = vmul.f32 %v9314_v54, %v3965_v11  ;;  %v4098_v29 = vmax.f32 %v4066_v4, 0.0  ;;  %4450 = vperm.xlu2 %6152, %v4388_v19  }
 0x44a   : > { %v9628_v39 = vpop.permute.xlu1 %6026 }
 0x44b   : > { %v4067_v33 = vadd.f32 %v9331_v27, %v4032_v24 }
 0x44c   : > { %v6097_v58 = vpop.permute.xlu0 %6096  ;;  %4485 = vperm.xlu0 %6150, %v4395_v56  }
 0x44d   : > { %v6092_v43 = vpop.permute.xlu2 %6091  ;;  %v6099_v62 = vunpack.i.h.bf16 %v6097_v58  ;;  %v6098_v5 = vunpack.i.l.bf16 %v6097_v58  ;;  %4860 = vmatmul.msk.bf16.gmra.mxu2 %vm1646_vm4, %v3873_v9  ;;  %v4398_v58 = vld [vmem:[%s9485_s22 + $0x88] sm:$0xff]  ;;  %v6054_v9 = vunpack.i.h.bf16 %v9545_v51 }
 0x44e   : > { %v6094_v28 = vunpack.i.h.bf16 %v6092_v43  ;;  %v6093_v49 = vunpack.i.l.bf16 %v6092_v43 }
 0x44f   : > { %v9639_v41 = vsel %vm1875_vm11, %v9460_v40, %v6098_v5  ;;  %v9643_v14 = vsel %vm1875_vm11, %v9569_v59, %v6099_v62  ;;  %v9647_v16 = vsel %vm1875_vm11, %v9573_v21, %v6099_v62  ;;  %v4099_v40 = vmax.f32 %v4067_v33, 0.0 }
 0x450   : > { %v9652_v8 = vsel %vm1875_vm11, %v9463_v22, %v6093_v49  ;;  %v9656_v55 = vsel %vm1875_vm11, %v9456_v48, %v6094_v28  ;;  %v6029_v21 = vunpack.i.h.bf16 %v9628_v39  ;;  %v3968_v15 = vpop.f32.mrf.mxu2  ;;  %v4393_v22 = vld [vmem:[%s9485_s22 + $0x60] sm:$0xff]  ;;  %v4396_v49 = vld [vmem:[%s9485_s22 + $0x78] sm:$0xff] }
 0x451   : > { %v4128_v59 = vpack.c.bf16 %v4099_v40, %v4098_v29  ;;  %v4033_v1 = vmul.f32 %v9314_v54, %v3968_v15  ;;  %4475 = vperm.xlu1 %6151, %v4393_v22   ;;  %v4391_v29 = vld [vmem:[%s9485_s22 + $0x50] sm:$0xff] }
 0x452   : > { %v6042_v26 = vpop.permute.xlu1 %6041  ;;  %4832 = vmatmul.msk.bf16.gmra.mxu1 %vm3612_vm7, %v3571_v0  ;;  %v3516_v7 = vsel %vm1875_vm11, %v9496_v46, %v6029_v21  ;;  %v6193_v40 = vld [vmem:[%s6313_s19 + $0xf0] sm:$0xff]  ;;  %4465 = vperm.xlu2 %6152, %v4391_v29  }
 0x453   : > { %v6044_v34 = vunpack.i.h.bf16 %v6042_v26  ;;  %v6043_v2 = vunpack.i.l.bf16 %v6042_v26  ;;  %4867 = vmatmul.msk.bf16.gmra.mxu3 %vm3308_vm13, %v4128_v59  ;;  %v4068_v57 = vadd.f32 %v9331_v27, %v4033_v1  ;;  %v6194_v26 = vld [vmem:[%s6313_s19 + $0xf8] sm:$0xff] }
 0x454   : > { %v6112_v17 = vpop.permute.xlu0 %6111  ;;  %4500 = vperm.xlu0 %6150, %v4398_v58   ;;  %v3874_v59 = vpack.c.bf16 %v6194_v26, %v6193_v40  ;;  %v6019_v26 = vunpack.i.h.bf16 %v9488_v6 }
 0x455   : > { %v6107_v61 = vpop.permute.xlu2 %6106  ;;  %v3519_v48 = vsel %vm1875_vm11, %v9403_v35, %v6043_v2  ;;  %v9668_v13 = vsel %vm1875_vm11, %v9396_v30, %v6044_v34  ;;  %v6114_v0 = vunpack.i.h.bf16 %v6112_v17  ;;  %v6113_v31 = vunpack.i.l.bf16 %v6112_v17 }
 0x456   : > { %v6109_v4 = vunpack.i.h.bf16 %v6107_v61  ;;  %v6108_v11 = vunpack.i.l.bf16 %v6107_v61  ;;  %v4100_v17 = vmax.f32 %v4068_v57, 0.0 }
 0x457   : > { %v9676_v35 = vsel %vm3536_vm2, %v9537_v44, %v6113_v31  ;;  %v9679_v30 = vsel %vm3536_vm2, %v3519_v48, %v6114_v0  ;;  %v3522_v48 = vsel %vm1875_vm11, %v9524_v50, %v6054_v9  ;;  %v4401_v0 = vld [vmem:[%s9485_s22 + $0xa0] sm:$0xff]  ;;  %v4399_v9 = vld [vmem:[%s9485_s22 + $0x90] sm:$0xff] }
 0x458   : > { %v9682_v43 = vsel %vm3536_vm2, %v3516_v7, %v6108_v11  ;;  %v9686_v24 = vsel %vm3536_vm2, %v9533_v52, %v6109_v4  ;;  %v3576_v46 = vpack.c.bf16 %v9679_v30, %v9676_v35  ;;  %v3970_v28 = vpop.f32.mrf.mxu2 }
 0x459   : > { %v3575_v23 = vpack.c.bf16 %v9686_v24, %v9682_v43  ;;  %v4034_v56 = vmul.f32 %v9314_v54, %v3970_v28  ;;  %4490 = vperm.xlu1 %6151, %v4396_v49  }
 0x45a   : > { %v6057_v44 = vpop.permute.xlu1 %6056 }
 0x45b   : > { %v6059_v62 = vunpack.i.h.bf16 %v6057_v44  ;;  %v6058_v5 = vunpack.i.l.bf16 %v6057_v44  ;;  %v4069_v61 = vadd.f32 %v9331_v27, %v4034_v56 }
 0x45c   : > { %v6127_v52 = vpop.permute.xlu0 %6126  ;;  %4515 = vperm.xlu0 %6150, %v4401_v0  }
 0x45d   : > { %v6122_v33 = vpop.permute.xlu2 %6121  ;;  %v3523_v21 = vsel %vm1875_vm11, %v9520_v63, %v6058_v5  ;;  %v3524_v34 = vsel %vm1875_vm11, %v9439_v32, %v6059_v62  ;;  %v6129_v2 = vunpack.i.h.bf16 %v6127_v52  ;;  %v6128_v15 = vunpack.i.l.bf16 %v6127_v52  ;;  %4861 = vmatmul.msk.bf16.gmra.mxu2 %vm1646_vm4, %v3874_v59  ;;  %v4394_v62 = vld [vmem:[%s9485_s22 + $0x68] sm:$0xff] }
 0x45e   : > { %v6124_v22 = vunpack.i.h.bf16 %v6122_v33  ;;  %v6123_v19 = vunpack.i.l.bf16 %v6122_v33  ;;  %v4101_v63 = vmax.f32 %v4069_v61, 0.0  ;;  %4480 = vperm.xlu2 %6152, %v4394_v62  }
 0x45f   : > { %v9708_v31 = vsel %vm3536_vm2, %v3524_v34, %v6128_v15  ;;  %v9712_v32 = vsel %vm3536_vm2, %v9584_v20, %v6129_v2 }
 0x460   : > { %v9716_v4 = vsel %vm3536_vm2, %v3522_v48, %v6123_v19  ;;  %v9719_v11 = vsel %vm3536_vm2, %v3523_v21, %v6124_v22  ;;  %v3579_v50 = vpack.c.bf16 %v9712_v32, %v9708_v31  ;;  %v4129_v20 = vpack.c.bf16 %v4101_v63, %v4100_v17  ;;  %v3973_v57 = vpop.f32.mrf.mxu2 }
 0x461   : > { %v3578_v1 = vpack.c.bf16 %v9719_v11, %v9716_v4  ;;  %v4035_v33 = vmul.f32 %v9314_v54, %v3973_v57  ;;  %4505 = vperm.xlu1 %6151, %v4399_v9  }
 0x462   : > { %v6072_v7 = vpop.permute.xlu1 %6071  ;;  %4833 = vmatmul.msk.bf16.gmra.mxu1 %vm3612_vm7, %v3572_v37 }
 0x463   : > { %v6074_v58 = vunpack.i.h.bf16 %v6072_v7  ;;  %v6073_v44 = vunpack.i.l.bf16 %v6072_v7  ;;  %4868 = vmatmul.msk.bf16.gmra.mxu3 %vm3308_vm13, %v4129_v20 }
 0x464   : > { %v6142_v5 = vpop.permute.xlu0 %6141 }
 0x465   : > { %v6137_v28 = vpop.permute.xlu2 %6136  ;;  %v9734_v49 = vsel %vm1875_vm11, %v9433_v38, %v6073_v44  ;;  %v3528_v36 = vsel %vm1875_vm11, %v9556_v47, %v6074_v58  ;;  %v6144_v12 = vunpack.i.h.bf16 %v6142_v5  ;;  %v6143_v37 = vunpack.i.l.bf16 %v6142_v5  ;;  %v4404_v38 = vld [vmem:[%s9485_s22 + $0xb8] sm:$0xff]  ;;  %v4402_v58 = vld [vmem:[%s9485_s22 + $0xa8] sm:$0xff] }
 0x466   : > { %v6139_v29 = vunpack.i.h.bf16 %v6137_v28  ;;  %v6138_v52 = vunpack.i.l.bf16 %v6137_v28  ;;  %4530 = vperm.xlu0 %6150, %v4404_v38   ;;  %v6028_v44 = vunpack.i.l.bf16 %v9628_v39  ;;  %v4410_v38 = vld [vmem:[%s9485_s22 + $0xe8] sm:$0xff] }
 0x467   : > { %v9741_v56 = vsel %vm3536_vm2, %v9617_v18, %v6143_v37  ;;  %v9745_v40 = vsel %vm3536_vm2, %v9652_v8, %v6144_v12  ;;  %v4070_v8 = vadd.f32 %v9331_v27, %v4035_v33  ;;  %v4405_v12 = vld [vmem:[%s9485_s22 + $0xc0] sm:$0xff]  ;;  %v4400_v37 = vld [vmem:[%s9485_s22 + $0x98] sm:$0xff] }
 0x468   : > { %v3582_v47 = vpack.c.bf16 %v9745_v40, %v9741_v56  ;;  %v9753_v59 = vsel %vm3536_vm2, %v9613_v42, %v6139_v29  ;;  %v9756_v21 = vsel %vm3536_vm2, %v3528_v36, %v6138_v52  ;;  %v3975_v15 = vpop.f32.mrf.mxu2  ;;  %v3512_v42 = vsel %vm1875_vm11, %v9377_v60, %v6019_v26 }
 0x469   : > { %v3581_v18 = vpack.c.bf16 %v9753_v59, %v9756_v21  ;;  %v4036_v19 = vmul.f32 %v9314_v54, %v3975_v15  ;;  %v4102_v7 = vmax.f32 %v4070_v8, 0.0  ;;  %4520 = vperm.xlu1 %6151, %v4402_v58   ;;  %v3515_v36 = vsel %vm1875_vm11, %v9366_v3, %v6028_v44  ;;  %v4406_v44 = vld [vmem:[%s9485_s22 + $0xc8] sm:$0xff] }
 0x46a   : > { %v6087_v34 = vpop.permute.xlu1 %6086  ;;  %v6053_v26 = vunpack.i.l.bf16 %v9545_v51 }
 0x46b   : > { %v6089_v6 = vunpack.i.h.bf16 %v6087_v34  ;;  %v6088_v2 = vunpack.i.l.bf16 %v6087_v34  ;;  %v4071_v20 = vadd.f32 %v9331_v27, %v4036_v19 }
 0x46d   : > { %v3276_v22 = vpop.permute.xlu2 %3275  ;;  %v3545_v48 = vsel %vm3536_vm2, %v3512_v42, %v6088_v2  ;;  %v3546_v0 = vsel %vm3536_vm2, %v9502_v10, %v6089_v6  ;;  %v4103_v57 = vmax.f32 %v4071_v20, 0.0  ;;  %v4408_v42 = vld [vmem:[%s9485_s22 + $0xd8] sm:$0xff] }
 0x46e   : > { %v9766_v17 = vsel %vm3536_vm2, %v9643_v14, %v3276_v22  ;;  %v9770_v61 = vsel %vm3536_vm2, %v9647_v16, %v3276_v22  ;;  %v3573_v60 = vpack.c.bf16 %v3546_v0, %v3545_v48  ;;  %v4397_v14 = vld [vmem:[%s9485_s22 + $0x80] sm:$0xff]  ;;  %v4407_v16 = vld [vmem:[%s9485_s22 + $0xd0] sm:$0xff] }
 0x46f   : > { %v3584_v63 = vpack.c.bf16 %v9770_v61, %v9766_v17  ;;  %4495 = vperm.xlu2 %6152, %v4397_v14   ;;  %v4130_v10 = vpack.c.bf16 %v4103_v57, %v4102_v7  ;;  %4545 = vperm.xlu0 %6150, %v4407_v16   ;;  %v4403_v22 = vld [vmem:[%s9485_s22 + $0xb0] sm:$0xff] }
 0x470   : > { %v3978_v28 = vpop.f32.mrf.mxu2  ;;  %v4411_v16 = vld [vmem:[%s9485_s22 + $0xf0] sm:$0xff] }
 0x471   : > { %v4037_v33 = vmul.f32 %v9314_v54, %v3978_v28  ;;  %4535 = vperm.xlu1 %6151, %v4405_v12  }
 0x472   : > { %v6102_v9 = vpop.permute.xlu1 %6101  ;;  %4834 = vmatmul.msk.bf16.gmra.mxu1 %vm3612_vm7, %v3573_v60 }
 0x473   : > { %v6104_v62 = vunpack.i.h.bf16 %v6102_v9  ;;  %v6103_v5 = vunpack.i.l.bf16 %v6102_v9  ;;  %4869 = vmatmul.msk.bf16.gmra.mxu3 %vm3308_vm13, %v4130_v10  ;;  %v4072_v34 = vadd.f32 %v9331_v27, %v4037_v33 }
 0x475   : > { %v3547_v39 = vsel %vm3536_vm2, %v9506_v25, %v6103_v5  ;;  %v3548_v29 = vsel %vm3536_vm2, %v3515_v36, %v6104_v62  ;;  %v3521_v25 = vsel %vm1875_vm11, %v9400_v45, %v6053_v26  ;;  %v4104_v48 = vmax.f32 %v4072_v34, 0.0 }
 0x476   : > { %v3574_v52 = vpack.c.bf16 %v3548_v29, %v3547_v39  ;;  %v4409_v29 = vld [vmem:[%s9485_s22 + $0xe0] sm:$0xff] }
 0x477   : > { %4510 = vperm.xlu2 %6152, %v4400_v37   ;;  %4560 = vperm.xlu0 %6150, %v4410_v38  }
 0x478   : > { %v3980_v2 = vpop.f32.mrf.mxu2 }
 0x479   : > { %v4038_v15 = vmul.f32 %v9314_v54, %v3980_v2  ;;  %4550 = vperm.xlu1 %6151, %v4408_v42  }
 0x47a   : > { %v6117_v3 = vpop.permute.xlu1 %6116 }
 0x47b   : > { %v6119_v8 = vunpack.i.h.bf16 %v6117_v3  ;;  %v6118_v6 = vunpack.i.l.bf16 %v6117_v3  ;;  %v4073_v0 = vadd.f32 %v9331_v27, %v4038_v15 }
 0x47d   : > { %v9802_v19 = vsel %vm3536_vm2, %v9668_v13, %v6118_v6  ;;  %v9805_v51 = vsel %vm3536_vm2, %v3521_v25, %v6119_v8  ;;  %v4105_v45 = vmax.f32 %v4073_v0, 0.0 }
 0x47e   : > { %v3577_v60 = vpack.c.bf16 %v9805_v51, %v9802_v19 }
 0x47f   : > { %4525 = vperm.xlu2 %6152, %v4403_v22   ;;  %v4131_v20 = vpack.c.bf16 %v4105_v45, %v4104_v48  ;;  %v9859_v45 = vld [vmem:[%s10119_s9] ss:$0 sm:$0xff] }
 0x480   : > { %v3983_v14 = vpop.f32.mrf.mxu2 }
 0x481   : > { %v4039_v10 = vmul.f32 %v9314_v54, %v3983_v14  ;;  %4565 = vperm.xlu1 %6151, %v4411_v16   ;;  %v9880_v14 = vld [vmem:[%s10123_s13] ss:$0 sm:$0xff] }
 0x482   : > { %v6132_v7 = vpop.permute.xlu1 %6131  ;;  %4835 = vmatmul.msk.bf16.gmra.mxu1 %vm3612_vm7, %v3574_v52  ;;  %v9885_v16 = vld [vmem:[%s10117_s7] ss:$0 sm:$0xff] }
 0x483   : > { %v6134_v58 = vunpack.i.h.bf16 %v6132_v7  ;;  %v6133_v13 = vunpack.i.l.bf16 %v6132_v7  ;;  %4870 = vmatmul.msk.bf16.gmra.mxu3 %vm3308_vm13, %v4131_v20  ;;  %v4074_v36 = vadd.f32 %v9331_v27, %v4039_v10  ;;  %v9867_v20 = vld [vmem:[%s10122_s12] ss:$0 sm:$0xff] }
 0x484   : > { %v4199_v5 = vpop.f32.mrf.mxu3 }
 0x485   : > { %v9816_v57 = vsel %vm3536_vm2, %v9588_v53, %v6133_v13  ;;  %v9820_v9 = vsel %vm3536_vm2, %v9734_v49, %v6134_v58  ;;  %v4106_v38 = vmax.f32 %v4074_v36, 0.0  ;;  %v4282_v13 = vmul.f32 %v9867_v20, %v4199_v5 }
 0x486   : > { %v3580_v62 = vpack.c.bf16 %v9820_v9, %v9816_v57 }
 0x487   : > { %4540 = vperm.xlu2 %6152, %v4406_v44   ;;  %v9890_v44 = vld [vmem:[%s10120_s10] ss:$0 sm:$0xff] }
 0x488   : > { %v3985_v53 = vpop.f32.mrf.mxu2 }
 0x489   : > { %v4040_v39 = vmul.f32 %v9314_v54, %v3985_v53 }
 0x48a   : > { %v6147_v28 = vpop.permute.xlu1 %6146 }
 0x48b   : > { %v6149_v12 = vunpack.i.h.bf16 %v6147_v28  ;;  %v6148_v37 = vunpack.i.l.bf16 %v6147_v28  ;;  %v4075_v26 = vadd.f32 %v9331_v27, %v4040_v39 }
 0x48c   : > { %v4201_v3 = vpop.f32.mrf.mxu3 }
 0x48d   : > { %v9830_v49 = vsel %vm3536_vm2, %v9656_v55, %v6148_v37  ;;  %v9834_v52 = vsel %vm3536_vm2, %v9639_v41, %v6149_v12  ;;  %v4107_v34 = vmax.f32 %v4075_v26, 0.0  ;;  %v4412_v41 = vld [vmem:[%s9485_s22 + $0xf8] sm:$0xff]  ;;  %v4317_v37 = vadd.f32 %v9880_v14, %v4282_v13 }
 0x48e   : > { %v3583_v33 = vpack.c.bf16 %v9834_v52, %v9830_v49 }
 0x48f   : > { %4555 = vperm.xlu2 %6152, %v4409_v29   ;;  %v4132_v55 = vpack.c.bf16 %v4107_v34, %v4106_v38  ;;  %v4416_v29 = vpop.permute.xlu0 %4415  ;;  %v4283_v34 = vmul.f32 %v9867_v20, %v4201_v3 }
 0x490   : > { %v3988_v8 = vpop.f32.mrf.mxu2 }
 0x491   : > { %v4041_v6 = vmul.f32 %v9314_v54, %v3988_v8  ;;  %v4318_v51 = vadd.f32 %v9880_v14, %v4283_v34 }
 0x492   : > { %4836 = vmatmul.msk.bf16.gmra.mxu1 %vm3612_vm7, %v3575_v23 }
 0x493   : > { %4871 = vmatmul.msk.bf16.gmra.mxu3 %vm3308_vm13, %v4132_v55  ;;  %v4076_v25 = vadd.f32 %v9331_v27, %v4041_v6  ;;  %v4349_v55 = vmax.f32 %v4317_v37, 0.0 }
 0x495   : > { %v4204_v2 = vpop.f32.mrf.mxu3  ;;  %v4108_v22 = vmax.f32 %v4076_v25, 0.0 }
 0x497   : > { %4570 = vperm.xlu2 %6152, %v4412_v41  }
 0x498   : > { %v3990_v15 = vpop.f32.mrf.mxu2 }
 0x499   : > { %v4042_v42 = vmul.f32 %v9314_v54, %v3990_v15 }
 0x49b   : > { %v4077_v48 = vadd.f32 %v9331_v27, %v4042_v42 }
 0x49d   : > { %v9849_v43 = vpop.f32.mrf.mxu3  ;;  %v4109_v24 = vmax.f32 %v4077_v48, 0.0 }
 0x49f   : > { %v4133_v23 = vpack.c.bf16 %v4109_v24, %v4108_v22  ;;  %v4421_v22 = vpop.permute.xlu1 %4420 }
 0x4a0   : > { %v3993_v0 = vpop.f32.mrf.mxu2 }
 0x4a1   : > { %v4043_v54 = vmul.f32 %v9859_v45, %v3993_v0  ;;  %v4284_v0 = vmul.f32 %v9867_v20, %v4204_v2 }
 0x4a2   : > { %4837 = vmatmul.msk.bf16.gmra.mxu1 %vm3612_vm7, %v3576_v46  ;;  %v9873_v46 = vld [vmem:[%s10116_s6] ss:$0 sm:$0xff] }
 0x4a3   : > { %4872 = vmatmul.msk.bf16.gmra.mxu3 %vm3308_vm13, %v4133_v23  ;;  %v4078_v35 = vadd.f32 %v9331_v27, %v4043_v54  ;;  %v4350_v23 = vmax.f32 %v4318_v51, 0.0 }
 0x4a5   : > { %v9862_v7 = vpop.f32.mrf.mxu3  ;;  %v4110_v27 = vmax.f32 %v4078_v35, 0.0 }
 0x4a8   : > { %v3995_v30 = vpop.f32.mrf.mxu2 }
 0x4a9   : > { %v4044_v58 = vmul.f32 %v9859_v45, %v3995_v30 }
 0x4ab   : > { %v4079_v10 = vadd.f32 %v9890_v44, %v4044_v58 }
 0x4ad   : > { %v9893_v5 = vpop.f32.mrf.mxu3  ;;  %v4111_v12 = vmax.f32 %v4079_v10, 0.0 }
 0x4af   : > { %v3674_v28 = vpop.f32.mrf.mxu1  ;;  %v4134_v39 = vpack.c.bf16 %v4111_v12, %v4110_v27 }
 0x4b0   : > { %v3757_v36 = vmul.f32 %v9873_v46, %v3674_v28  ;;  %v3998_v38 = vpop.f32.mrf.mxu2 }
 0x4b1   : > { %v4045_v41 = vmul.f32 %v9859_v45, %v3998_v38 }
 0x4b2   : > { %v3792_v53 = vadd.f32 %v9885_v16, %v3757_v36  ;;  %4838 = vmatmul.msk.bf16.gmra.mxu1 %vm3612_vm7, %v3577_v60  ;;  %v4319_v36 = vadd.f32 %v9880_v14, %v4284_v0 }
 0x4b3   : > { %4873 = vmatmul.msk.bf16.gmra.mxu3 %vm3308_vm13, %v4134_v39  ;;  %v4080_v42 = vadd.f32 %v9890_v44, %v4045_v41  ;;  %v4285_v39 = vmul.f32 %v9867_v20, %v9849_v43 }
 0x4b4   : > { %v3824_v26 = vmax.f32 %v3792_v53, 0.0  ;;  %v4351_v38 = vmax.f32 %v4319_v36, 0.0  ;;  %v4287_v36 = vmul.f32 %v9867_v20, %v9893_v5 }
 0x4b5   : > { %v9905_v25 = vpop.f32.mrf.mxu3  ;;  %v4112_v35 = vmax.f32 %v4080_v42, 0.0  ;;  %v4320_v11 = vadd.f32 %v9880_v14, %v4285_v39  ;;  %v4286_v42 = vmul.f32 %v9867_v20, %v9862_v7 }
 0x4b6   : > { %v4573_v8 = vmul.f32 %v4416_v29, %v3824_v26  ;;  %v4426_v29 = vpop.permute.xlu2 %4425  ;;  %v4322_v32 = vadd.f32 %v9880_v14, %v4287_v36 }
 0x4b7   : > { %v3676_v6 = vpop.f32.mrf.mxu1 }
 0x4b8   : > { %v4605_v15 = vadd.f32 %v4573_v8, %v4349_v55  ;;  %v3758_v19 = vmul.f32 %v9873_v46, %v3676_v6  ;;  %v4000_v48 = vpop.f32.mrf.mxu2 }
 0x4b9   : > { %v4046_v24 = vmul.f32 %v9859_v45, %v4000_v48 }
 0x4ba   : > { %4637 = vxpose.xlu0.b32.start [1/16] (narrow) %v4605_v15, 8  ;;  %v3793_v60 = vadd.f32 %v9885_v16, %v3758_v19  ;;  %v4431_v15 = vpop.permute.xlu1 %4430 }
 0x4bb   : > { %v4081_v30 = vadd.f32 %v9890_v44, %v4046_v24 }
 0x4bc   : > { %v3825_v3 = vmax.f32 %v3793_v60, 0.0  ;;  %v4352_v60 = vmax.f32 %v4320_v11, 0.0 }
 0x4bd   : > { %v9914_v13 = vpop.f32.mrf.mxu3  ;;  %v4113_v28 = vmax.f32 %v4081_v30, 0.0  ;;  %v4321_v30 = vadd.f32 %v9880_v14, %v4286_v42 }
 0x4be   : > { %v4574_v54 = vmul.f32 %v4421_v22, %v3825_v3 }
 0x4bf   : > { %v3679_v58 = vpop.f32.mrf.mxu1  ;;  %v4135_v2 = vpack.c.bf16 %v4113_v28, %v4112_v35  ;;  %v4436_v28 = vpop.permute.xlu2 %4435 }
 0x4c0   : > { %v4606_v27 = vadd.f32 %v4574_v54, %v4350_v23  ;;  %v3759_v10 = vmul.f32 %v9873_v46, %v3679_v58  ;;  %v4003_v37 = vpop.f32.mrf.mxu2 }
 0x4c1   : > { %v4047_v34 = vmul.f32 %v9859_v45, %v4003_v37 }
 0x4c2   : > { %v3794_v12 = vadd.f32 %v9885_v16, %v3759_v10  ;;  %4638 = vxpose.xlu0.b32.cont [2/16] (narrow) %v4606_v27, 8  ;;  %4839 = vmatmul.msk.bf16.gmra.mxu1 %vm3612_vm7, %v3578_v1 }
 0x4c3   : > { %4874 = vmatmul.msk.bf16.gmra.mxu3 %vm3308_vm13, %v4135_v2  ;;  %v4082_v6 = vadd.f32 %v9890_v44, %v4047_v34 }
 0x4c4   : > { %v3826_v53 = vmax.f32 %v3794_v12, 0.0  ;;  %v4353_v12 = vmax.f32 %v4321_v30, 0.0 }
 0x4c5   : > { %v9927_v8 = vpop.f32.mrf.mxu3  ;;  %v4114_v48 = vmax.f32 %v4082_v6, 0.0 }
 0x4c6   : > { %v4575_v26 = vmul.f32 %v4426_v29, %v3826_v53 }
 0x4c7   : > { %v3681_v55 = vpop.f32.mrf.mxu1 }
 0x4c8   : > { %v4607_v41 = vadd.f32 %v4575_v26, %v4351_v38  ;;  %v3760_v4 = vmul.f32 %v9873_v46, %v3681_v55  ;;  %v4005_v43 = vpop.f32.mrf.mxu2  ;;  %v4354_v55 = vmax.f32 %v4322_v32, 0.0 }
 0x4c9   : > { %v4048_v51 = vmul.f32 %v9859_v45, %v4005_v43 }
 0x4ca   : > { %4639 = vxpose.xlu0.b32.cont [3/16] (narrow) %v4607_v41, 8  ;;  %v3795_v1 = vadd.f32 %v9885_v16, %v3760_v4  ;;  %v4441_v41 = vpop.permute.xlu0 %4440  ;;  %v4288_v4 = vmul.f32 %v9867_v20, %v9905_v25 }
 0x4cb   : > { %v4083_v3 = vadd.f32 %v9890_v44, %v4048_v51 }
 0x4cc   : > { %v3827_v19 = vmax.f32 %v3795_v1, 0.0  ;;  %v4323_v42 = vadd.f32 %v9880_v14, %v4288_v4 }
 0x4cd   : > { %v9937_v23 = vpop.f32.mrf.mxu3  ;;  %v4115_v35 = vmax.f32 %v4083_v3, 0.0 }
 0x4ce   : > { %v4576_v22 = vmul.f32 %v4431_v15, %v3827_v19  ;;  %v4291_v4 = vmul.f32 %v9867_v20, %v9937_v23 }
 0x4cf   : > { %v3684_v24 = vpop.f32.mrf.mxu1  ;;  %v4136_v7 = vpack.c.bf16 %v4115_v35, %v4114_v48 }
 0x4d0   : > { %v4608_v0 = vadd.f32 %v4576_v22, %v4352_v60  ;;  %v3761_v54 = vmul.f32 %v9873_v46, %v3684_v24  ;;  %v4008_v27 = vpop.f32.mrf.mxu2  ;;  %v4446_v24 = vpop.permute.xlu1 %4445 }
 0x4d1   : > { %v4049_v37 = vmul.f32 %v9859_v45, %v4008_v27 }
 0x4d2   : > { %v3796_v58 = vadd.f32 %v9885_v16, %v3761_v54  ;;  %4640 = vxpose.xlu0.b32.cont [4/16] (narrow) %v4608_v0, 8  ;;  %4840 = vmatmul.msk.bf16.gmra.mxu1 %vm3612_vm7, %v3579_v50  ;;  %v4289_v0 = vmul.f32 %v9867_v20, %v9914_v13  ;;  %v4355_v54 = vmax.f32 %v4323_v42, 0.0 }
 0x4d3   : > { %4875 = vmatmul.msk.bf16.gmra.mxu3 %vm3308_vm13, %v4136_v7  ;;  %v4084_v38 = vadd.f32 %v9890_v44, %v4049_v37  ;;  %v4290_v37 = vmul.f32 %v9867_v20, %v9927_v8 }
 0x4d4   : > { %v3828_v10 = vmax.f32 %v3796_v58, 0.0  ;;  %v4324_v9 = vadd.f32 %v9880_v14, %v4289_v0 }
 0x4d5   : > { %v4116_v1 = vmax.f32 %v4084_v38, 0.0 }
 0x4d6   : > { %v4577_v2 = vmul.f32 %v4436_v28, %v3828_v10  ;;  %v9950_v39 = vpop.f32.mrf.mxu3 }
 0x4d7   : > { %v3686_v53 = vpop.f32.mrf.mxu1  ;;  %v4292_v42 = vmul.f32 %v9867_v20, %v9950_v39 }
 0x4d8   : > { %v4609_v29 = vadd.f32 %v4577_v2, %v4353_v12  ;;  %v3762_v31 = vmul.f32 %v9873_v46, %v3686_v53  ;;  %v4010_v26 = vpop.f32.mrf.mxu2  ;;  %v4451_v12 = vpop.permute.xlu2 %4450  ;;  %v4356_v2 = vmax.f32 %v4324_v9, 0.0 }
 0x4d9   : > { %v4050_v5 = vmul.f32 %v9859_v45, %v4010_v26 }
 0x4da   : > { %v3797_v50 = vadd.f32 %v9885_v16, %v3762_v31  ;;  %4641 = vxpose.xlu0.b32.cont [5/16] (narrow) %v4609_v29, 8 }
 0x4db   : > { %v4085_v6 = vadd.f32 %v9890_v44, %v4050_v5  ;;  %v4325_v5 = vadd.f32 %v9880_v14, %v4290_v37 }
 0x4dc   : > { %v3829_v34 = vmax.f32 %v3797_v50, 0.0 }
 0x4dd   : > { %v4117_v60 = vmax.f32 %v4085_v6, 0.0 }
 0x4de   : > { %v4578_v11 = vmul.f32 %v4441_v41, %v3829_v34  ;;  %v9960_v43 = vpop.f32.mrf.mxu3  ;;  %v4357_v41 = vmax.f32 %v4325_v5, 0.0 }
 0x4df   : > { %v3689_v15 = vpop.f32.mrf.mxu1  ;;  %v4137_v25 = vpack.c.bf16 %v4117_v60, %v4116_v1  ;;  %v4293_v39 = vmul.f32 %v9867_v20, %v9960_v43 }
 0x4e0   : > { %v3763_v19 = vmul.f32 %v9873_v46, %v3689_v15  ;;  %v4610_v51 = vadd.f32 %v4578_v11, %v4354_v55  ;;  %v4013_v48 = vpop.f32.mrf.mxu2 }
 0x4e1   : > { %v4051_v30 = vmul.f32 %v9859_v45, %v4013_v48 }
 0x4e2   : > { %v3798_v22 = vadd.f32 %v9885_v16, %v3763_v19  ;;  %4642 = vxpose.xlu0.b32.cont [6/16] (narrow) %v4610_v51, 8  ;;  %4841 = vmatmul.msk.bf16.gmra.mxu1 %vm3612_vm7, %v3580_v62  ;;  %v4326_v51 = vadd.f32 %v9880_v14, %v4291_v4 }
 0x4e3   : > { %4876 = vmatmul.msk.bf16.gmra.mxu3 %vm3308_vm13, %v4137_v25  ;;  %v4086_v10 = vadd.f32 %v9890_v44, %v4051_v30 }
 0x4e4   : > { %v3830_v3 = vmax.f32 %v3798_v22, 0.0  ;;  %v4358_v60 = vmax.f32 %v4326_v51, 0.0 }
 0x4e5   : > { %v4118_v29 = vmax.f32 %v4086_v10, 0.0 }
 0x4e6   : > { %v4579_v35 = vmul.f32 %v4446_v24, %v3830_v3  ;;  %v9973_v7 = vpop.f32.mrf.mxu3  ;;  %v4327_v3 = vadd.f32 %v9880_v14, %v4292_v42 }
 0x4e7   : > { %v3691_v58 = vpop.f32.mrf.mxu1 }
 0x4e8   : > { %v4611_v27 = vadd.f32 %v4579_v35, %v4355_v54  ;;  %v3764_v57 = vmul.f32 %v9873_v46, %v3691_v58  ;;  %v4015_v28 = vpop.f32.mrf.mxu2  ;;  %v4466_v35 = vpop.permute.xlu2 %4465  ;;  %v4359_v30 = vmax.f32 %v4327_v3, 0.0 }
 0x4e9   : > { %v4052_v13 = vmul.f32 %v9859_v45, %v4015_v28 }
 0x4ea   : > { %v3799_v62 = vadd.f32 %v9885_v16, %v3764_v57  ;;  %4643 = vxpose.xlu0.b32.cont [7/16] (narrow) %v4611_v27, 8 }
 0x4eb   : > { %v4087_v31 = vadd.f32 %v9890_v44, %v4052_v13  ;;  %v4456_v44 = vpop.permute.xlu0 %4455 }
 0x4ec   : > { %v3831_v36 = vmax.f32 %v3799_v62, 0.0  ;;  %v4328_v62 = vadd.f32 %v9880_v14, %v4293_v39 }
 0x4ed   : > { %v4119_v34 = vmax.f32 %v4087_v31, 0.0 }
 0x4ee   : > { %v4580_v53 = vmul.f32 %v4451_v12, %v3831_v36  ;;  %v4231_v50 = vpop.f32.mrf.mxu3  ;;  %v4360_v28 = vmax.f32 %v4328_v62, 0.0  ;;  %v4294_v36 = vmul.f32 %v9867_v20, %v9973_v7 }
 0x4ef   : > { %v3694_v32 = vpop.f32.mrf.mxu1  ;;  %v4138_v45 = vpack.c.bf16 %v4119_v34, %v4118_v29  ;;  %v4295_v7 = vmul.f32 %v9867_v20, %v4231_v50 }
 0x4f0   : > { %v3765_v38 = vmul.f32 %v9873_v46, %v3694_v32  ;;  %v4612_v26 = vadd.f32 %v4580_v53, %v4356_v2  ;;  %v4329_v37 = vadd.f32 %v9880_v14, %v4294_v36  ;;  %v4481_v49 = vpop.permute.xlu2 %4480 }
 0x4f2   : > { %v3800_v55 = vadd.f32 %v9885_v16, %v3765_v38  ;;  %4644 = vxpose.xlu0.b32.cont [8/16] (narrow) %v4612_v26, 8  ;;  %4842 = vmatmul.msk.bf16.gmra.mxu1 %vm3612_vm7, %v3581_v18  ;;  %v4461_v18 = vpop.permute.xlu1 %4460  ;;  %v4361_v32 = vmax.f32 %v4329_v37, 0.0 }
 0x4f3   : > { %4877 = vmatmul.msk.bf16.gmra.mxu3 %vm3308_vm13, %v4138_v45  ;;  %v4471_v40 = vpop.permute.xlu0 %4470  ;;  %v4330_v45 = vadd.f32 %v9880_v14, %v4295_v7 }
 0x4f4   : > { %v3832_v8 = vmax.f32 %v3800_v55, 0.0 }
 0x4f5   : > { %v4362_v52 = vmax.f32 %v4330_v45, 0.0 }
 0x4f6   : > { %v4581_v11 = vmul.f32 %v4456_v44, %v3832_v8  ;;  %v4234_v19 = vpop.f32.mrf.mxu3 }
 0x4f7   : > { %v3696_v1 = vpop.f32.mrf.mxu1 }
 0x4f8   : > { %v4613_v6 = vadd.f32 %v4581_v11, %v4357_v41  ;;  %v3766_v15 = vmul.f32 %v9873_v46, %v3696_v1 }
 0x4fa   : > { %v3801_v59 = vadd.f32 %v9885_v16, %v3766_v15  ;;  %4645 = vxpose.xlu0.b32.cont [9/16] (narrow) %v4613_v6, 8  ;;  %v4476_v31 = vpop.permute.xlu1 %4475 }
 0x4fc   : > { %v3833_v21 = vmax.f32 %v3801_v59, 0.0  ;;  %v4486_v59 = vpop.permute.xlu0 %4485 }
 0x4fe   : > { %v4582_v22 = vmul.f32 %v4461_v18, %v3833_v21  ;;  %v4236_v0 = vpop.f32.mrf.mxu3 }
 0x4ff   : > { %v3699_v25 = vpop.f32.mrf.mxu1 }
 0x500   : > { %v4614_v23 = vadd.f32 %v4582_v22, %v4358_v60  ;;  %v3767_v48 = vmul.f32 %v9873_v46, %v3699_v25 }
 0x502   : > { %v3802_v24 = vadd.f32 %v9885_v16, %v3767_v48  ;;  %4646 = vxpose.xlu0.b32.cont [10/16] (narrow) %v4614_v23, 8  ;;  %4843 = vmatmul.msk.bf16.gmra.mxu1 %vm3612_vm7, %v3582_v47  ;;  %v4491_v17 = vpop.permute.xlu1 %4490 }
 0x504   : > { %v3834_v54 = vmax.f32 %v3802_v24, 0.0 }
 0x506   : > { %v4583_v58 = vmul.f32 %v4466_v35, %v3834_v54  ;;  %v4239_v47 = vpop.f32.mrf.mxu3 }
 0x507   : > { %v3701_v27 = vpop.f32.mrf.mxu1 }
 0x508   : > { %v4615_v57 = vadd.f32 %v4583_v58, %v4359_v30  ;;  %v3768_v9 = vmul.f32 %v9873_v46, %v3701_v27  ;;  %v4496_v27 = vpop.permute.xlu2 %4495 }
 0x50a   : > { %v3803_v10 = vadd.f32 %v9885_v16, %v3768_v9  ;;  %4647 = vxpose.xlu0.b32.cont [11/16] (narrow) %v4615_v57, 8 }
 0x50c   : > { %v3835_v56 = vmax.f32 %v3803_v10, 0.0 }
 0x50e   : > { %v4584_v13 = vmul.f32 %v4471_v40, %v3835_v56  ;;  %v4241_v34 = vpop.f32.mrf.mxu3 }
 0x50f   : > { %v3704_v12 = vpop.f32.mrf.mxu1  ;;  %v4299_v62 = vmul.f32 %v9867_v20, %v4241_v34  ;;  %v4506_v34 = vpop.permute.xlu1 %4505 }
 0x510   : > { %v4616_v43 = vadd.f32 %v4584_v13, %v4360_v28  ;;  %v3769_v2 = vmul.f32 %v9873_v46, %v3704_v12  ;;  %v4501_v12 = vpop.permute.xlu0 %4500 }
 0x511   : > { %v4334_v28 = vadd.f32 %v9880_v14, %v4299_v62 }
 0x512   : > { %v3804_v53 = vadd.f32 %v9885_v16, %v3769_v2  ;;  %4648 = vxpose.xlu0.b32.cont [12/16] (narrow) %v4616_v43, 8  ;;  %4844 = vmatmul.msk.bf16.gmra.mxu1 %vm3612_vm7, %v3583_v33  ;;  %v4296_v33 = vmul.f32 %v9867_v20, %v4234_v19  ;;  %v4297_v19 = vmul.f32 %v9867_v20, %v4236_v0 }
 0x513   : > { %v4366_v43 = vmax.f32 %v4334_v28, 0.0 }
 0x514   : > { %v3836_v29 = vmax.f32 %v3804_v53, 0.0  ;;  %v4331_v6 = vadd.f32 %v9880_v14, %v4296_v33  ;;  %v4332_v25 = vadd.f32 %v9880_v14, %v4297_v19 }
 0x516   : > { %v4585_v38 = vmul.f32 %v4476_v31, %v3836_v29  ;;  %v4244_v1 = vpop.f32.mrf.mxu3  ;;  %v4363_v21 = vmax.f32 %v4331_v6, 0.0  ;;  %v4364_v61 = vmax.f32 %v4332_v25, 0.0 }
 0x517   : > { %v3706_v26 = vpop.f32.mrf.mxu1  ;;  %v4300_v2 = vmul.f32 %v9867_v20, %v4244_v1 }
 0x518   : > { %v4617_v5 = vadd.f32 %v4585_v38, %v4361_v32  ;;  %v3770_v55 = vmul.f32 %v9873_v46, %v3706_v26 }
 0x519   : > { %v4335_v7 = vadd.f32 %v9880_v14, %v4300_v2 }
 0x51a   : > { %v3805_v8 = vadd.f32 %v9885_v16, %v3770_v55  ;;  %4649 = vxpose.xlu0.b32.cont [13/16] (narrow) %v4617_v5, 8 }
 0x51b   : > { %v4367_v5 = vmax.f32 %v4335_v7, 0.0 }
 0x51c   : > { %v3837_v44 = vmax.f32 %v3805_v8, 0.0 }
 0x51e   : > { %v4586_v41 = vmul.f32 %v4481_v49, %v3837_v44  ;;  %v4246_v48 = vpop.f32.mrf.mxu3 }
 0x51f   : > { %v3709_v4 = vpop.f32.mrf.mxu1  ;;  %v4301_v55 = vmul.f32 %v9867_v20, %v4246_v48 }
 0x520   : > { %v4618_v11 = vadd.f32 %v4586_v41, %v4362_v52  ;;  %v3771_v50 = vmul.f32 %v9873_v46, %v3709_v4 }
 0x521   : > { %v4336_v33 = vadd.f32 %v9880_v14, %v4301_v55 }
 0x522   : > { %v3806_v15 = vadd.f32 %v9885_v16, %v3771_v50  ;;  %4650 = vxpose.xlu0.b32.cont [14/16] (narrow) %v4618_v11, 8  ;;  %4845 = vmatmul.msk.bf16.gmra.mxu1 %vm3612_vm7, %v3584_v63  ;;  %v4298_v63 = vmul.f32 %v9867_v20, %v4239_v47  ;;  %v4511_v11 = vpop.permute.xlu2 %4510 }
 0x523   : > { %v4368_v50 = vmax.f32 %v4336_v33, 0.0 }
 0x524   : > { %v3838_v51 = vmax.f32 %v3806_v15, 0.0  ;;  %v4333_v30 = vadd.f32 %v9880_v14, %v4298_v63 }
 0x526   : > { %v4587_v18 = vmul.f32 %v4486_v59, %v3838_v51  ;;  %v4249_v57 = vpop.f32.mrf.mxu3  ;;  %v4365_v9 = vmax.f32 %v4333_v30, 0.0 }
 0x527   : > { %v3711_v60 = vpop.f32.mrf.mxu1  ;;  %v4302_v1 = vmul.f32 %v9867_v20, %v4249_v57 }
 0x528   : > { %v4619_v42 = vadd.f32 %v4587_v18, %v4363_v21  ;;  %v3772_v22 = vmul.f32 %v9873_v46, %v3711_v60 }
 0x529   : > { %v4337_v21 = vadd.f32 %v9880_v14, %v4302_v1 }
 0x52a   : > { %v3807_v23 = vadd.f32 %v9885_v16, %v3772_v22  ;;  %4651 = vxpose.xlu0.b32.cont [15/16] (narrow) %v4619_v42, 8  ;;  %v4516_v42 = vpop.permute.xlu0 %4515 }
 0x52b   : > { %v4369_v22 = vmax.f32 %v4337_v21, 0.0 }
 0x52c   : > { %v3839_v3 = vmax.f32 %v3807_v23, 0.0 }
 0x52e   : > { %v4588_v24 = vmul.f32 %v4491_v17, %v3839_v3  ;;  %v4251_v29 = vpop.f32.mrf.mxu3 }
 0x52f   : > { %v3714_v54 = vpop.f32.mrf.mxu1  ;;  %v4303_v25 = vmul.f32 %v9867_v20, %v4251_v29 }
 0x530   : > { %v4620_v35 = vadd.f32 %v4588_v24, %v4364_v61  ;;  %v3773_v0 = vmul.f32 %v9873_v46, %v3714_v54  ;;  %v4521_v54 = vpop.permute.xlu1 %4520 }
 0x531   : > { %v4338_v61 = vadd.f32 %v9880_v14, %v4303_v25 }
 0x532   : > { %v3808_v39 = vadd.f32 %v9885_v16, %v3773_v0  ;;  %4652 = vxpose.xlu0.b32.end [16/16] (narrow) %v4620_v35, 8  ;;  %v4531_v29 = vpop.permute.xlu0 %4530 }
 0x533   : > { %v4370_v0 = vmax.f32 %v4338_v61, 0.0 }
 0x534   : > { %v3840_v58 = vmax.f32 %v3808_v39, 0.0 }
 0x536   : > { %v4589_v10 = vmul.f32 %v4496_v27, %v3840_v58  ;;  %v4254_v52 = vpop.f32.mrf.mxu3 }
 0x537   : > { %v3716_v56 = vpop.f32.mrf.mxu1  ;;  %v4304_v30 = vmul.f32 %v9867_v20, %v4254_v52 }
 0x538   : > { %v4621_v40 = vadd.f32 %v4589_v10, %v4365_v9  ;;  %v3774_v47 = vmul.f32 %v9873_v46, %v3716_v56  ;;  %v4526_v56 = vpop.permute.xlu2 %4525 }
 0x539   : > { %v4339_v9 = vadd.f32 %v9880_v14, %v4304_v30 }
 0x53a   : > { %v3809_v36 = vadd.f32 %v9885_v16, %v3774_v47  ;;  %4669 = vxpose.xlu1.b32.start [1/16] (narrow) %v4621_v40, 8 }
 0x53b   : > { %v4371_v40 = vmax.f32 %v4339_v9, 0.0 }
 0x53c   : > { %v3841_v13 = vmax.f32 %v3809_v36, 0.0 }
 0x53e   : > { %v4590_v37 = vmul.f32 %v4501_v12, %v3841_v13  ;;  %v4256_v18 = vpop.f32.mrf.mxu3 }
 0x53f   : > { %v3719_v53 = vpop.f32.mrf.mxu1  ;;  %v4305_v47 = vmul.f32 %v9867_v20, %v4256_v18 }
 0x540   : > { %v4622_v31 = vadd.f32 %v4590_v37, %v4366_v43  ;;  %v3775_v32 = vmul.f32 %v9873_v46, %v3719_v53 }
 0x541   : > { %v4340_v2 = vadd.f32 %v9880_v14, %v4305_v47 }
 0x542   : > { %v3810_v38 = vadd.f32 %v9885_v16, %v3775_v32  ;;  %4670 = vxpose.xlu1.b32.cont [2/16] (narrow) %v4622_v31, 8 }
 0x543   : > { %v4372_v31 = vmax.f32 %v4340_v2, 0.0 }
 0x544   : > { %v3842_v26 = vmax.f32 %v3810_v38, 0.0 }
 0x546   : > { %v4591_v45 = vmul.f32 %v4506_v34, %v3842_v26  ;;  %v4259_v35 = vpop.f32.mrf.mxu3 }
 0x547   : > { %v3721_v8 = vpop.f32.mrf.mxu1  ;;  %v4306_v32 = vmul.f32 %v9867_v20, %v4259_v35 }
 0x548   : > { %v4623_v44 = vadd.f32 %v4591_v45, %v4367_v5  ;;  %v3776_v49 = vmul.f32 %v9873_v46, %v3721_v8 }
 0x549   : > { %v4341_v55 = vadd.f32 %v9880_v14, %v4306_v32 }
 0x54a   : > { %v3811_v41 = vadd.f32 %v9885_v16, %v3776_v49  ;;  %4671 = vxpose.xlu1.b32.cont [3/16] (narrow) %v4623_v44, 8  ;;  %v4536_v44 = vpop.permute.xlu1 %4535 }
 0x54b   : > { %v4373_v49 = vmax.f32 %v4341_v55, 0.0 }
 0x54c   : > { %v3843_v4 = vmax.f32 %v3811_v41, 0.0 }
 0x54e   : > { %v4592_v6 = vmul.f32 %v4511_v11, %v3843_v4  ;;  %v4261_v13 = vpop.f32.mrf.mxu3 }
 0x54f   : > { %v3724_v15 = vpop.f32.mrf.mxu1  ;;  %v4307_v52 = vmul.f32 %v9867_v20, %v4261_v13 }
 0x550   : > { %v4624_v51 = vadd.f32 %v4592_v6, %v4368_v50  ;;  %v3777_v59 = vmul.f32 %v9873_v46, %v3724_v15 }
 0x551   : > { %v4342_v50 = vadd.f32 %v9880_v14, %v4307_v52 }
 0x552   : > { %v3812_v19 = vadd.f32 %v9885_v16, %v3777_v59  ;;  %4672 = vxpose.xlu1.b32.cont [4/16] (narrow) %v4624_v51, 8  ;;  %v4541_v51 = vpop.permute.xlu2 %4540 }
 0x553   : > { %v4374_v59 = vmax.f32 %v4342_v50, 0.0 }
 0x554   : > { %v3844_v60 = vmax.f32 %v3812_v19, 0.0 }
 0x556   : > { %v4593_v23 = vmul.f32 %v4516_v42, %v3844_v60  ;;  %v4264_v5 = vpop.f32.mrf.mxu3  ;;  %v4546_v60 = vpop.permute.xlu0 %4545 }
 0x557   : > { %v3726_v48 = vpop.f32.mrf.mxu1  ;;  %v4308_v21 = vmul.f32 %v9867_v20, %v4264_v5 }
 0x558   : > { %v4625_v3 = vadd.f32 %v4593_v23, %v4369_v22  ;;  %v3778_v17 = vmul.f32 %v9873_v46, %v3726_v48 }
 0x559   : > { %v4343_v25 = vadd.f32 %v9880_v14, %v4308_v21 }
 0x55a   : > { %v3813_v63 = vadd.f32 %v9885_v16, %v3778_v17  ;;  %4673 = vxpose.xlu1.b32.cont [5/16] (narrow) %v4625_v3, 8 }
 0x55b   : > { %v4375_v17 = vmax.f32 %v4343_v25, 0.0 }
 0x55c   : > { %v3845_v24 = vmax.f32 %v3813_v63, 0.0 }
 0x55e   : > { %v4594_v39 = vmul.f32 %v4521_v54, %v3845_v24  ;;  %v4266_v6 = vpop.f32.mrf.mxu3 }
 0x55f   : > { %v3729_v58 = vpop.f32.mrf.mxu1  ;;  %v4309_v61 = vmul.f32 %v9867_v20, %v4266_v6 }
 0x560   : > { %v4626_v27 = vadd.f32 %v4594_v39, %v4370_v0  ;;  %v3779_v57 = vmul.f32 %v9873_v46, %v3729_v58  ;;  %v4561_v0 = vpop.permute.xlu0 %4560 }
 0x561   : > { %v4344_v30 = vadd.f32 %v9880_v14, %v4309_v61 }
 0x562   : > { %v3814_v62 = vadd.f32 %v9885_v16, %v3779_v57  ;;  %4674 = vxpose.xlu1.b32.cont [6/16] (narrow) %v4626_v27, 8  ;;  %v4551_v27 = vpop.permute.xlu1 %4550 }
 0x563   : > { %v4376_v57 = vmax.f32 %v4344_v30, 0.0 }
 0x564   : > { %v3846_v10 = vmax.f32 %v3814_v62, 0.0 }
 0x566   : > { %v4595_v28 = vmul.f32 %v4526_v56, %v3846_v10  ;;  %v4269_v3 = vpop.f32.mrf.mxu3 }
 0x567   : > { %v3731_v36 = vpop.f32.mrf.mxu1  ;;  %v4310_v9 = vmul.f32 %v9867_v20, %v4269_v3 }
 0x568   : > { %v4627_v12 = vadd.f32 %v4595_v28, %v4371_v40  ;;  %v3780_v43 = vmul.f32 %v9873_v46, %v3731_v36  ;;  %v4653_v13 = vpop.trf.xlu0 }
 0x569   : > { %v4345_v28 = vadd.f32 %v9880_v14, %v4310_v9  ;;  %4701 = vst [vmem:[%s10089_s23] sm:$0xff] %v4653_v13 }
 0x56a   : > { %v3815_v37 = vadd.f32 %v9885_v16, %v3780_v43  ;;  %4675 = vxpose.xlu1.b32.cont [7/16] (narrow) %v4627_v12, 8  ;;  %v4556_v43 = vpop.permute.xlu2 %4555 }
 0x56b   : > { %v4377_v2 = vmax.f32 %v4345_v28, 0.0 }
 0x56c   : > { %v3847_v53 = vmax.f32 %v3815_v37, 0.0 }
 0x56e   : > { %v4596_v7 = vmul.f32 %v4531_v29, %v3847_v53  ;;  %v4271_v10 = vpop.f32.mrf.mxu3 }
 0x56f   : > { %v3734_v38 = vpop.f32.mrf.mxu1  ;;  %v4311_v37 = vmul.f32 %v9867_v20, %v4271_v10 }
 0x570   : > { %v4628_v26 = vadd.f32 %v4596_v7, %v4372_v31  ;;  %v3781_v34 = vmul.f32 %v9873_v46, %v3734_v38 }
 0x571   : > { %v4346_v38 = vadd.f32 %v9880_v14, %v4311_v37 }
 0x572   : > { %v3816_v45 = vadd.f32 %v9885_v16, %v3781_v34  ;;  %4676 = vxpose.xlu1.b32.cont [8/16] (narrow) %v4628_v26, 8 }
 0x573   : > { %v4378_v5 = vmax.f32 %v4346_v38, 0.0 }
 0x574   : > { %v3848_v8 = vmax.f32 %v3816_v45, 0.0 }
 0x576   : > { %v4597_v33 = vmul.f32 %v4536_v44, %v3848_v8  ;;  %v4274_v7 = vpop.f32.mrf.mxu3 }
 0x577   : > { %v3736_v41 = vpop.f32.mrf.mxu1  ;;  %v4312_v55 = vmul.f32 %v9867_v20, %v4274_v7 }
 0x578   : > { %v4629_v4 = vadd.f32 %v4597_v33, %v4373_v49  ;;  %v3782_v11 = vmul.f32 %v9873_v46, %v3736_v41 }
 0x579   : > { %v4347_v52 = vadd.f32 %v9880_v14, %v4312_v55 }
 0x57a   : > { %v3817_v1 = vadd.f32 %v9885_v16, %v3782_v11  ;;  %4677 = vxpose.xlu1.b32.cont [9/16] (narrow) %v4629_v4, 8  ;;  %v4566_v11 = vpop.permute.xlu1 %4565 }
 0x57b   : > { %v4379_v50 = vmax.f32 %v4347_v52, 0.0 }
 0x57c   : > { %v3849_v15 = vmax.f32 %v3817_v1, 0.0 }
 0x57e   : > { %v4598_v19 = vmul.f32 %v4541_v51, %v3849_v15  ;;  %v4276_v41 = vpop.f32.mrf.mxu3 }
 0x57f   : > { %v3739_v18 = vpop.f32.mrf.mxu1  ;;  %v4313_v1 = vmul.f32 %v9867_v20, %v4276_v41 }
 0x580   : > { %v4630_v42 = vadd.f32 %v4598_v19, %v4374_v59  ;;  %v3783_v22 = vmul.f32 %v9873_v46, %v3739_v18 }
 0x581   : > { %v4348_v21 = vadd.f32 %v9880_v14, %v4313_v1 }
 0x582   : > { %v3818_v23 = vadd.f32 %v9885_v16, %v3783_v22  ;;  %4678 = vxpose.xlu1.b32.cont [10/16] (narrow) %v4630_v42, 8 }
 0x583   : > { %v4380_v42 = vmax.f32 %v4348_v21, 0.0 }
 0x584   : > { %v3850_v48 = vmax.f32 %v3818_v23, 0.0 }
 0x586   : > { %v4599_v63 = vmul.f32 %v4546_v60, %v3850_v48  ;;  %v4571_v60 = vpop.permute.xlu2 %4570 }
 0x587   : > { %v3741_v24 = vpop.f32.mrf.mxu1 }
 0x588   : > { %v4631_v54 = vadd.f32 %v4599_v63, %v4375_v17  ;;  %v3784_v35 = vmul.f32 %v9873_v46, %v3741_v24 }
 0x58a   : > { %v3819_v39 = vadd.f32 %v9885_v16, %v3784_v35  ;;  %4679 = vxpose.xlu1.b32.cont [11/16] (narrow) %v4631_v54, 8 }
 0x58c   : > { %v3851_v58 = vmax.f32 %v3819_v39, 0.0 }
 0x58e   : > { %v4600_v62 = vmul.f32 %v4551_v27, %v3851_v58 }
 0x58f   : > { %v3744_v56 = vpop.f32.mrf.mxu1 }
 0x590   : > { %v4632_v40 = vadd.f32 %v4600_v62, %v4376_v57  ;;  %v3785_v47 = vmul.f32 %v9873_v46, %v3744_v56 }
 0x592   : > { %v3820_v36 = vadd.f32 %v9885_v16, %v3785_v47  ;;  %4680 = vxpose.xlu1.b32.cont [12/16] (narrow) %v4632_v40, 8 }
 0x594   : > { %v3852_v12 = vmax.f32 %v3820_v36, 0.0 }
 0x596   : > { %v4601_v53 = vmul.f32 %v4556_v43, %v3852_v12 }
 0x597   : > { %v3746_v29 = vpop.f32.mrf.mxu1 }
 0x598   : > { %v4633_v31 = vadd.f32 %v4601_v53, %v4377_v2  ;;  %v3786_v32 = vmul.f32 %v9873_v46, %v3746_v29 }
 0x59a   : > { %v3821_v26 = vadd.f32 %v9885_v16, %v3786_v32  ;;  %4681 = vxpose.xlu1.b32.cont [13/16] (narrow) %v4633_v31, 8 }
 0x59c   : > { %v3853_v34 = vmax.f32 %v3821_v26, 0.0 }
 0x59e   : > { %v4602_v45 = vmul.f32 %v4561_v0, %v3853_v34 }
 0x59f   : > { %v3749_v8 = vpop.f32.mrf.mxu1 }
 0x5a0   : > { %v4634_v44 = vadd.f32 %v4602_v45, %v4378_v5  ;;  %v3787_v49 = vmul.f32 %v9873_v46, %v3749_v8 }
 0x5a2   : > { %v3822_v33 = vadd.f32 %v9885_v16, %v3787_v49  ;;  %4682 = vxpose.xlu1.b32.cont [14/16] (narrow) %v4634_v44, 8 }
 0x5a4   : > { %v3854_v4 = vmax.f32 %v3822_v33, 0.0 }
 0x5a6   : > { %v4603_v6 = vmul.f32 %v4566_v11, %v3854_v4 }
 0x5a7   : > { %v3751_v15 = vpop.f32.mrf.mxu1 }
 0x5a8   : > { %v4635_v51 = vadd.f32 %v4603_v6, %v4379_v50  ;;  %v3788_v59 = vmul.f32 %v9873_v46, %v3751_v15 }
 0x5aa   : > { %v3823_v19 = vadd.f32 %v9885_v16, %v3788_v59  ;;  %4683 = vxpose.xlu1.b32.cont [15/16] (narrow) %v4635_v51, 8 }
 0x5ac   : > { %v3855_v18 = vmax.f32 %v3823_v19, 0.0 }
 0x5ae   : > { %v4604_v22 = vmul.f32 %v4571_v60, %v3855_v18 }
 0x5b0   : > { %v4636_v25 = vadd.f32 %v4604_v22, %v4380_v42 }
 0x5b2   : > { %4684 = vxpose.xlu1.b32.end [16/16] (narrow) %v4636_v25, 8 }
 0x5de   : > { %v4685_v23 = vpop.trf.xlu1 }
 0x5df   : > { %4702 = vst [vmem:[%s10089_s23 + $0x8] sm:$0xff] %v4685_v23 }
 0x5e0 PF: > { %s24_s29 = sadd.s32 1, %s6203_s29  }
 0x5e1   : > { %p21_p6 = scmp.ge.s32.totalorder %s24_s29, 4  }
 0x5e3   :  { %23 = sbr.rel (!%p21_p6) target bundleno = 1 (0x1), region = 109 }

</bundles_post_ra>
